<compile_context>
chip_gen: v6e
topology: v6e:2x2x1
jax: 0.10.0
libtpu: 0.0.40
codegen_flags: <defaults>
</compile_context>

<pallas_src>
import functools

import jax
import jax.numpy as jnp
from jax.experimental import pallas as pl
from jax.experimental.pallas import tpu as pltpu

BN_EPS = 1e-5
LANE = 128


def _round_up(n, m):
    return ((n + m - 1) // m) * m


# ----------------------------------------------------------------------------
# Pallas kernels: one fused kernel per TinyBlockDWT (per batch element)
# ----------------------------------------------------------------------------
def _tiny_block_s1_kernel(xp_ref, w1_ref, b1_ref, w2_ref, ws_ref, bo_ref,
                          o_ref, *, H, W, Cin):
    """Fused stride-1 TinyBlockDWT.

    xp_ref: (H+2, W+2, Cin) bf16 padded input (one batch element)
    w1_ref: (9*Cin, Cmid)   bf16, BN1 scale folded;  b1_ref: (1, Cmid) f32
    w2_ref: (Cmid, Cpad)    bf16, BN2 scale folded
    ws_ref: (Cin, Cpad)     bf16 shortcut conv (BN folded) or zero-padded identity
    bo_ref: (1, Cpad)       f32  (BN2 bias + shortcut-BN bias, pre-summed)
    o_ref : (H*W, Cpad)     bf16 (wrapper reshapes back to (H, W, Cout))
    """
    cmid = w1_ref.shape[1]
    xfull = xp_ref[...]                                   # (H+2, W+2, Cin) bf16, one load
    w1 = w1_ref[...]                                      # (9*Cin, Cmid)   bf16, one load

    # conv1: 3x3 pad=1 as 9 shifted whole-image MXU matmuls, f32 accumulate.
    acc = jnp.zeros((H * W, cmid), jnp.float32)
    x_center = None
    for dy in range(3):
        for dx in range(3):
            tap = dy * 3 + dx
            win = xfull[dy:dy + H, dx:dx + W, :].reshape(H * W, Cin)   # bf16
            if tap == 4:                                   # (dy=1, dx=1) == unpadded center
                x_center = win                             # reused for the shortcut below
            acc += jnp.dot(win, w1[tap * Cin:(tap + 1) * Cin, :],
                           preferred_element_type=jnp.float32)
    mid = jnp.maximum(acc + b1_ref[...], 0.0).astype(jnp.bfloat16)

    # conv2 (1x1, BN2 folded) + shortcut (1x1 conv + BN, or identity via padded eye).
    y = jnp.dot(mid, w2_ref[...], preferred_element_type=jnp.float32)
    sc = jnp.dot(x_center, ws_ref[...], preferred_element_type=jnp.float32)
    o_ref[...] = jnp.maximum(y + sc + bo_ref[...], 0.0).astype(o_ref.dtype)


def _tiny_block_s2_kernel(xs_ref, wd_ref, b1_ref, w2_ref, ws_ref, bo_ref,
                          o_ref, *, Cin):
    """Fused stride-2 TinyBlockDWT (Haar DWT downsampling path).

    xs_ref: (Ho*Wo, 4*Cin) bf16 space-to-depth rows, channel order (dy, dx, c)
    wd_ref: (4*Cin, 4*Cin) bf16 Haar matrix with BN1 scale folded; b1_ref: (1, 4*Cin) f32
    w2_ref: (4*Cin, Cpad)  bf16, BN2 scale folded
    ws_ref: (Cin, Cpad)    bf16 stride-2 1x1 shortcut (acts on the top-left subpixel,
                           i.e. the first Cin channels of xs)
    bo_ref: (1, Cpad)      f32  (BN2 bias + shortcut-BN bias, pre-summed)
    o_ref : (Ho*Wo, Cpad)  bf16
    """
    xr = xs_ref[...]                                      # (rows, 4*Cin) bf16
    mid = jnp.dot(xr, wd_ref[...], preferred_element_type=jnp.float32) + b1_ref[...]
    mid = jnp.maximum(mid, 0.0).astype(jnp.bfloat16)
    y = jnp.dot(mid, w2_ref[...], preferred_element_type=jnp.float32)
    sc = jnp.dot(xr[:, :Cin], ws_ref[...], preferred_element_type=jnp.float32)
    o_ref[...] = jnp.maximum(y + sc + bo_ref[...], 0.0).astype(o_ref.dtype)


# ----------------------------------------------------------------------------
# Wrappers (layout plumbing only; all hot compute is inside the kernels above)
# ----------------------------------------------------------------------------
_COMPILER_PARAMS = pltpu.CompilerParams(
    dimension_semantics=("parallel",),        # >= 2 grid steps -> both v7x TensorCores
    vmem_limit_bytes=32 * 1024 * 1024,
)


def _space_to_depth_rows(x):
    """(B, H, W, C) -> (B, (H//2)*(W//2), 4C); channel order (dy, dx, c)."""
    B, H, W, C = x.shape
    x = x.reshape(B, H // 2, 2, W // 2, 2, C)
    x = jnp.transpose(x, (0, 1, 3, 2, 4, 5))
    return x.reshape(B, (H // 2) * (W // 2), 4 * C)


def _run_block_s1(prep, x):
    """x: (B, H, W, Cin) bf16 NHWC -> (B, H, W, Cout) bf16."""
    B, H, W, Cin = x.shape
    cmid = prep["w1"].shape[1]
    cpad = prep["w2"].shape[1]
    xp = jnp.pad(x, ((0, 0), (1, 1), (1, 1), (0, 0)))
    out = pl.pallas_call(
        functools.partial(_tiny_block_s1_kernel, H=H, W=W, Cin=Cin),
        out_shape=jax.ShapeDtypeStruct((B, H * W, cpad), jnp.bfloat16),
        grid=(B,),
        in_specs=[
            pl.BlockSpec((None, H + 2, W + 2, Cin), lambda b: (b, 0, 0, 0)),
            pl.BlockSpec((9 * Cin, cmid), lambda b: (0, 0)),
            pl.BlockSpec((1, cmid), lambda b: (0, 0)),
            pl.BlockSpec((cmid, cpad), lambda b: (0, 0)),
            pl.BlockSpec((Cin, cpad), lambda b: (0, 0)),
            pl.BlockSpec((1, cpad), lambda b: (0, 0)),
        ],
        out_specs=pl.BlockSpec((None, H * W, cpad), lambda b: (b, 0, 0)),
        compiler_params=_COMPILER_PARAMS,
    )(xp, prep["w1"], prep["b1"], prep["w2"], prep["ws"], prep["b_out"])
    cout = prep["cout"]
    return out[..., :cout].reshape(B, H, W, cout)       # drop lane padding, back to NHWC


def _run_block_s2(prep, x):
    """x: (B, H, W, Cin) bf16 NHWC -> (B, H//2, W//2, Cout) bf16."""
    B, H, W, Cin = x.shape
    Ho, Wo = H // 2, W // 2
    rows = Ho * Wo
    c4 = 4 * Cin
    cpad = prep["w2"].shape[1]
    xs = _space_to_depth_rows(x)            # pure permutation (no data duplication)
    out = pl.pallas_call(
        functools.partial(_tiny_block_s2_kernel, Cin=Cin),
        out_shape=jax.ShapeDtypeStruct((B, rows, cpad), jnp.bfloat16),
        grid=(B,),
        in_specs=[
            pl.BlockSpec((None, rows, c4), lambda b: (b, 0, 0)),
            pl.BlockSpec((c4, c4), lambda b: (0, 0)),
            pl.BlockSpec((1, c4), lambda b: (0, 0)),
            pl.BlockSpec((c4, cpad), lambda b: (0, 0)),
            pl.BlockSpec((Cin, cpad), lambda b: (0, 0)),
            pl.BlockSpec((1, cpad), lambda b: (0, 0)),
        ],
        out_specs=pl.BlockSpec((None, rows, cpad), lambda b: (b, 0, 0)),
        compiler_params=_COMPILER_PARAMS,
    )(xs, prep["wdwt"], prep["b1"], prep["w2"], prep["ws"], prep["b_out"])
    cout = prep["cout"]
    return out[..., :cout].reshape(B, Ho, Wo, cout)


def tiny_block_forward(prep, x):
    return _run_block_s2(prep, x) if prep["stride"] == 2 else _run_block_s1(prep, x)


# ----------------------------------------------------------------------------
# Parameters (synthetic init mirroring the PyTorch module) + offline BN folding
# ----------------------------------------------------------------------------
def _default_bn(c):
    # PyTorch BatchNorm2d default init, eval mode.
    return dict(gamma=jnp.ones((c,), jnp.float32), beta=jnp.zeros((c,), jnp.float32),
                mean=jnp.zeros((c,), jnp.float32), var=jnp.ones((c,), jnp.float32))


def _fold_bn(bn):
    scale = bn["gamma"] / jnp.sqrt(bn["var"] + BN_EPS)
    bias = bn["beta"] - bn["mean"] * scale
    return scale, bias


def _conv_w(key, kh, kw, cin, cout):
    w = jax.random.normal(key, (kh, kw, cin, cout), jnp.float32) * 0.1
    return w if kh > 1 else w[0, 0]


def init_tiny_block_dwt(key, in_planes, planes, stride=1):
    """Raw parameters mirroring TinyBlockDWT(in_planes, planes, stride)."""
    ks = jax.random.split(key, 3)
    p = dict(in_planes=in_planes, planes=planes, stride=stride)
    if stride == 2:
        p["bn1"] = _default_bn(in_planes * 4)       # conv1 = DWTForward (no weights)
        p["w2"] = _conv_w(ks[0], 1, 1, in_planes * 4, planes)
    else:
        p["w1"] = _conv_w(ks[0], 3, 3, in_planes, planes // 2)
        p["bn1"] = _default_bn(planes // 2)
        p["w2"] = _conv_w(ks[1], 1, 1, planes // 2, planes)
    p["bn2"] = _default_bn(planes)
    if stride != 1 or in_planes != planes:
        p["ws"] = _conv_w(ks[2], 1, 1, in_planes, planes)
        p["bns"] = _default_bn(planes)
    return p


def _haar_dwt_matrix(cin, bn1_scale):
    # Rows: space-to-depth patch channels ((dy,dx,c) order); cols: [LL, LH, HL, HH] x cin.
    haar = 0.5 * jnp.array([[1.,  1.,  1.,  1.],     # LL
                            [1., -1.,  1., -1.],     # LH
                            [1.,  1., -1., -1.],     # HL
                            [1., -1., -1.,  1.]],    # HH
                           jnp.float32)
    w = jnp.kron(haar.T, jnp.eye(cin, dtype=jnp.float32))   # (4*cin, 4*cin)
    return w * bn1_scale[None, :]                            # fold BN1 scale into the DWT


def _pad_cols(a, n):
    return jnp.pad(a, ((0, 0), (0, n - a.shape[-1])))


def prepare_tiny_block(raw):
    """Fold eval-mode BN into weights, pad output channels to a lane multiple, cast bf16."""
    in_planes, planes, stride = raw["in_planes"], raw["planes"], raw["stride"]
    cpad = _round_up(planes, LANE)
    prep = dict(stride=stride, cout=planes)
    s1, b1 = _fold_bn(raw["bn1"])
    s2, b2 = _fold_bn(raw["bn2"])
    if stride == 2:
        prep["wdwt"] = _haar_dwt_matrix(in_planes, s1).astype(jnp.bfloat16)
        prep["b1"] = b1.reshape(1, -1)
    else:
        cmid = planes // 2
        w1 = (raw["w1"] * s1[None, None, None, :]).reshape(9 * in_planes, cmid)
        prep["w1"] = w1.astype(jnp.bfloat16)
        prep["b1"] = b1.reshape(1, cmid)
    prep["w2"] = _pad_cols(raw["w2"] * s2[None, :], cpad).astype(jnp.bfloat16)
    if "ws" in raw:
        ss, bs = _fold_bn(raw["bns"])
        ws = raw["ws"] * ss[None, :]
    else:                                    # identity shortcut (stride==1, cin==cout)
        ws = jnp.eye(in_planes, planes, dtype=jnp.float32)
        bs = jnp.zeros((planes,), jnp.float32)
    prep["ws"] = _pad_cols(ws, cpad).astype(jnp.bfloat16)
    # Single fused bias: BN2 bias + shortcut-BN bias (both land before the final ReLU).
    prep["b_out"] = _pad_cols((b2 + bs).reshape(1, -1), cpad)
    return prep


# ----------------------------------------------------------------------------
# Pure-JAX reference (consumes the same folded bf16 params) for validation
# ----------------------------------------------------------------------------
def _ref_block(prep, x):
    xf = x.astype(jnp.float32)
    cout = prep["cout"]
    if prep["stride"] == 2:
        B, H, W, Cin = x.shape
        xs = _space_to_depth_rows(xf)                              # (B, rows, 4*Cin)
        mid = jnp.maximum(xs @ prep["wdwt"].astype(jnp.float32) + prep["b1"], 0.0)
        mid = mid.astype(jnp.bfloat16).astype(jnp.float32)
        y = mid @ prep["w2"].astype(jnp.float32)
        sc = xs[..., :Cin] @ prep["ws"].astype(jnp.float32)
        out = jnp.maximum(y + sc + prep["b_out"], 0.0)[..., :cout]
        return out.reshape(B, H // 2, W // 2, cout)
    else:
        B, H, W, Cin = xf.shape
        xp = jnp.pad(xf, ((0, 0), (1, 1), (1, 1), (0, 0)))
        w1 = prep["w1"].astype(jnp.float32)
        acc = 0.0
        for dy in range(3):
            for dx in range(3):
                tap = dy * 3 + dx
                acc = acc + xp[:, dy:dy + H, dx:dx + W, :] @ w1[tap * Cin:(tap + 1) * Cin]
        mid = jnp.maximum(acc + prep["b1"], 0.0).astype(jnp.bfloat16).astype(jnp.float32)
        y = mid @ prep["w2"].astype(jnp.float32)
        sc = xf @ prep["ws"].astype(jnp.float32)
        return jnp.maximum(y + sc + prep["b_out"], 0.0)[..., :cout]


# ----------------------------------------------------------------------------
if __name__ == "__main__":
    root = jax.random.PRNGKey(0)
    k_param, k_input = jax.random.split(root)
    kA, kB, kC = jax.random.split(k_param, 3)

    # Three TinyBlockDWT configs covering every branch of the module:
    #   A: stride=1, conv+BN shortcut   (in_planes != planes)
    #   B: stride=1, identity shortcut  (in_planes == planes)
    #   C: stride=2, DWT downsampling + strided conv shortcut
    blocks = [
        prepare_tiny_block(init_tiny_block_dwt(kA, 4, 32, stride=1)),
        prepare_tiny_block(init_tiny_block_dwt(kB, 32, 32, stride=1)),
        prepare_tiny_block(init_tiny_block_dwt(kC, 32, 64, stride=2)),
    ]

    x = jax.random.normal(k_input, (2, 4, 16, 16), jnp.float32)   # NCHW

    @jax.jit
    def forward(x_nchw):
        h = jnp.transpose(x_nchw, (0, 2, 3, 1)).astype(jnp.bfloat16)   # NCHW -> NHWC bf16
        for prep in blocks:
            h = tiny_block_forward(prep, h)
        return jnp.transpose(h, (0, 3, 1, 2)).astype(jnp.float32)      # NHWC -> NCHW

    out = jax.block_until_ready(forward(x))
    assert out.shape == (2, 64, 8, 8), out.shape
    assert bool(jnp.all(jnp.isfinite(out)))

    # Validate against the pure-JAX reference (same folded bf16 params).
    h = jnp.transpose(x, (0, 2, 3, 1)).astype(jnp.bfloat16)
    for prep in blocks:
        h = _ref_block(prep, h).astype(jnp.bfloat16)
    ref = jnp.transpose(h, (0, 3, 1, 2)).astype(jnp.float32)
    assert bool(jnp.allclose(out, ref, atol=5e-2, rtol=5e-2)), \
        float(jnp.max(jnp.abs(out - ref)))

    print("KERNEL_OK")
</pallas_src>

<mosaic_0001>
module attributes {stable_mosaic.version = 11 : i64} {
  func.func @_tiny_block_s1_kernel(%arg0: i32, %arg1: memref<1x18x18x32xbf16, #tpu.memory_space<vmem>>, %arg2: memref<288x16xbf16, #tpu.memory_space<vmem>>, %arg3: memref<1x16xf32, #tpu.memory_space<vmem>>, %arg4: memref<16x128xbf16, #tpu.memory_space<vmem>>, %arg5: memref<32x128xbf16, #tpu.memory_space<vmem>>, %arg6: memref<1x128xf32, #tpu.memory_space<vmem>>, %arg7: memref<1x256x128xbf16, #tpu.memory_space<vmem>>) attributes {dimension_semantics = [#tpu.dimension_semantics<parallel>], iteration_bounds = array<i64: 2>, scalar_prefetch = 0 : i64, scratch_operands = 0 : i64, tpu.core_type = #tpu.core_type<tc>, window_params = [{transform_indices = @transform_0, window_bounds = array<i64: 1, 18, 18, 32>}, {pipeline_mode = #tpu.pipeline_mode<synchronous>, transform_indices = @transform_1, window_bounds = array<i64: 288, 16>}, {pipeline_mode = #tpu.pipeline_mode<synchronous>, transform_indices = @transform_2, window_bounds = array<i64: 1, 16>}, {pipeline_mode = #tpu.pipeline_mode<synchronous>, transform_indices = @transform_3, window_bounds = array<i64: 16, 128>}, {pipeline_mode = #tpu.pipeline_mode<synchronous>, transform_indices = @transform_4, window_bounds = array<i64: 32, 128>}, {pipeline_mode = #tpu.pipeline_mode<synchronous>, transform_indices = @transform_5, window_bounds = array<i64: 1, 128>}, {transform_indices = @transform_6, window_bounds = array<i64: 1, 256, 128>}]} {
    %c0 = arith.constant 0 : index
    %c0_0 = arith.constant 0 : index
    %c0_1 = arith.constant 0 : index
    %c0_2 = arith.constant 0 : index
    %0 = vector.load %arg1[%c0, %c0_0, %c0_1, %c0_2] : memref<1x18x18x32xbf16, #tpu.memory_space<vmem>>, vector<1x18x18x32xbf16>
    %1 = vector.shape_cast %0 : vector<1x18x18x32xbf16> to vector<18x18x32xbf16>
    %c0_3 = arith.constant 0 : index
    %c0_4 = arith.constant 0 : index
    %2 = vector.load %arg2[%c0_3, %c0_4] : memref<288x16xbf16, #tpu.memory_space<vmem>>, vector<288x16xbf16>
    %cst = arith.constant 0.000000e+00 : f32
    %3 = vector.broadcast %cst : f32 to vector<256x16xf32>
    %4 = vector.extract_strided_slice %1 {offsets = [0, 0, 0], sizes = [16, 16, 32], strides = [1, 1, 1]} : vector<18x18x32xbf16> to vector<16x16x32xbf16>
    %5 = vector.shape_cast %4 : vector<16x16x32xbf16> to vector<256x32xbf16>
    %6 = vector.extract_strided_slice %2 {offsets = [0, 0], sizes = [32, 16], strides = [1, 1]} : vector<288x16xbf16> to vector<32x16xbf16>
    %cst_5 = arith.constant dense<0.000000e+00> : vector<256x16xf32>
    %7 = tpu.matmul %5, %6, %cst_5 {dimension_numbers = #tpu.dot_dimension_numbers<[1], [0], [0], [1], [0, 0, 1, 1], [], []>} : vector<256x32xbf16>, vector<32x16xbf16>, vector<256x16xf32> -> vector<256x16xf32>
    %8 = arith.addf %3, %7 : vector<256x16xf32>
    %9 = vector.extract_strided_slice %1 {offsets = [0, 1, 0], sizes = [16, 16, 32], strides = [1, 1, 1]} : vector<18x18x32xbf16> to vector<16x16x32xbf16>
    %10 = vector.shape_cast %9 : vector<16x16x32xbf16> to vector<256x32xbf16>
    %11 = vector.extract_strided_slice %2 {offsets = [32, 0], sizes = [32, 16], strides = [1, 1]} : vector<288x16xbf16> to vector<32x16xbf16>
    %cst_6 = arith.constant dense<0.000000e+00> : vector<256x16xf32>
    %12 = tpu.matmul %10, %11, %cst_6 {dimension_numbers = #tpu.dot_dimension_numbers<[1], [0], [0], [1], [0, 0, 1, 1], [], []>} : vector<256x32xbf16>, vector<32x16xbf16>, vector<256x16xf32> -> vector<256x16xf32>
    %13 = arith.addf %8, %12 : vector<256x16xf32>
    %14 = vector.extract_strided_slice %1 {offsets = [0, 2, 0], sizes = [16, 16, 32], strides = [1, 1, 1]} : vector<18x18x32xbf16> to vector<16x16x32xbf16>
    %15 = vector.shape_cast %14 : vector<16x16x32xbf16> to vector<256x32xbf16>
    %16 = vector.extract_strided_slice %2 {offsets = [64, 0], sizes = [32, 16], strides = [1, 1]} : vector<288x16xbf16> to vector<32x16xbf16>
    %cst_7 = arith.constant dense<0.000000e+00> : vector<256x16xf32>
    %17 = tpu.matmul %15, %16, %cst_7 {dimension_numbers = #tpu.dot_dimension_numbers<[1], [0], [0], [1], [0, 0, 1, 1], [], []>} : vector<256x32xbf16>, vector<32x16xbf16>, vector<256x16xf32> -> vector<256x16xf32>
    %18 = arith.addf %13, %17 : vector<256x16xf32>
    %19 = vector.extract_strided_slice %1 {offsets = [1, 0, 0], sizes = [16, 16, 32], strides = [1, 1, 1]} : vector<18x18x32xbf16> to vector<16x16x32xbf16>
    %20 = vector.shape_cast %19 : vector<16x16x32xbf16> to vector<256x32xbf16>
    %21 = vector.extract_strided_slice %2 {offsets = [96, 0], sizes = [32, 16], strides = [1, 1]} : vector<288x16xbf16> to vector<32x16xbf16>
    %cst_8 = arith.constant dense<0.000000e+00> : vector<256x16xf32>
    %22 = tpu.matmul %20, %21, %cst_8 {dimension_numbers = #tpu.dot_dimension_numbers<[1], [0], [0], [1], [0, 0, 1, 1], [], []>} : vector<256x32xbf16>, vector<32x16xbf16>, vector<256x16xf32> -> vector<256x16xf32>
    %23 = arith.addf %18, %22 : vector<256x16xf32>
    %24 = vector.extract_strided_slice %1 {offsets = [1, 1, 0], sizes = [16, 16, 32], strides = [1, 1, 1]} : vector<18x18x32xbf16> to vector<16x16x32xbf16>
    %25 = vector.shape_cast %24 : vector<16x16x32xbf16> to vector<256x32xbf16>
    %26 = vector.extract_strided_slice %2 {offsets = [128, 0], sizes = [32, 16], strides = [1, 1]} : vector<288x16xbf16> to vector<32x16xbf16>
    %cst_9 = arith.constant dense<0.000000e+00> : vector<256x16xf32>
    %27 = tpu.matmul %25, %26, %cst_9 {dimension_numbers = #tpu.dot_dimension_numbers<[1], [0], [0], [1], [0, 0, 1, 1], [], []>} : vector<256x32xbf16>, vector<32x16xbf16>, vector<256x16xf32> -> vector<256x16xf32>
    %28 = arith.addf %23, %27 : vector<256x16xf32>
    %29 = vector.extract_strided_slice %1 {offsets = [1, 2, 0], sizes = [16, 16, 32], strides = [1, 1, 1]} : vector<18x18x32xbf16> to vector<16x16x32xbf16>
    %30 = vector.shape_cast %29 : vector<16x16x32xbf16> to vector<256x32xbf16>
    %31 = vector.extract_strided_slice %2 {offsets = [160, 0], sizes = [32, 16], strides = [1, 1]} : vector<288x16xbf16> to vector<32x16xbf16>
    %cst_10 = arith.constant dense<0.000000e+00> : vector<256x16xf32>
    %32 = tpu.matmul %30, %31, %cst_10 {dimension_numbers = #tpu.dot_dimension_numbers<[1], [0], [0], [1], [0, 0, 1, 1], [], []>} : vector<256x32xbf16>, vector<32x16xbf16>, vector<256x16xf32> -> vector<256x16xf32>
    %33 = arith.addf %28, %32 : vector<256x16xf32>
    %34 = vector.extract_strided_slice %1 {offsets = [2, 0, 0], sizes = [16, 16, 32], strides = [1, 1, 1]} : vector<18x18x32xbf16> to vector<16x16x32xbf16>
    %35 = vector.shape_cast %34 : vector<16x16x32xbf16> to vector<256x32xbf16>
    %36 = vector.extract_strided_slice %2 {offsets = [192, 0], sizes = [32, 16], strides = [1, 1]} : vector<288x16xbf16> to vector<32x16xbf16>
    %cst_11 = arith.constant dense<0.000000e+00> : vector<256x16xf32>
    %37 = tpu.matmul %35, %36, %cst_11 {dimension_numbers = #tpu.dot_dimension_numbers<[1], [0], [0], [1], [0, 0, 1, 1], [], []>} : vector<256x32xbf16>, vector<32x16xbf16>, vector<256x16xf32> -> vector<256x16xf32>
    %38 = arith.addf %33, %37 : vector<256x16xf32>
    %39 = vector.extract_strided_slice %1 {offsets = [2, 1, 0], sizes = [16, 16, 32], strides = [1, 1, 1]} : vector<18x18x32xbf16> to vector<16x16x32xbf16>
    %40 = vector.shape_cast %39 : vector<16x16x32xbf16> to vector<256x32xbf16>
    %41 = vector.extract_strided_slice %2 {offsets = [224, 0], sizes = [32, 16], strides = [1, 1]} : vector<288x16xbf16> to vector<32x16xbf16>
    %cst_12 = arith.constant dense<0.000000e+00> : vector<256x16xf32>
    %42 = tpu.matmul %40, %41, %cst_12 {dimension_numbers = #tpu.dot_dimension_numbers<[1], [0], [0], [1], [0, 0, 1, 1], [], []>} : vector<256x32xbf16>, vector<32x16xbf16>, vector<256x16xf32> -> vector<256x16xf32>
    %43 = arith.addf %38, %42 : vector<256x16xf32>
    %44 = vector.extract_strided_slice %1 {offsets = [2, 2, 0], sizes = [16, 16, 32], strides = [1, 1, 1]} : vector<18x18x32xbf16> to vector<16x16x32xbf16>
    %45 = vector.shape_cast %44 : vector<16x16x32xbf16> to vector<256x32xbf16>
    %46 = vector.extract_strided_slice %2 {offsets = [256, 0], sizes = [32, 16], strides = [1, 1]} : vector<288x16xbf16> to vector<32x16xbf16>
    %cst_13 = arith.constant dense<0.000000e+00> : vector<256x16xf32>
    %47 = tpu.matmul %45, %46, %cst_13 {dimension_numbers = #tpu.dot_dimension_numbers<[1], [0], [0], [1], [0, 0, 1, 1], [], []>} : vector<256x32xbf16>, vector<32x16xbf16>, vector<256x16xf32> -> vector<256x16xf32>
    %48 = arith.addf %43, %47 : vector<256x16xf32>
    %c0_14 = arith.constant 0 : index
    %c0_15 = arith.constant 0 : index
    %49 = vector.load %arg3[%c0_14, %c0_15] : memref<1x16xf32, #tpu.memory_space<vmem>>, vector<1x16xf32>
    %50 = vector.broadcast %49 : vector<1x16xf32> to vector<256x16xf32>
    %51 = arith.addf %48, %50 : vector<256x16xf32>
    %cst_16 = arith.constant 0.000000e+00 : f32
    %52 = vector.broadcast %cst_16 : f32 to vector<256x16xf32>
    %53 = arith.maximumf %51, %52 : vector<256x16xf32>
    %54 = arith.truncf %53 : vector<256x16xf32> to vector<256x16xbf16>
    %c0_17 = arith.constant 0 : index
    %c0_18 = arith.constant 0 : index
    %55 = vector.load %arg4[%c0_17, %c0_18] : memref<16x128xbf16, #tpu.memory_space<vmem>>, vector<16x128xbf16>
    %cst_19 = arith.constant dense<0.000000e+00> : vector<256x128xf32>
    %56 = tpu.matmul %54, %55, %cst_19 {dimension_numbers = #tpu.dot_dimension_numbers<[1], [0], [0], [1], [0, 0, 1, 1], [], []>} : vector<256x16xbf16>, vector<16x128xbf16>, vector<256x128xf32> -> vector<256x128xf32>
    %c0_20 = arith.constant 0 : index
    %c0_21 = arith.constant 0 : index
    %57 = vector.load %arg5[%c0_20, %c0_21] : memref<32x128xbf16, #tpu.memory_space<vmem>>, vector<32x128xbf16>
    %cst_22 = arith.constant dense<0.000000e+00> : vector<256x128xf32>
    %58 = tpu.matmul %25, %57, %cst_22 {dimension_numbers = #tpu.dot_dimension_numbers<[1], [0], [0], [1], [0, 0, 1, 1], [], []>} : vector<256x32xbf16>, vector<32x128xbf16>, vector<256x128xf32> -> vector<256x128xf32>
    %59 = arith.addf %56, %58 : vector<256x128xf32>
    %c0_23 = arith.constant 0 : index
    %c0_24 = arith.constant 0 : index
    %60 = vector.load %arg6[%c0_23, %c0_24] : memref<1x128xf32, #tpu.memory_space<vmem>>, vector<1x128xf32>
    %61 = vector.broadcast %60 : vector<1x128xf32> to vector<256x128xf32>
    %62 = arith.addf %59, %61 : vector<256x128xf32>
    %cst_25 = arith.constant 0.000000e+00 : f32
    %63 = vector.broadcast %cst_25 : f32 to vector<256x128xf32>
    %64 = arith.maximumf %62, %63 : vector<256x128xf32>
    %65 = arith.truncf %64 : vector<256x128xf32> to vector<256x128xbf16>
    %c0_26 = arith.constant 0 : index
    %c0_27 = arith.constant 0 : index
    %c0_28 = arith.constant 0 : index
    %66 = vector.load %arg7[%c0_26, %c0_27, %c0_28] : memref<1x256x128xbf16, #tpu.memory_space<vmem>>, vector<1x256x128xbf16>
    %67 = vector.shape_cast %66 : vector<1x256x128xbf16> to vector<256x128xbf16>
    %68 = vector.shape_cast %65 : vector<256x128xbf16> to vector<1x256x128xbf16>
    tpu.vector_store %arg7[%c0_26, %c0_27, %c0_28], %68 {strides = array<i32>} : memref<1x256x128xbf16, #tpu.memory_space<vmem>>, vector<1x256x128xbf16>,
    return
  }
  func.func @transform_0(%arg0: i32) -> (i32, i32, i32, i32) {
    %c0_i32 = arith.constant 0 : i32
    %c0_i32_0 = arith.constant 0 : i32
    %c0_i32_1 = arith.constant 0 : i32
    %c0_i32_2 = arith.constant 0 : i32
    return %arg0, %c0_i32, %c0_i32_0, %c0_i32_1 : i32, i32, i32, i32
  }
  func.func @transform_1(%arg0: i32) -> (i32, i32) {
    %c0_i32 = arith.constant 0 : i32
    %c0_i32_0 = arith.constant 0 : i32
    %c0_i32_1 = arith.constant 0 : i32
    return %c0_i32, %c0_i32_0 : i32, i32
  }
  func.func @transform_2(%arg0: i32) -> (i32, i32) {
    %c0_i32 = arith.constant 0 : i32
    %c0_i32_0 = arith.constant 0 : i32
    %c0_i32_1 = arith.constant 0 : i32
    return %c0_i32, %c0_i32_0 : i32, i32
  }
  func.func @transform_3(%arg0: i32) -> (i32, i32) {
    %c0_i32 = arith.constant 0 : i32
    %c0_i32_0 = arith.constant 0 : i32
    %c0_i32_1 = arith.constant 0 : i32
    return %c0_i32, %c0_i32_0 : i32, i32
  }
  func.func @transform_4(%arg0: i32) -> (i32, i32) {
    %c0_i32 = arith.constant 0 : i32
    %c0_i32_0 = arith.constant 0 : i32
    %c0_i32_1 = arith.constant 0 : i32
    return %c0_i32, %c0_i32_0 : i32, i32
  }
  func.func @transform_5(%arg0: i32) -> (i32, i32) {
    %c0_i32 = arith.constant 0 : i32
    %c0_i32_0 = arith.constant 0 : i32
    %c0_i32_1 = arith.constant 0 : i32
    return %c0_i32, %c0_i32_0 : i32, i32
  }
  func.func @transform_6(%arg0: i32) -> (i32, i32, i32) {
    %c0_i32 = arith.constant 0 : i32
    %c0_i32_0 = arith.constant 0 : i32
    %c0_i32_1 = arith.constant 0 : i32
    return %arg0, %c0_i32, %c0_i32_0 : i32, i32, i32
  }
}

module attributes {stable_mosaic.version = 11 : i64} {
  func.func @_tiny_block_s1_kernel(%arg0: i32, %arg1: memref<1x18x18x4xbf16, #tpu.memory_space<vmem>>, %arg2: memref<36x16xbf16, #tpu.memory_space<vmem>>, %arg3: memref<1x16xf32, #tpu.memory_space<vmem>>, %arg4: memref<16x128xbf16, #tpu.memory_space<vmem>>, %arg5: memref<4x128xbf16, #tpu.memory_space<vmem>>, %arg6: memref<1x128xf32, #tpu.memory_space<vmem>>, %arg7: memref<1x256x128xbf16, #tpu.memory_space<vmem>>) attributes {dimension_semantics = [#tpu.dimension_semantics<parallel>], iteration_bounds = array<i64: 2>, scalar_prefetch = 0 : i64, scratch_operands = 0 : i64, tpu.core_type = #tpu.core_type<tc>, window_params = [{transform_indices = @transform_0, window_bounds = array<i64: 1, 18, 18, 4>}, {pipeline_mode = #tpu.pipeline_mode<synchronous>, transform_indices = @transform_1, window_bounds = array<i64: 36, 16>}, {pipeline_mode = #tpu.pipeline_mode<synchronous>, transform_indices = @transform_2, window_bounds = array<i64: 1, 16>}, {pipeline_mode = #tpu.pipeline_mode<synchronous>, transform_indices = @transform_3, window_bounds = array<i64: 16, 128>}, {pipeline_mode = #tpu.pipeline_mode<synchronous>, transform_indices = @transform_4, window_bounds = array<i64: 4, 128>}, {pipeline_mode = #tpu.pipeline_mode<synchronous>, transform_indices = @transform_5, window_bounds = array<i64: 1, 128>}, {transform_indices = @transform_6, window_bounds = array<i64: 1, 256, 128>}]} {
    %c0 = arith.constant 0 : index
    %c0_0 = arith.constant 0 : index
    %c0_1 = arith.constant 0 : index
    %c0_2 = arith.constant 0 : index
    %0 = vector.load %arg1[%c0, %c0_0, %c0_1, %c0_2] : memref<1x18x18x4xbf16, #tpu.memory_space<vmem>>, vector<1x18x18x4xbf16>
    %1 = vector.shape_cast %0 : vector<1x18x18x4xbf16> to vector<18x18x4xbf16>
    %c0_3 = arith.constant 0 : index
    %c0_4 = arith.constant 0 : index
    %2 = vector.load %arg2[%c0_3, %c0_4] : memref<36x16xbf16, #tpu.memory_space<vmem>>, vector<36x16xbf16>
    %cst = arith.constant 0.000000e+00 : f32
    %3 = vector.broadcast %cst : f32 to vector<256x16xf32>
    %4 = vector.extract_strided_slice %1 {offsets = [0, 0, 0], sizes = [16, 16, 4], strides = [1, 1, 1]} : vector<18x18x4xbf16> to vector<16x16x4xbf16>
    %5 = vector.shape_cast %4 : vector<16x16x4xbf16> to vector<256x4xbf16>
    %6 = vector.extract_strided_slice %2 {offsets = [0, 0], sizes = [4, 16], strides = [1, 1]} : vector<36x16xbf16> to vector<4x16xbf16>
    %cst_5 = arith.constant dense<0.000000e+00> : vector<256x16xf32>
    %7 = tpu.matmul %5, %6, %cst_5 {dimension_numbers = #tpu.dot_dimension_numbers<[1], [0], [0], [1], [0, 0, 1, 1], [], []>} : vector<256x4xbf16>, vector<4x16xbf16>, vector<256x16xf32> -> vector<256x16xf32>
    %8 = arith.addf %3, %7 : vector<256x16xf32>
    %9 = vector.extract_strided_slice %1 {offsets = [0, 1, 0], sizes = [16, 16, 4], strides = [1, 1, 1]} : vector<18x18x4xbf16> to vector<16x16x4xbf16>
    %10 = vector.shape_cast %9 : vector<16x16x4xbf16> to vector<256x4xbf16>
    %11 = vector.extract_strided_slice %2 {offsets = [4, 0], sizes = [4, 16], strides = [1, 1]} : vector<36x16xbf16> to vector<4x16xbf16>
    %cst_6 = arith.constant dense<0.000000e+00> : vector<256x16xf32>
    %12 = tpu.matmul %10, %11, %cst_6 {dimension_numbers = #tpu.dot_dimension_numbers<[1], [0], [0], [1], [0, 0, 1, 1], [], []>} : vector<256x4xbf16>, vector<4x16xbf16>, vector<256x16xf32> -> vector<256x16xf32>
    %13 = arith.addf %8, %12 : vector<256x16xf32>
    %14 = vector.extract_strided_slice %1 {offsets = [0, 2, 0], sizes = [16, 16, 4], strides = [1, 1, 1]} : vector<18x18x4xbf16> to vector<16x16x4xbf16>
    %15 = vector.shape_cast %14 : vector<16x16x4xbf16> to vector<256x4xbf16>
    %16 = vector.extract_strided_slice %2 {offsets = [8, 0], sizes = [4, 16], strides = [1, 1]} : vector<36x16xbf16> to vector<4x16xbf16>
    %cst_7 = arith.constant dense<0.000000e+00> : vector<256x16xf32>
    %17 = tpu.matmul %15, %16, %cst_7 {dimension_numbers = #tpu.dot_dimension_numbers<[1], [0], [0], [1], [0, 0, 1, 1], [], []>} : vector<256x4xbf16>, vector<4x16xbf16>, vector<256x16xf32> -> vector<256x16xf32>
    %18 = arith.addf %13, %17 : vector<256x16xf32>
    %19 = vector.extract_strided_slice %1 {offsets = [1, 0, 0], sizes = [16, 16, 4], strides = [1, 1, 1]} : vector<18x18x4xbf16> to vector<16x16x4xbf16>
    %20 = vector.shape_cast %19 : vector<16x16x4xbf16> to vector<256x4xbf16>
    %21 = vector.extract_strided_slice %2 {offsets = [12, 0], sizes = [4, 16], strides = [1, 1]} : vector<36x16xbf16> to vector<4x16xbf16>
    %cst_8 = arith.constant dense<0.000000e+00> : vector<256x16xf32>
    %22 = tpu.matmul %20, %21, %cst_8 {dimension_numbers = #tpu.dot_dimension_numbers<[1], [0], [0], [1], [0, 0, 1, 1], [], []>} : vector<256x4xbf16>, vector<4x16xbf16>, vector<256x16xf32> -> vector<256x16xf32>
    %23 = arith.addf %18, %22 : vector<256x16xf32>
    %24 = vector.extract_strided_slice %1 {offsets = [1, 1, 0], sizes = [16, 16, 4], strides = [1, 1, 1]} : vector<18x18x4xbf16> to vector<16x16x4xbf16>
    %25 = vector.shape_cast %24 : vector<16x16x4xbf16> to vector<256x4xbf16>
    %26 = vector.extract_strided_slice %2 {offsets = [16, 0], sizes = [4, 16], strides = [1, 1]} : vector<36x16xbf16> to vector<4x16xbf16>
    %cst_9 = arith.constant dense<0.000000e+00> : vector<256x16xf32>
    %27 = tpu.matmul %25, %26, %cst_9 {dimension_numbers = #tpu.dot_dimension_numbers<[1], [0], [0], [1], [0, 0, 1, 1], [], []>} : vector<256x4xbf16>, vector<4x16xbf16>, vector<256x16xf32> -> vector<256x16xf32>
    %28 = arith.addf %23, %27 : vector<256x16xf32>
    %29 = vector.extract_strided_slice %1 {offsets = [1, 2, 0], sizes = [16, 16, 4], strides = [1, 1, 1]} : vector<18x18x4xbf16> to vector<16x16x4xbf16>
    %30 = vector.shape_cast %29 : vector<16x16x4xbf16> to vector<256x4xbf16>
    %31 = vector.extract_strided_slice %2 {offsets = [20, 0], sizes = [4, 16], strides = [1, 1]} : vector<36x16xbf16> to vector<4x16xbf16>
    %cst_10 = arith.constant dense<0.000000e+00> : vector<256x16xf32>
    %32 = tpu.matmul %30, %31, %cst_10 {dimension_numbers = #tpu.dot_dimension_numbers<[1], [0], [0], [1], [0, 0, 1, 1], [], []>} : vector<256x4xbf16>, vector<4x16xbf16>, vector<256x16xf32> -> vector<256x16xf32>
    %33 = arith.addf %28, %32 : vector<256x16xf32>
    %34 = vector.extract_strided_slice %1 {offsets = [2, 0, 0], sizes = [16, 16, 4], strides = [1, 1, 1]} : vector<18x18x4xbf16> to vector<16x16x4xbf16>
    %35 = vector.shape_cast %34 : vector<16x16x4xbf16> to vector<256x4xbf16>
    %36 = vector.extract_strided_slice %2 {offsets = [24, 0], sizes = [4, 16], strides = [1, 1]} : vector<36x16xbf16> to vector<4x16xbf16>
    %cst_11 = arith.constant dense<0.000000e+00> : vector<256x16xf32>
    %37 = tpu.matmul %35, %36, %cst_11 {dimension_numbers = #tpu.dot_dimension_numbers<[1], [0], [0], [1], [0, 0, 1, 1], [], []>} : vector<256x4xbf16>, vector<4x16xbf16>, vector<256x16xf32> -> vector<256x16xf32>
    %38 = arith.addf %33, %37 : vector<256x16xf32>
    %39 = vector.extract_strided_slice %1 {offsets = [2, 1, 0], sizes = [16, 16, 4], strides = [1, 1, 1]} : vector<18x18x4xbf16> to vector<16x16x4xbf16>
    %40 = vector.shape_cast %39 : vector<16x16x4xbf16> to vector<256x4xbf16>
    %41 = vector.extract_strided_slice %2 {offsets = [28, 0], sizes = [4, 16], strides = [1, 1]} : vector<36x16xbf16> to vector<4x16xbf16>
    %cst_12 = arith.constant dense<0.000000e+00> : vector<256x16xf32>
    %42 = tpu.matmul %40, %41, %cst_12 {dimension_numbers = #tpu.dot_dimension_numbers<[1], [0], [0], [1], [0, 0, 1, 1], [], []>} : vector<256x4xbf16>, vector<4x16xbf16>, vector<256x16xf32> -> vector<256x16xf32>
    %43 = arith.addf %38, %42 : vector<256x16xf32>
    %44 = vector.extract_strided_slice %1 {offsets = [2, 2, 0], sizes = [16, 16, 4], strides = [1, 1, 1]} : vector<18x18x4xbf16> to vector<16x16x4xbf16>
    %45 = vector.shape_cast %44 : vector<16x16x4xbf16> to vector<256x4xbf16>
    %46 = vector.extract_strided_slice %2 {offsets = [32, 0], sizes = [4, 16], strides = [1, 1]} : vector<36x16xbf16> to vector<4x16xbf16>
    %cst_13 = arith.constant dense<0.000000e+00> : vector<256x16xf32>
    %47 = tpu.matmul %45, %46, %cst_13 {dimension_numbers = #tpu.dot_dimension_numbers<[1], [0], [0], [1], [0, 0, 1, 1], [], []>} : vector<256x4xbf16>, vector<4x16xbf16>, vector<256x16xf32> -> vector<256x16xf32>
    %48 = arith.addf %43, %47 : vector<256x16xf32>
    %c0_14 = arith.constant 0 : index
    %c0_15 = arith.constant 0 : index
    %49 = vector.load %arg3[%c0_14, %c0_15] : memref<1x16xf32, #tpu.memory_space<vmem>>, vector<1x16xf32>
    %50 = vector.broadcast %49 : vector<1x16xf32> to vector<256x16xf32>
    %51 = arith.addf %48, %50 : vector<256x16xf32>
    %cst_16 = arith.constant 0.000000e+00 : f32
    %52 = vector.broadcast %cst_16 : f32 to vector<256x16xf32>
    %53 = arith.maximumf %51, %52 : vector<256x16xf32>
    %54 = arith.truncf %53 : vector<256x16xf32> to vector<256x16xbf16>
    %c0_17 = arith.constant 0 : index
    %c0_18 = arith.constant 0 : index
    %55 = vector.load %arg4[%c0_17, %c0_18] : memref<16x128xbf16, #tpu.memory_space<vmem>>, vector<16x128xbf16>
    %cst_19 = arith.constant dense<0.000000e+00> : vector<256x128xf32>
    %56 = tpu.matmul %54, %55, %cst_19 {dimension_numbers = #tpu.dot_dimension_numbers<[1], [0], [0], [1], [0, 0, 1, 1], [], []>} : vector<256x16xbf16>, vector<16x128xbf16>, vector<256x128xf32> -> vector<256x128xf32>
    %c0_20 = arith.constant 0 : index
    %c0_21 = arith.constant 0 : index
    %57 = vector.load %arg5[%c0_20, %c0_21] : memref<4x128xbf16, #tpu.memory_space<vmem>>, vector<4x128xbf16>
    %cst_22 = arith.constant dense<0.000000e+00> : vector<256x128xf32>
    %58 = tpu.matmul %25, %57, %cst_22 {dimension_numbers = #tpu.dot_dimension_numbers<[1], [0], [0], [1], [0, 0, 1, 1], [], []>} : vector<256x4xbf16>, vector<4x128xbf16>, vector<256x128xf32> -> vector<256x128xf32>
    %59 = arith.addf %56, %58 : vector<256x128xf32>
    %c0_23 = arith.constant 0 : index
    %c0_24 = arith.constant 0 : index
    %60 = vector.load %arg6[%c0_23, %c0_24] : memref<1x128xf32, #tpu.memory_space<vmem>>, vector<1x128xf32>
    %61 = vector.broadcast %60 : vector<1x128xf32> to vector<256x128xf32>
    %62 = arith.addf %59, %61 : vector<256x128xf32>
    %cst_25 = arith.constant 0.000000e+00 : f32
    %63 = vector.broadcast %cst_25 : f32 to vector<256x128xf32>
    %64 = arith.maximumf %62, %63 : vector<256x128xf32>
    %65 = arith.truncf %64 : vector<256x128xf32> to vector<256x128xbf16>
    %c0_26 = arith.constant 0 : index
    %c0_27 = arith.constant 0 : index
    %c0_28 = arith.constant 0 : index
    %66 = vector.load %arg7[%c0_26, %c0_27, %c0_28] : memref<1x256x128xbf16, #tpu.memory_space<vmem>>, vector<1x256x128xbf16>
    %67 = vector.shape_cast %66 : vector<1x256x128xbf16> to vector<256x128xbf16>
    %68 = vector.shape_cast %65 : vector<256x128xbf16> to vector<1x256x128xbf16>
    tpu.vector_store %arg7[%c0_26, %c0_27, %c0_28], %68 {strides = array<i32>} : memref<1x256x128xbf16, #tpu.memory_space<vmem>>, vector<1x256x128xbf16>,
    return
  }
  func.func @transform_0(%arg0: i32) -> (i32, i32, i32, i32) {
    %c0_i32 = arith.constant 0 : i32
    %c0_i32_0 = arith.constant 0 : i32
    %c0_i32_1 = arith.constant 0 : i32
    %c0_i32_2 = arith.constant 0 : i32
    return %arg0, %c0_i32, %c0_i32_0, %c0_i32_1 : i32, i32, i32, i32
  }
  func.func @transform_1(%arg0: i32) -> (i32, i32) {
    %c0_i32 = arith.constant 0 : i32
    %c0_i32_0 = arith.constant 0 : i32
    %c0_i32_1 = arith.constant 0 : i32
    return %c0_i32, %c0_i32_0 : i32, i32
  }
  func.func @transform_2(%arg0: i32) -> (i32, i32) {
    %c0_i32 = arith.constant 0 : i32
    %c0_i32_0 = arith.constant 0 : i32
    %c0_i32_1 = arith.constant 0 : i32
    return %c0_i32, %c0_i32_0 : i32, i32
  }
  func.func @transform_3(%arg0: i32) -> (i32, i32) {
    %c0_i32 = arith.constant 0 : i32
    %c0_i32_0 = arith.constant 0 : i32
    %c0_i32_1 = arith.constant 0 : i32
    return %c0_i32, %c0_i32_0 : i32, i32
  }
  func.func @transform_4(%arg0: i32) -> (i32, i32) {
    %c0_i32 = arith.constant 0 : i32
    %c0_i32_0 = arith.constant 0 : i32
    %c0_i32_1 = arith.constant 0 : i32
    return %c0_i32, %c0_i32_0 : i32, i32
  }
  func.func @transform_5(%arg0: i32) -> (i32, i32) {
    %c0_i32 = arith.constant 0 : i32
    %c0_i32_0 = arith.constant 0 : i32
    %c0_i32_1 = arith.constant 0 : i32
    return %c0_i32, %c0_i32_0 : i32, i32
  }
  func.func @transform_6(%arg0: i32) -> (i32, i32, i32) {
    %c0_i32 = arith.constant 0 : i32
    %c0_i32_0 = arith.constant 0 : i32
    %c0_i32_1 = arith.constant 0 : i32
    return %arg0, %c0_i32, %c0_i32_0 : i32, i32, i32
  }
}

module attributes {stable_mosaic.version = 11 : i64} {
  func.func @_tiny_block_s2_kernel(%arg0: i32, %arg1: memref<1x64x128xbf16, #tpu.memory_space<vmem>>, %arg2: memref<128x128xbf16, #tpu.memory_space<vmem>>, %arg3: memref<1x128xf32, #tpu.memory_space<vmem>>, %arg4: memref<128x128xbf16, #tpu.memory_space<vmem>>, %arg5: memref<32x128xbf16, #tpu.memory_space<vmem>>, %arg6: memref<1x128xf32, #tpu.memory_space<vmem>>, %arg7: memref<1x64x128xbf16, #tpu.memory_space<vmem>>) attributes {dimension_semantics = [#tpu.dimension_semantics<parallel>], iteration_bounds = array<i64: 2>, scalar_prefetch = 0 : i64, scratch_operands = 0 : i64, tpu.core_type = #tpu.core_type<tc>, window_params = [{transform_indices = @transform_0, window_bounds = array<i64: 1, 64, 128>}, {pipeline_mode = #tpu.pipeline_mode<synchronous>, transform_indices = @transform_1, window_bounds = array<i64: 128, 128>}, {pipeline_mode = #tpu.pipeline_mode<synchronous>, transform_indices = @transform_2, window_bounds = array<i64: 1, 128>}, {pipeline_mode = #tpu.pipeline_mode<synchronous>, transform_indices = @transform_3, window_bounds = array<i64: 128, 128>}, {pipeline_mode = #tpu.pipeline_mode<synchronous>, transform_indices = @transform_4, window_bounds = array<i64: 32, 128>}, {pipeline_mode = #tpu.pipeline_mode<synchronous>, transform_indices = @transform_5, window_bounds = array<i64: 1, 128>}, {transform_indices = @transform_6, window_bounds = array<i64: 1, 64, 128>}]} {
    %c0 = arith.constant 0 : index
    %c0_0 = arith.constant 0 : index
    %c0_1 = arith.constant 0 : index
    %0 = vector.load %arg1[%c0, %c0_0, %c0_1] : memref<1x64x128xbf16, #tpu.memory_space<vmem>>, vector<1x64x128xbf16>
    %1 = vector.shape_cast %0 : vector<1x64x128xbf16> to vector<64x128xbf16>
    %c0_2 = arith.constant 0 : index
    %c0_3 = arith.constant 0 : index
    %2 = vector.load %arg2[%c0_2, %c0_3] : memref<128x128xbf16, #tpu.memory_space<vmem>>, vector<128x128xbf16>
    %cst = arith.constant dense<0.000000e+00> : vector<64x128xf32>
    %3 = tpu.matmul %1, %2, %cst {dimension_numbers = #tpu.dot_dimension_numbers<[1], [0], [0], [1], [0, 0, 1, 1], [], []>} : vector<64x128xbf16>, vector<128x128xbf16>, vector<64x128xf32> -> vector<64x128xf32>
    %c0_4 = arith.constant 0 : index
    %c0_5 = arith.constant 0 : index
    %4 = vector.load %arg3[%c0_4, %c0_5] : memref<1x128xf32, #tpu.memory_space<vmem>>, vector<1x128xf32>
    %5 = vector.broadcast %4 : vector<1x128xf32> to vector<64x128xf32>
    %6 = arith.addf %3, %5 : vector<64x128xf32>
    %cst_6 = arith.constant 0.000000e+00 : f32
    %7 = vector.broadcast %cst_6 : f32 to vector<64x128xf32>
    %8 = arith.maximumf %6, %7 : vector<64x128xf32>
    %9 = arith.truncf %8 : vector<64x128xf32> to vector<64x128xbf16>
    %c0_7 = arith.constant 0 : index
    %c0_8 = arith.constant 0 : index
    %10 = vector.load %arg4[%c0_7, %c0_8] : memref<128x128xbf16, #tpu.memory_space<vmem>>, vector<128x128xbf16>
    %cst_9 = arith.constant dense<0.000000e+00> : vector<64x128xf32>
    %11 = tpu.matmul %9, %10, %cst_9 {dimension_numbers = #tpu.dot_dimension_numbers<[1], [0], [0], [1], [0, 0, 1, 1], [], []>} : vector<64x128xbf16>, vector<128x128xbf16>, vector<64x128xf32> -> vector<64x128xf32>
    %12 = vector.extract_strided_slice %1 {offsets = [0, 0], sizes = [64, 32], strides = [1, 1]} : vector<64x128xbf16> to vector<64x32xbf16>
    %c0_10 = arith.constant 0 : index
    %c0_11 = arith.constant 0 : index
    %13 = vector.load %arg5[%c0_10, %c0_11] : memref<32x128xbf16, #tpu.memory_space<vmem>>, vector<32x128xbf16>
    %cst_12 = arith.constant dense<0.000000e+00> : vector<64x128xf32>
    %14 = tpu.matmul %12, %13, %cst_12 {dimension_numbers = #tpu.dot_dimension_numbers<[1], [0], [0], [1], [0, 0, 1, 1], [], []>} : vector<64x32xbf16>, vector<32x128xbf16>, vector<64x128xf32> -> vector<64x128xf32>
    %15 = arith.addf %11, %14 : vector<64x128xf32>
    %c0_13 = arith.constant 0 : index
    %c0_14 = arith.constant 0 : index
    %16 = vector.load %arg6[%c0_13, %c0_14] : memref<1x128xf32, #tpu.memory_space<vmem>>, vector<1x128xf32>
    %17 = vector.broadcast %16 : vector<1x128xf32> to vector<64x128xf32>
    %18 = arith.addf %15, %17 : vector<64x128xf32>
    %cst_15 = arith.constant 0.000000e+00 : f32
    %19 = vector.broadcast %cst_15 : f32 to vector<64x128xf32>
    %20 = arith.maximumf %18, %19 : vector<64x128xf32>
    %21 = arith.truncf %20 : vector<64x128xf32> to vector<64x128xbf16>
    %c0_16 = arith.constant 0 : index
    %c0_17 = arith.constant 0 : index
    %c0_18 = arith.constant 0 : index
    %22 = vector.load %arg7[%c0_16, %c0_17, %c0_18] : memref<1x64x128xbf16, #tpu.memory_space<vmem>>, vector<1x64x128xbf16>
    %23 = vector.shape_cast %22 : vector<1x64x128xbf16> to vector<64x128xbf16>
    %24 = vector.shape_cast %21 : vector<64x128xbf16> to vector<1x64x128xbf16>
    tpu.vector_store %arg7[%c0_16, %c0_17, %c0_18], %24 {strides = array<i32>} : memref<1x64x128xbf16, #tpu.memory_space<vmem>>, vector<1x64x128xbf16>,
    return
  }
  func.func @transform_0(%arg0: i32) -> (i32, i32, i32) {
    %c0_i32 = arith.constant 0 : i32
    %c0_i32_0 = arith.constant 0 : i32
    %c0_i32_1 = arith.constant 0 : i32
    return %arg0, %c0_i32, %c0_i32_0 : i32, i32, i32
  }
  func.func @transform_1(%arg0: i32) -> (i32, i32) {
    %c0_i32 = arith.constant 0 : i32
    %c0_i32_0 = arith.constant 0 : i32
    %c0_i32_1 = arith.constant 0 : i32
    return %c0_i32, %c0_i32_0 : i32, i32
  }
  func.func @transform_2(%arg0: i32) -> (i32, i32) {
    %c0_i32 = arith.constant 0 : i32
    %c0_i32_0 = arith.constant 0 : i32
    %c0_i32_1 = arith.constant 0 : i32
    return %c0_i32, %c0_i32_0 : i32, i32
  }
  func.func @transform_3(%arg0: i32) -> (i32, i32) {
    %c0_i32 = arith.constant 0 : i32
    %c0_i32_0 = arith.constant 0 : i32
    %c0_i32_1 = arith.constant 0 : i32
    return %c0_i32, %c0_i32_0 : i32, i32
  }
  func.func @transform_4(%arg0: i32) -> (i32, i32) {
    %c0_i32 = arith.constant 0 : i32
    %c0_i32_0 = arith.constant 0 : i32
    %c0_i32_1 = arith.constant 0 : i32
    return %c0_i32, %c0_i32_0 : i32, i32
  }
  func.func @transform_5(%arg0: i32) -> (i32, i32) {
    %c0_i32 = arith.constant 0 : i32
    %c0_i32_0 = arith.constant 0 : i32
    %c0_i32_1 = arith.constant 0 : i32
    return %c0_i32, %c0_i32_0 : i32, i32
  }
  func.func @transform_6(%arg0: i32) -> (i32, i32, i32) {
    %c0_i32 = arith.constant 0 : i32
    %c0_i32_0 = arith.constant 0 : i32
    %c0_i32_1 = arith.constant 0 : i32
    return %arg0, %c0_i32, %c0_i32_0 : i32, i32, i32
  }
}

</mosaic_0001>

<bundles_post_ra>
// kernel: forward.5
= control target key start
LH: loop header
LB: loop body
LE: loop exit
PB: predicated region body
PF: predicated region fallthrough
CT: control target
= control target key end

     0   :  { %s1017_s21 = smov 0   ;;  %s1111_s0 = inlined_call_operand.vmem [shape: bf16[2,64,128], index: 0, kind: input, shape index: {}]   ;;  %s1112_s1 = inlined_call_operand.vmem [shape: bf16[128,128], index: 1, kind: input, shape index: {}]   ;;  %s1113_s2 = inlined_call_operand.vmem [shape: f32[1,128], index: 2, kind: input, shape index: {}, may-alias: {2,5}]   ;;  %s1114_s3 = inlined_call_operand.vmem [shape: bf16[128,128], index: 3, kind: input, shape index: {}]   ;;  %s1115_s4 = inlined_call_operand.vmem [shape: bf16[32,128], index: 4, kind: input, shape index: {}]   ;;  %s1116_s5 = inlined_call_operand.vmem [shape: f32[1,128], index: 5, kind: input, shape index: {}, may-alias: {2,5}]   ;;  %s1117_s6 = inlined_call_operand.vmem [shape: bf16[2,64,128], index: 6, kind: output, shape index: {}]  }
   0x1 LB: > { %s774_s22 = sadd.s32 4294967295, %s980_s21   ;;  %p778_p0 = scmp.ge.s32.totalorder %s980_s21, 1  ;;  %s980_s21 = sphi %s1017_s21, %s16_s21  }
   0x2   : > { %p212_p1 = scmp.lt.s32.totalorder %s980_s21, 3 }
   0x4   : > { %p213_p2 = pnand %p778_p0, %p212_p1 }
   0x5   : > { %p242_p3 = scmp.lt.s32.totalorder (!%p213_p2), %s774_s22, 1 }
   0x6   : > { %216 = sbr.rel (%p213_p2) target bundleno = 466 (0x1d2), region = 44 }
   0xb   : > { %v952_v0 = vld [vmem:[%s1112_s1 + $0x38] sm:$0xff]   ;;  %v953_v1 = vld [vmem:[%s1112_s1 + $0x30] sm:$0xff]   ;;  %s1119_s22 = smov (!%p242_p3, %s774_s22), 1  ;;  %v954_v2 = vld [vmem:[%s1112_s1 + $0x28] sm:$0xff]   ;;  %vm465_vm0 = vcmask 261120  }
   0xc   : > { %884 = vmatprep.subr.bf16.mxu0 %v952_v0  ;;  %s821_s29 = sshll.u32 %s1119_s22, 5  ;;  %v955_v3 = vld [vmem:[%s1112_s1 + $0x20] sm:$0xff]   ;;  %v956_v5 = vld [vmem:[%s1112_s1 + $0x18] sm:$0xff]   ;;  %v964_v6 = vld [vmem:[%s1115_s4 + $0x8] sm:$0xff]  }
   0xd   : > { %885 = vmatpush3.bf16.msra.mxu0 %v952_v0  ;;  %s1042_s8 = scalar_lea.vmem %s1111_s0, %s821_s29  ;;  %v965_v7 = vld [vmem:[%s1115_s4] sm:$0xff]   ;;  %908 = vmatprep.subr.bf16.mxu1 %v964_v6  ;;  %v957_v8 = vld [vmem:[%s1112_s1 + $0x10] sm:$0xff]   ;;  %v966_v9 = vld [vmem:[%s1114_s3 + $0x38] sm:$0xff]   ;;  %s251_s26 = scalar_lea.vmem %s1117_s6, %s821_s29 }
   0xe   : > { %886 = vmatprep.subr.bf16.mxu0 %v953_v1  ;;  %v960_v4 = vld [vmem:[%s1042_s8] sm:$0xff]   ;;  %909 = vmatpush3.bf16.msra.mxu1 %v964_v6  ;;  %v958_v10 = vld [vmem:[%s1112_s1 + $0x8] sm:$0xff]   ;;  %v967_v12 = vld [vmem:[%s1114_s3 + $0x30] sm:$0xff]  }
   0xf   : > { %900 = vmatprep.mubr.bf16.mxu0 %v960_v4  ;;  %912 = vmatprep.mubr.msk.bf16.mxu1 %vm465_vm0, %v960_v4  ;;  %v961_v11 = vld [vmem:[%s1042_s8 + $0x8] sm:$0xff]   ;;  %v962_v13 = vld [vmem:[%s1042_s8 + $0x10] sm:$0xff]   ;;  %v959_v14 = vld [vmem:[%s1112_s1] sm:$0xff]  }
  0x10   : > { %910 = vmatprep.subr.bf16.mxu1 %v965_v7  ;;  %v968_v15 = vld [vmem:[%s1114_s3 + $0x28] sm:$0xff]   ;;  %v963_v16 = vld [vmem:[%s1042_s8 + $0x18] sm:$0xff]   ;;  %v969_v17 = vld [vmem:[%s1114_s3 + $0x20] sm:$0xff]  }
  0x11   : > { %887 = vmatpush3.bf16.msra.mxu0 %v953_v1  ;;  %v970_v18 = vld [vmem:[%s1114_s3 + $0x18] sm:$0xff]   ;;  %v971_v19 = vld [vmem:[%s1114_s3 + $0x10] sm:$0xff]   ;;  %v972_v20 = vld [vmem:[%s1114_s3 + $0x8] sm:$0xff]  }
  0x12   : > { %888 = vmatprep.subr.bf16.mxu0 %v954_v2  ;;  %911 = vmatpush3.bf16.msra.mxu1 %v965_v7  ;;  %v973_v21 = vld [vmem:[%s1114_s3] sm:$0xff]  }
  0x13   : > { %920 = vmatprep.subr.bf16.mxu1 %v966_v9  ;;  %v783_v24 = vld [vmem:[%s1113_s2] ss:$0 sm:$0xff] }
  0x14   : > { %v810_v61 = vld [vmem:[%s1116_s5] ss:$0 sm:$0xff] }
  0x15   : > { %889 = vmatpush3.bf16.msra.mxu0 %v954_v2  ;;  %913 = vmatmul.mubr.msk.bf16.vlgmr.msra.gmra.mxu1 %vm465_vm0, %v961_v11 }
  0x16   : > { %890 = vmatprep.subr.bf16.mxu0 %v955_v3  ;;  %921 = vmatpush3.bf16.msra.mxu1 %v966_v9 }
  0x17   : > { %922 = vmatprep.subr.bf16.mxu1 %v967_v12  ;;  %916 = vmatprep.mubr.msk.bf16.mxu1 %vm465_vm0, %v962_v13 }
  0x19   : > { %891 = vmatpush3.bf16.msra.mxu0 %v955_v3 }
  0x1a   : > { %892 = vmatprep.subr.bf16.mxu0 %v956_v5  ;;  %923 = vmatpush3.bf16.msra.mxu1 %v967_v12 }
  0x1b   : > { %924 = vmatprep.subr.bf16.mxu1 %v968_v15 }
  0x1d   : > { %893 = vmatpush3.bf16.msra.mxu0 %v956_v5  ;;  %917 = vmatmul.mubr.msk.bf16.gmra.mxu1 %vm465_vm0, %v963_v16 }
  0x1e   : > { %894 = vmatprep.subr.bf16.mxu0 %v957_v8  ;;  %925 = vmatpush3.bf16.msra.mxu1 %v968_v15 }
  0x1f   : > { %926 = vmatprep.subr.bf16.mxu1 %v969_v17 }
  0x21   : > { %895 = vmatpush3.bf16.msra.mxu0 %v957_v8 }
  0x22   : > { %896 = vmatprep.subr.bf16.mxu0 %v958_v10  ;;  %927 = vmatpush3.bf16.msra.mxu1 %v969_v17 }
  0x23   : > { %928 = vmatprep.subr.bf16.mxu1 %v970_v18 }
  0x25   : > { %897 = vmatpush3.bf16.msra.mxu0 %v958_v10 }
  0x26   : > { %898 = vmatprep.subr.bf16.mxu0 %v959_v14  ;;  %929 = vmatpush3.bf16.msra.mxu1 %v970_v18 }
  0x27   : > { %930 = vmatprep.subr.bf16.mxu1 %v971_v19 }
  0x29   : > { %899 = vmatpush3.bf16.msra.mxu0 %v959_v14 }
  0x2a   : > { %931 = vmatpush3.bf16.msra.mxu1 %v971_v19 }
  0x2b   : > { %932 = vmatprep.subr.bf16.mxu1 %v972_v20 }
  0x2c   : > { %901 = vmatmul.mubr.bf16.vlgmr.msra.gmra.mxu0 %v961_v11 }
  0x2d   : > { %904 = vmatprep.mubr.bf16.mxu0 %v962_v13 }
  0x2e   : > { %933 = vmatpush3.bf16.msra.mxu1 %v972_v20 }
  0x2f   : > { %934 = vmatprep.subr.bf16.mxu1 %v973_v21 }
  0x32   : > { %935 = vmatpush3.bf16.msra.mxu1 %v973_v21 }
  0x34   : > { %905 = vmatmul.mubr.bf16.gmra.mxu0 %v963_v16 }
  0xd5   : > { %v914_v51 = vpop.f32.mrf.mxu1 }
  0xd7   : > { %v512_v52 = vpop.f32.mrf.mxu1 }
  0xd9   : > { %v915_v53 = vpop.f32.mrf.mxu1 }
  0xdb   : > { %v515_v54 = vpop.f32.mrf.mxu1 }
  0xdd   : > { %v918_v55 = vpop.f32.mrf.mxu1 }
  0xdf   : > { %v528_v56 = vpop.f32.mrf.mxu1 }
  0xe1   : > { %v919_v57 = vpop.f32.mrf.mxu1 }
  0xe3   : > { %v531_v58 = vpop.f32.mrf.mxu1 }
  0xec   : > { %v902_v22 = vpop.f32.mrf.mxu0 }
  0xed   : > { %v399_v28 = vadd.f32 %v902_v22, %v783_v24 }
  0xee   : > { %v390_v23 = vpop.f32.mrf.mxu0 }
  0xef   : > { %v391_v26 = vadd.f32 %v783_v24, %v390_v23  ;;  %v423_v35 = vmax.f32 %v399_v28, 0.0 }
  0xf0   : > { %v903_v25 = vpop.f32.mrf.mxu0 }
  0xf1   : > { %v402_v27 = vadd.f32 %v903_v25, %v783_v24  ;;  %v421_v33 = vmax.f32 %v391_v26, 0.0 }
  0xf2   : > { %v393_v29 = vpop.f32.mrf.mxu0 }
  0xf3   : > { %v394_v30 = vadd.f32 %v783_v24, %v393_v29  ;;  %v424_v31 = vmax.f32 %v402_v27, 0.0 }
  0xf4   : > { %v906_v32 = vpop.f32.mrf.mxu0 }
  0xf5   : > { %v422_v34 = vmax.f32 %v394_v30, 0.0  ;;  %v430_v38 = vpack.c.bf16 %v424_v31, %v423_v35  ;;  %v415_v42 = vadd.f32 %v906_v32, %v783_v24 }
  0xf6   : > { %v406_v36 = vpop.f32.mrf.mxu0 }
  0xf7   : > { %v429_v37 = vpack.c.bf16 %v422_v34, %v421_v33  ;;  %v407_v40 = vadd.f32 %v783_v24, %v406_v36  ;;  %v427_v48 = vmax.f32 %v415_v42, 0.0 }
  0xf8   : > { %v907_v39 = vpop.f32.mrf.mxu0 }
  0xf9   : > { %v418_v41 = vadd.f32 %v907_v39, %v783_v24  ;;  %936 = vmatprep.mubr.bf16.mxu1 %v429_v37  ;;  %v425_v46 = vmax.f32 %v407_v40, 0.0 }
  0xfa   : > { %v409_v43 = vpop.f32.mrf.mxu0  ;;  %937 = vmatmul.mubr.bf16.vlgmr.msra.gmra.mxu1 %v430_v38 }
  0xfb   : > { %v410_v44 = vadd.f32 %v783_v24, %v409_v43  ;;  %v428_v45 = vmax.f32 %v418_v41, 0.0 }
  0xfd   : > { %v426_v47 = vmax.f32 %v410_v44, 0.0  ;;  %v432_v50 = vpack.c.bf16 %v428_v45, %v427_v48 }
  0xff   : > { %v431_v49 = vpack.c.bf16 %v426_v47, %v425_v46 }
 0x101   : > { %940 = vmatprep.mubr.bf16.mxu1 %v431_v49 }
 0x102   : > { %941 = vmatmul.mubr.bf16.gmra.mxu1 %v432_v50 }
 0x1ba   : > { %v938_v59 = vpop.f32.mrf.mxu1 }
 0x1bb   : > { %v634_v60 = vadd.f32 %v938_v59, %v914_v51 }
 0x1bc   : > { %v625_v62 = vpop.f32.mrf.mxu1 }
 0x1bd   : > { %v626_v63 = vadd.f32 %v625_v62, %v512_v52  ;;  %v665_v1 = vadd.f32 %v810_v61, %v634_v60 }
 0x1be   : > { %v939_v0 = vpop.f32.mrf.mxu1 }
 0x1bf   : > { %v637_v2 = vadd.f32 %v939_v0, %v915_v53  ;;  %v663_v4 = vadd.f32 %v810_v61, %v626_v63  ;;  %v673_v8 = vmax.f32 %v665_v1, 0.0 }
 0x1c0   : > { %v628_v3 = vpop.f32.mrf.mxu1 }
 0x1c1   : > { %v666_v5 = vadd.f32 %v810_v61, %v637_v2  ;;  %v629_v6 = vadd.f32 %v628_v3, %v515_v54  ;;  %v671_v13 = vmax.f32 %v663_v4, 0.0 }
 0x1c2   : > { %v942_v7 = vpop.f32.mrf.mxu1 }
 0x1c3   : > { %v674_v9 = vmax.f32 %v666_v5, 0.0  ;;  %v664_v10 = vadd.f32 %v810_v61, %v629_v6  ;;  %v650_v11 = vadd.f32 %v942_v7, %v918_v55 }
 0x1c4   : > { %v641_v12 = vpop.f32.mrf.mxu1 }
 0x1c5   : > { %v839_v14 = vpack.c.bf16 %v674_v9, %v673_v8  ;;  %v672_v15 = vmax.f32 %v664_v10, 0.0  ;;  %v642_v16 = vadd.f32 %v641_v12, %v528_v56  ;;  %v669_v19 = vadd.f32 %v810_v61, %v650_v11 }
 0x1c6   : > { %v943_v17 = vpop.f32.mrf.mxu1 }
 0x1c7   : > { %851 = vst [vmem:[%s251_s26 + $0x8] sm:$0xff] %v839_v14   ;;  %v834_v18 = vpack.c.bf16 %v672_v15, %v671_v13  ;;  %v653_v20 = vadd.f32 %v943_v17, %v919_v57  ;;  %v667_v22 = vadd.f32 %v810_v61, %v642_v16  ;;  %v677_v25 = vmax.f32 %v669_v19, 0.0 }
 0x1c8   : > { %v644_v21 = vpop.f32.mrf.mxu1 }
 0x1c9   : > { %835 = vst [vmem:[%s251_s26] sm:$0xff] %v834_v18   ;;  %v670_v23 = vadd.f32 %v810_v61, %v653_v20  ;;  %v645_v24 = vadd.f32 %v644_v21, %v531_v58  ;;  %v675_v28 = vmax.f32 %v667_v22, 0.0 }
 0x1cb   : > { %v678_v26 = vmax.f32 %v670_v23, 0.0  ;;  %v668_v27 = vadd.f32 %v810_v61, %v645_v24 }
 0x1cd   : > { %v849_v29 = vpack.c.bf16 %v678_v26, %v677_v25  ;;  %v676_v30 = vmax.f32 %v668_v27, 0.0 }
 0x1cf   : > { %853 = vst [vmem:[%s251_s26 + $0x18] sm:$0xff] %v849_v29   ;;  %v844_v31 = vpack.c.bf16 %v676_v30, %v675_v28 }
 0x1d1   : > { %852 = vst [vmem:[%s251_s26 + $0x10] sm:$0xff] %v844_v31  }
 0x1d2 PF: > { %s16_s21 = sadd.s32 1, %s980_s21  }
 0x1d3   : > { %p13_p4 = scmp.ge.s32.totalorder %s16_s21, 4  }
 0x1d5   :  { %15 = sbr.rel (!%p13_p4) target bundleno = 1 (0x1), region = 74 }

// kernel: forward.4
= control target key start
LH: loop header
LB: loop body
LE: loop exit
PB: predicated region body
PF: predicated region fallthrough
CT: control target
= control target key end

     0   :  { %s4964_s21 = smov 0   ;;  %s6551_s0 = inlined_call_operand.vmem [shape: bf16[2,18,18,32], index: 0, kind: input, shape index: {}]   ;;  %s6552_s1 = inlined_call_operand.vmem [shape: bf16[288,16], index: 1, kind: input, shape index: {}]   ;;  %s6553_s2 = inlined_call_operand.vmem [shape: f32[1,16], index: 2, kind: input, shape index: {}]   ;;  %s6554_s3 = inlined_call_operand.vmem [shape: bf16[16,128], index: 3, kind: input, shape index: {}]   ;;  %s6555_s4 = inlined_call_operand.vmem [shape: bf16[32,128], index: 4, kind: input, shape index: {}]   ;;  %s6556_s5 = inlined_call_operand.vmem [shape: f32[1,128], index: 5, kind: input, shape index: {}]   ;;  %s6557_s6 = inlined_call_operand.vmem [shape: bf16[2,256,128], index: 6, kind: output, shape index: {}]  }
   0x1 LB: > { %s3835_s22 = sadd.s32 4294967295, %s4927_s21   ;;  %p3839_p0 = scmp.ge.s32.totalorder %s4927_s21, 1  ;;  %s4927_s21 = sphi %s4964_s21, %s16_s21  }
   0x2   : > { %p212_p1 = scmp.lt.s32.totalorder %s4927_s21, 3 }
   0x4   : > { %p213_p2 = pnand %p3839_p0, %p212_p1 }
   0x6   : > { %216 = sbr.rel (%p213_p2) target bundleno = 767 (0x2ff), region = 44 }
   0xb   : > { %v4880_v0 = vld [vmem:[%s6552_s1 + $0x18] sm:$0xff]   ;;  %p242_p3 = scmp.lt.s32.totalorder %s3835_s22, 1  ;;  %v4881_v1 = vld [vmem:[%s6552_s1 + $0x10] sm:$0xff]   ;;  %v4983_v2 = vld [vmem:[%s6552_s1 + $0x8] sm:$0xff]   ;;  %vm343_vm0 = vsmask.f32 3328 }
   0xc   : > { %4867 = vmatprep.subr.bf16.mxu1 %v4880_v0  ;;  %4473 = vmatprep.subr.bf16.mxu0 %v4880_v0  ;;  %v4989_v3 = vld [vmem:[%s6552_s1 + $0x28] sm:$0xff]   ;;  %vm344_vm1 = vsmask.f32 7440  ;;  %vm790_vm2 = vcmask 261120   ;;  %v6603_v30 = vmov 0  ;;  %vm1317_vm4 = vcmask 1042432  }
   0xd   : > { %s6700_s22 = smov (!%p242_p3, %s3835_s22), 1  ;;  %4869 = vmatpush3.bf16.msra.mxu1 %v4880_v0  ;;  %4474 = vmatpush3.bf16.msra.mxu0 %v4880_v0  ;;  %vm5035_vm3 = vmor %vm343_vm0, %vm344_vm1  ;;  %vm1318_vm5 = vcmask 1046532   ;;  %vm3339_vm7 = vcmask 130048  }
   0xe   : > { %4868 = vmatprep.subr.bf16.mxu1 %v4881_v1  ;;  %4475 = vmatprep.subr.bf16.mxu0 %v4881_v1  ;;  %s4871_s29 = smul.u32 216, %s6700_s22  ;;  %v6604_v30 = vsel %vm5035_vm3, 4294967295, %v6603_v30  ;;  %vm5360_vm6 = vmor %vm1317_vm4, %vm1318_vm5 }
   0xf   : > { %6605 = vst [vmem:[#allocation2_spill] sm:$0xff] %v6604_v30 }
  0x10   : > { %s4994_s10 = scalar_lea.vmem %s6551_s0, %s4871_s29  ;;  %s4148_s29 = sshll.u32 %s6700_s22, 7 }
  0x11   : > { %4870 = vmatpush3.bf16.msra.mxu1 %v4881_v1  ;;  %4476 = vmatpush3.bf16.msra.mxu0 %v4881_v1  ;;  %v4997_v4 = vld [vmem:[%s4994_s10] sm:$0xf]  ;;  %v5000_v5 = vld [vmem:[%s4994_s10 + $0x4] sm:$0xf]  ;;  %v5003_v6 = vld [vmem:[%s4994_s10 + $0x8] sm:$0x1]  ;;  %s6489_s8 = scalar_lea.vmem %s6557_s6, %s4148_s29 }
  0x12   : > { %v347_v7 = vshrl.u32 %v4997_v4, 16  ;;  %v350_v8 = vshll.u32 %v4997_v4, 16  ;;  %v356_v9 = vshll.u32 %v5000_v5, 16  ;;  %v360_v10 = vshrl.u32 %v5000_v5, 16  ;;  %v5010_v11 = vld [vmem:[%s4994_s10 + $0x60] sm:$0xf]  ;;  %4509 = vmatprep.subr.bf16.mxu1 %v4983_v2  ;;  %4545 = vmatprep.subr.bf16.mxu0 %v4989_v3 }
  0x13   : > { %v366_v12 = vshll.u32 %v5003_v6, 16  ;;  %v5017_v14 = vld [vmem:[%s4994_s10 + $0x64] sm:$0xf]  ;;  %v5020_v15 = vld [vmem:[%s4994_s10 + $0x68] sm:$0x1]  ;;  %v539_v22 = vshrl.u32 %v5010_v11, 16 }
  0x14   : > { %v349_v16 = vrot.slane %v347_v7, 4  ;;  %v352_v17 = vrot.slane %v350_v8, 5  ;;  %v358_v18 = vrot.slane %v356_v9, 5  ;;  %v362_v19 = vrot.slane %v360_v10, 4  ;;  %v5023_v20 = vld [vmem:[%s4994_s10 + $0xc] sm:$0xf] }
  0x15   : > { %v368_v21 = vrot.slane %v366_v12, 5  ;;  %v542_v23 = vshll.u32 %v5010_v11, 16  ;;  %v548_v24 = vshll.u32 %v5017_v14, 16  ;;  %v552_v27 = vshrl.u32 %v5017_v14, 16  ;;  %v5031_v29 = vld [vmem:[%s4994_s10 + $0x10] sm:$0xf] }
  0x16   : > { %v353_v25 = vor.u32 %v352_v17, %v349_v16  ;;  %v363_v26 = vor.u32 %v362_v19, %v358_v18  ;;  %v558_v28 = vshll.u32 %v5020_v15, 16  ;;  %v541_v31 = vrot.slane %v539_v22, 4  ;;  %v5041_v40 = vld [vmem:[%s4994_s10 + $0x14] sm:$0x1]  ;;  %v5051_v48 = vld [vmem:[%s4994_s10 + $0x6c] sm:$0xf] }
  0x17   : > { %v544_v32 = vrot.slane %v542_v23, 5  ;;  %v550_v33 = vrot.slane %v548_v24, 5  ;;  %v371_v34 = vshrl.u32 %v5023_v20, 16  ;;  %v554_v37 = vrot.slane %v552_v27, 4  ;;  %6606 = vst [vmem:[#allocation3_spill] sm:$0xff] %v5051_v48 }
  0x18   : > { %v354_v35 = vrot.slane %v353_v25, 4  ;;  %v364_v36 = vrot.slane %v363_v26, 4  ;;  %v560_v38 = vrot.slane %v558_v28, 5  ;;  %v374_v42 = vshll.u32 %v5023_v20, 16  ;;  %v5056_v57 = vld [vmem:[%s4994_s10 + $0x70] sm:$0xf] }
  0x19   : > { %v545_v39 = vor.u32 %v544_v32, %v541_v31  ;;  %v373_v41 = vrot.slane %v371_v34, 4  ;;  %v380_v43 = vshll.u32 %v5031_v29, 16  ;;  %v555_v46 = vor.u32 %v554_v37, %v550_v33  ;;  %v5063_v61 = vld [vmem:[%s4994_s10 + $0x74] sm:$0x1]  ;;  %v5070_v8 = vld [vmem:[%s4994_s10 + $0x18] sm:$0xf] }
  0x1a   : > { %v359_v44 = vsel %vm5035_vm3, %v354_v35, %v358_v18  ;;  %v369_v45 = vsel %vm5035_vm3, %v364_v36, %v368_v21  ;;  %v384_v47 = vshrl.u32 %v5031_v29, 16  ;;  %v376_v51 = vrot.slane %v374_v42, 5  ;;  %6607 = vst [vmem:[#allocation4_spill] sm:$0xff] %v5063_v61  ;;  %v5078_v22 = vld [vmem:[%s4994_s10 + $0x1c] sm:$0xf] }
  0x1b   : > { %v3843_v49 = vcombine.low %v359_v44, %v369_v45  ;;  %v546_v50 = vrot.slane %v545_v39, 4  ;;  %v382_v52 = vrot.slane %v380_v43, 5  ;;  %v556_v53 = vrot.slane %v555_v46, 4  ;;  %v5085_v25 = vld [vmem:[%s4994_s10 + $0x20] sm:$0x1] }
  0x1c   : > { %v386_v54 = vrot.slane %v384_v47, 4  ;;  %v390_v55 = vshll.u32 %v5041_v40, 16  ;;  %v377_v59 = vor.u32 %v376_v51, %v373_v41  ;;  %v563_v62 = vshrl.u32 %v5051_v48, 16  ;;  %v5092_v34 = vld [vmem:[%s4994_s10 + $0x78] sm:$0xf]  ;;  %v4885_v39 = vld [vmem:[%s6552_s1 + $0x20] sm:$0xff]  }
  0x1d   : > { %4477 = vmatprep.mubr.msk.bf16.mxu0 %vm790_vm2, %v3843_v49  ;;  %v551_v58 = vsel %vm5035_vm3, %v546_v50, %v550_v33  ;;  %v561_v63 = vsel %vm5035_vm3, %v556_v53, %v560_v38  ;;  %v566_v7 = vshll.u32 %v5051_v48, 16  ;;  %v572_v16 = vshll.u32 %v5056_v57, 16  ;;  %6609 = vst [vmem:[#allocation6_spill] sm:$0xff] %v5092_v34  ;;  %v5103_v45 = vld [vmem:[%s4994_s10 + $0x7c] sm:$0xf] }
  0x1e   : > { %v387_v0 = vor.u32 %v386_v54, %v382_v52  ;;  %v392_v1 = vrot.slane %v390_v55, 5  ;;  %v5072_v9 = vcombine.low %v551_v58, %v561_v63  ;;  %v378_v10 = vrot.slane %v377_v59, 4  ;;  %6611 = vst [vmem:[#allocation8_spill] sm:$0xff] %v5103_v45  ;;  %v5108_v49 = vld [vmem:[%s4994_s10 + $0x80] sm:$0x1]  ;;  %v5118_v58 = vld [vmem:[%s6552_s1 + $0x48] sm:$0xff]  }
  0x1f   : > { %v565_v12 = vrot.slane %v563_v62, 4  ;;  %v568_v18 = vrot.slane %v566_v7, 5  ;;  %v576_v19 = vshrl.u32 %v5056_v57, 16  ;;  %v582_v21 = vshll.u32 %v5063_v61, 16  ;;  %6612 = vst [vmem:[#allocation9_spill] sm:$0xff] %v5108_v49 }
  0x20   : > { %6608 = vst [vmem:[#allocation5_spill] sm:$0xff] %v5072_v9  ;;  %v388_v17 = vrot.slane %v387_v0, 4  ;;  %4493 = vmatprep.mubr.msk.bf16.mxu1 %vm790_vm2, %v5072_v9  ;;  %v383_v23 = vsel %vm5035_vm3, %v378_v10, %v382_v52  ;;  %v574_v24 = vrot.slane %v572_v16, 5  ;;  %v395_v26 = vshrl.u32 %v5070_v8, 16  ;;  %v5129_v16 = vld [vmem:[%s4994_s10 + $0x28] sm:$0xf] }
  0x21   : > { %v398_v27 = vshll.u32 %v5070_v8, 16  ;;  %v569_v31 = vor.u32 %v568_v18, %v565_v12  ;;  %v578_v32 = vrot.slane %v576_v19, 4  ;;  %v584_v33 = vrot.slane %v582_v21, 5  ;;  %v5231_v56 = vld [vmem:[%s4994_s10 + $0x44] sm:$0x1] }
  0x22   : > { %v393_v28 = vsel %vm5035_vm3, %v388_v17, %v392_v1  ;;  %v397_v36 = vrot.slane %v395_v26, 4  ;;  %v404_v38 = vshll.u32 %v5078_v22, 16  ;;  %v408_v43 = vshrl.u32 %v5078_v22, 16  ;;  %v5122_v1 = vld [vmem:[%s4994_s10 + $0x24] sm:$0xf] }
  0x23   : > { %v5094_v35 = vcombine.low %v383_v23, %v393_v28  ;;  %v400_v37 = vrot.slane %v398_v27, 5  ;;  %v570_v41 = vrot.slane %v569_v31, 4  ;;  %v579_v42 = vor.u32 %v578_v32, %v574_v24  ;;  %v5136_v23 = vld [vmem:[%s4994_s10 + $0x2c] sm:$0x1]  ;;  %v5253_v9 = vld [vmem:[%s4994_s10 + $0xa4] sm:$0x1] }
  0x24   : > { %v414_v44 = vshll.u32 %v5085_v25, 16  ;;  %v406_v47 = vrot.slane %v404_v38, 5  ;;  %v587_v50 = vshrl.u32 %v5092_v34, 16  ;;  %v590_v51 = vshll.u32 %v5092_v34, 16  ;;  %v5148_v38 = vld [vmem:[%s4994_s10 + $0x84] sm:$0xf] }
  0x25   : > { %6610 = vst [vmem:[#allocation7_spill] sm:$0xff] %v5094_v35  ;;  %4478 = vmatmul.mubr.msk.bf16.vlgmr.msra.gmra.mxu0 %vm790_vm2, %v5094_v35  ;;  %v401_v46 = vor.u32 %v400_v37, %v397_v36  ;;  %v575_v52 = vsel %vm5035_vm3, %v570_v41, %v574_v24  ;;  %v580_v53 = vrot.slane %v579_v42, 4  ;;  %v410_v54 = vrot.slane %v408_v43, 4  ;;  %v4884_v24 = vld [vmem:[%s6552_s1] sm:$0xff]   ;;  %6619 = vst [vmem:[#allocation16_spill] sm:$0xff] %v5253_v9 }
  0x26   : > { %4546 = vmatpush3.bf16.msra.mxu0 %v4989_v3  ;;  %v416_v55 = vrot.slane %v414_v44, 5  ;;  %v589_v62 = vrot.slane %v587_v50, 4  ;;  %v592_v63 = vrot.slane %v590_v51, 5  ;;  %v596_v0 = vshll.u32 %v5103_v45, 16  ;;  %v5156_v44 = vld [vmem:[%s4994_s10 + $0x88] sm:$0xf] }
  0x27   : > { %v402_v59 = vrot.slane %v401_v46, 4  ;;  %4547 = vmatprep.subr.bf16.mxu0 %v4885_v39  ;;  %v585_v7 = vsel %vm5035_vm3, %v580_v53, %v584_v33  ;;  %v411_v3 = vor.u32 %v410_v54, %v406_v47  ;;  %v600_v10 = vshrl.u32 %v5103_v45, 16 }
  0x28   : > { %v606_v12 = vshll.u32 %v5108_v49, 16  ;;  %v5131_v17 = vcombine.low %v575_v52, %v585_v7  ;;  %v593_v19 = vor.u32 %v592_v63, %v589_v62  ;;  %v598_v21 = vrot.slane %v596_v0, 5  ;;  %v5163_v52 = vld [vmem:[%s4994_s10 + $0x8c] sm:$0x1] }
  0x29   : > { %v407_v18 = vsel %vm5035_vm3, %v402_v59, %v406_v47  ;;  %v412_v26 = vrot.slane %v411_v3, 4  ;;  %v602_v27 = vrot.slane %v600_v10, 4  ;;  %v419_v31 = vshrl.u32 %v5122_v1, 16  ;;  %v5177_v3 = vld [vmem:[%s4994_s10 + $0x30] sm:$0xf] }
  0x2a   : > { %6613 = vst [vmem:[#allocation10_spill] sm:$0xff] %v5131_v17  ;;  %v608_v28 = vrot.slane %v606_v12, 5  ;;  %4548 = vmatpush3.bf16.msra.mxu0 %v4885_v39  ;;  %4494 = vmatmul.mubr.msk.bf16.vlgmr.msra.gmra.mxu1 %vm790_vm2, %v5131_v17  ;;  %v594_v32 = vrot.slane %v593_v19, 4  ;;  %v422_v33 = vshll.u32 %v5122_v1, 16  ;;  %v428_v36 = vshll.u32 %v5129_v16, 16 }
  0x2b   : > { %v432_v37 = vshrl.u32 %v5129_v16, 16  ;;  %4617 = vmatprep.subr.bf16.mxu0 %v5118_v58  ;;  %4510 = vmatpush3.bf16.msra.mxu1 %v4983_v2  ;;  %v417_v39 = vsel %vm5035_vm3, %v412_v26, %v416_v55  ;;  %v603_v41 = vor.u32 %v602_v27, %v598_v21  ;;  %v421_v42 = vrot.slane %v419_v31, 4  ;;  %v5168_v2 = vld [vmem:[%s6552_s1 + $0x38] sm:$0xff]  }
  0x2c   : > { %v438_v43 = vshll.u32 %v5136_v23, 16  ;;  %v5158_v46 = vcombine.low %v407_v18, %v417_v39  ;;  %v599_v47 = vsel %vm5035_vm3, %v594_v32, %v598_v21  ;;  %v424_v50 = vrot.slane %v422_v33, 5  ;;  %4511 = vmatprep.subr.bf16.mxu1 %v4884_v24  ;;  %v5183_v21 = vld [vmem:[%s4994_s10 + $0x34] sm:$0xf]  ;;  %v5188_v33 = vld [vmem:[%s4994_s10 + $0x38] sm:$0x1] }
  0x2d   : > { %v430_v51 = vrot.slane %v428_v36, 5  ;;  %v604_v53 = vrot.slane %v603_v41, 4  ;;  %v434_v54 = vrot.slane %v432_v37, 4  ;;  %v611_v59 = vshrl.u32 %v5148_v38, 16  ;;  %v5193_v41 = vld [vmem:[%s4994_s10 + $0x90] sm:$0xf] }
  0x2e   : > { %6614 = vst [vmem:[#allocation11_spill] sm:$0xff] %v5158_v46  ;;  %v440_v55 = vrot.slane %v438_v43, 5  ;;  %4481 = vmatprep.mubr.msk.bf16.mxu0 %vm790_vm2, %v5158_v46  ;;  %v425_v62 = vor.u32 %v424_v50, %v421_v42  ;;  %v614_v63 = vshll.u32 %v5148_v38, 16  ;;  %v620_v0 = vshll.u32 %v5156_v44, 16  ;;  %v5202_v50 = vld [vmem:[%s4994_s10 + $0x94] sm:$0xf] }
  0x2f   : > { %v624_v7 = vshrl.u32 %v5156_v44, 16  ;;  %v609_v10 = vsel %vm5035_vm3, %v604_v53, %v608_v28  ;;  %v435_v12 = vor.u32 %v434_v54, %v430_v51  ;;  %v613_v18 = vrot.slane %v611_v59, 4  ;;  %4512 = vmatpush3.bf16.msra.mxu1 %v4884_v24 }
  0x30   : > { %v630_v19 = vshll.u32 %v5163_v52, 16  ;;  %v5185_v26 = vcombine.low %v599_v47, %v609_v10  ;;  %v426_v27 = vrot.slane %v425_v62, 4  ;;  %v616_v31 = vrot.slane %v614_v63, 5  ;;  %4581 = vmatprep.subr.bf16.mxu1 %v5168_v2  ;;  %v5210_v10 = vld [vmem:[%s4994_s10 + $0x98] sm:$0x1] }
  0x31   : > { %v622_v32 = vrot.slane %v620_v0, 5  ;;  %v436_v36 = vrot.slane %v435_v12, 4  ;;  %v626_v28 = vrot.slane %v624_v7, 4  ;;  %v443_v39 = vshrl.u32 %v5177_v3, 16  ;;  %v5213_v12 = vld [vmem:[%s4994_s10 + $0x3c] sm:$0xf] }
  0x32   : > { %6615 = vst [vmem:[#allocation12_spill] sm:$0xff] %v5185_v26  ;;  %v632_v37 = vrot.slane %v630_v19, 5  ;;  %4497 = vmatprep.mubr.msk.bf16.mxu1 %vm790_vm2, %v5185_v26  ;;  %v431_v24 = vsel %vm5035_vm3, %v426_v27, %v430_v51  ;;  %v617_v42 = vor.u32 %v616_v31, %v613_v18  ;;  %v446_v43 = vshll.u32 %v5177_v3, 16  ;;  %v5218_v31 = vld [vmem:[%s4994_s10 + $0x40] sm:$0xf] }
  0x33   : > { %v452_v47 = vshll.u32 %v5183_v21, 16  ;;  %v441_v53 = vsel %vm5035_vm3, %v436_v36, %v440_v55  ;;  %v627_v54 = vor.u32 %v626_v28, %v622_v32  ;;  %v445_v59 = vrot.slane %v443_v39, 4 }
  0x34   : > { %v456_v62 = vshrl.u32 %v5183_v21, 16  ;;  %v5207_v63 = vcombine.low %v431_v24, %v441_v53  ;;  %v618_v0 = vrot.slane %v617_v42, 4  ;;  %v448_v7 = vrot.slane %v446_v43, 5 }
  0x35   : > { %v454_v51 = vrot.slane %v452_v47, 5  ;;  %v628_v18 = vrot.slane %v627_v54, 4  ;;  %v462_v27 = vshll.u32 %v5188_v33, 16  ;;  %v635_v55 = vshrl.u32 %v5193_v41, 16 }
  0x36   : > { %6616 = vst [vmem:[#allocation13_spill] sm:$0xff] %v5207_v63  ;;  %v458_v19 = vrot.slane %v456_v62, 4  ;;  %4482 = vmatmul.mubr.msk.bf16.gmra.mxu0 %vm790_vm2, %v5207_v63  ;;  %v623_v36 = vsel %vm5035_vm3, %v618_v0, %v622_v32  ;;  %v449_v28 = vor.u32 %v448_v7, %v445_v59  ;;  %v638_v39 = vshll.u32 %v5193_v41, 16  ;;  %v5234_v32 = vld [vmem:[%s4994_s10 + $0x9c] sm:$0xf] }
  0x37   : > { %v644_v24 = vshll.u32 %v5202_v50, 16  ;;  %v633_v42 = vsel %vm5035_vm3, %v628_v18, %v632_v37  ;;  %v464_v47 = vrot.slane %v462_v27, 5  ;;  %v637_v53 = vrot.slane %v635_v55, 4  ;;  %v5240_v18 = vld [vmem:[%s4994_s10 + $0xa0] sm:$0xf] }
  0x38   : > { %v459_v43 = vor.u32 %v458_v19, %v454_v51  ;;  %v5228_v54 = vcombine.low %v623_v36, %v633_v42  ;;  %v450_v62 = vrot.slane %v449_v28, 4  ;;  %v640_v60 = vrot.slane %v638_v39, 5 }
  0x39   : > { %v646_v13 = vrot.slane %v644_v24, 5  ;;  %v648_v0 = vshrl.u32 %v5202_v50, 16  ;;  %v654_v7 = vshll.u32 %v5210_v10, 16  ;;  %v467_v37 = vshrl.u32 %v5213_v12, 16 }
  0x3a   : > { %6617 = vst [vmem:[#allocation14_spill] sm:$0xff] %v5228_v54  ;;  %v460_v59 = vrot.slane %v459_v43, 4  ;;  %4498 = vmatmul.mubr.msk.bf16.gmra.mxu1 %vm790_vm2, %v5228_v54  ;;  %v455_v19 = vsel %vm5035_vm3, %v450_v62, %v454_v51  ;;  %v641_v27 = vor.u32 %v640_v60, %v637_v53  ;;  %v470_v55 = vshll.u32 %v5213_v12, 16 }
  0x3b   : > { %v476_v36 = vshll.u32 %v5218_v31, 16  ;;  %v650_v39 = vrot.slane %v648_v0, 4  ;;  %v656_v24 = vrot.slane %v654_v7, 5  ;;  %v469_v42 = vrot.slane %v467_v37, 4  ;;  %v5265_v37 = vld [vmem:[%s4994_s10 + $0x48] sm:$0xf] }
  0x3c   : > { %v465_v28 = vsel %vm5035_vm3, %v460_v59, %v464_v47  ;;  %v642_v26 = vrot.slane %v641_v27, 4  ;;  %v472_v17 = vrot.slane %v470_v55, 5  ;;  %v480_v51 = vshrl.u32 %v5218_v31, 16 }
  0x3d   : > { %v5250_v43 = vcombine.low %v455_v19, %v465_v28  ;;  %v478_v54 = vrot.slane %v476_v36, 5  ;;  %v651_v60 = vor.u32 %v650_v39, %v646_v13  ;;  %v486_v53 = vshll.u32 %v5231_v56, 16  ;;  %v5268_v28 = vld [vmem:[%s4994_s10 + $0x4c] sm:$0xf] }
  0x3e   : > { %v659_v62 = vshrl.u32 %v5234_v32, 16  ;;  %v647_v47 = vsel %vm5035_vm3, %v642_v26, %v646_v13  ;;  %v473_v59 = vor.u32 %v472_v17, %v469_v42  ;;  %v662_v0 = vshll.u32 %v5234_v32, 16  ;;  %v5272_v13 = vld [vmem:[%s4994_s10 + $0x50] sm:$0x1]  ;;  %v5275_v17 = vld [vmem:[%s4994_s10 + $0xa8] sm:$0xf] }
  0x3f   : > { %6618 = vst [vmem:[#allocation15_spill] sm:$0xff] %v5250_v43  ;;  %4485 = vmatprep.mubr.msk.bf16.mxu0 %vm790_vm2, %v5250_v43  ;;  %v668_v7 = vshll.u32 %v5240_v18, 16  ;;  %v652_v19 = vrot.slane %v651_v60, 4  ;;  %v482_v27 = vrot.slane %v480_v51, 4  ;;  %v488_v55 = vrot.slane %v486_v53, 5  ;;  %6620 = vst [vmem:[#allocation17_spill] sm:$0xff] %v5275_v17 }
  0x40   : > { %v661_v36 = vrot.slane %v659_v62, 4  ;;  %v474_v39 = vrot.slane %v473_v59, 4  ;;  %v664_v63 = vrot.slane %v662_v0, 5  ;;  %v672_v46 = vshrl.u32 %v5240_v18, 16 }
  0x41   : > { %v670_v43 = vrot.slane %v668_v7, 5  ;;  %v657_v26 = vsel %vm5035_vm3, %v652_v19, %v656_v24  ;;  %v483_v42 = vor.u32 %v482_v27, %v478_v54  ;;  %v678_v60 = vshll.u32 %v5253_v9, 16  ;;  %v5287_v24 = vld [vmem:[%s4994_s10 + $0xac] sm:$0xf] }
  0x42   : > { %v491_v51 = vshrl.u32 %v5265_v37, 16  ;;  %v5281_v53 = vcombine.low %v647_v47, %v657_v26  ;;  %v479_v62 = vsel %vm5035_vm3, %v474_v39, %v478_v54  ;;  %v665_v59 = vor.u32 %v664_v63, %v661_v36  ;;  %6622 = vst [vmem:[#allocation19_spill] sm:$0xff] %v5287_v24  ;;  %v5294_v54 = vld [vmem:[%s4994_s10 + $0xb0] sm:$0x1] }
  0x43   : > { %v674_v0 = vrot.slane %v672_v46, 4  ;;  %v484_v7 = vrot.slane %v483_v42, 4  ;;  %v680_v35 = vrot.slane %v678_v60, 5  ;;  %v494_v34 = vshll.u32 %v5265_v37, 16  ;;  %6623 = vst [vmem:[#allocation20_spill] sm:$0xff] %v5294_v54 }
  0x44   : > { %6621 = vst [vmem:[#allocation18_spill] sm:$0xff] %v5281_v53  ;;  %v493_v49 = vrot.slane %v491_v51, 4  ;;  %4501 = vmatprep.mubr.msk.bf16.mxu1 %vm790_vm2, %v5281_v53  ;;  %v666_v19 = vrot.slane %v665_v59, 4  ;;  %v500_v47 = vshll.u32 %v5268_v28, 16  ;;  %v504_v26 = vshrl.u32 %v5268_v28, 16 }
  0x45   : > { %v675_v27 = vor.u32 %v674_v0, %v670_v43  ;;  %v489_v46 = vsel %vm5035_vm3, %v484_v7, %v488_v55  ;;  %v496_v63 = vrot.slane %v494_v34, 5  ;;  %v510_v36 = vshll.u32 %v5272_v13, 16  ;;  %v5301_v42 = vld [vmem:[%s4994_s10 + $0x54] sm:$0xf] }
  0x46   : > { %v683_v39 = vshrl.u32 %v5275_v17, 16  ;;  %v5303_v60 = vcombine.low %v479_v62, %v489_v46  ;;  %v671_v51 = vsel %vm5035_vm3, %v666_v19, %v670_v43  ;;  %v502_v0 = vrot.slane %v500_v47, 5  ;;  %v5318_v47 = vld [vmem:[%s4994_s10 + $0x58] sm:$0xf] }
  0x47   : > { %v676_v59 = vrot.slane %v675_v27, 4  ;;  %v497_v53 = vor.u32 %v496_v63, %v493_v49  ;;  %v506_v61 = vrot.slane %v504_v26, 4  ;;  %v512_v48 = vrot.slane %v510_v36, 5  ;;  %v5321_v36 = vld [vmem:[%s4994_s10 + $0x5c] sm:$0x1] }
  0x48   : > { %6624 = vst [vmem:[#allocation21_spill] sm:$0xff] %v5303_v60  ;;  %v685_v45 = vrot.slane %v683_v39, 4  ;;  %4486 = vmatmul.mubr.msk.bf16.gmra.mxu0 %vm790_vm2, %v5303_v60  ;;  %v686_v55 = vshll.u32 %v5275_v17, 16  ;;  %v692_v43 = vshll.u32 %v5287_v24, 16  ;;  %v696_v62 = vshrl.u32 %v5287_v24, 16 }
  0x49   : > { %v681_v34 = vsel %vm5035_vm3, %v676_v59, %v680_v35  ;;  %v498_v49 = vrot.slane %v497_v53, 4  ;;  %v507_v19 = vor.u32 %v506_v61, %v502_v0  ;;  %v702_v27 = vshll.u32 %v5294_v54, 16  ;;  %v5343_v24 = vld [vmem:[%s4994_s10 + $0xbc] sm:$0x1] }
  0x4a   : > { %v5314_v7 = vcombine.low %v671_v51, %v681_v34  ;;  %v688_v26 = vrot.slane %v686_v55, 5  ;;  %v694_v46 = vrot.slane %v692_v43, 5  ;;  %v698_v63 = vrot.slane %v696_v62, 4  ;;  %v5331_v62 = vld [vmem:[%s4994_s10 + $0xb4] sm:$0xf] }
  0x4b   : > { %v515_v35 = vshrl.u32 %v5301_v42, 16  ;;  %v503_v53 = vsel %vm5035_vm3, %v498_v49, %v502_v0  ;;  %v508_v61 = vrot.slane %v507_v19, 4  ;;  %v704_v39 = vrot.slane %v702_v27, 5  ;;  %v5338_v49 = vld [vmem:[%s4994_s10 + $0xb8] sm:$0xf] }
  0x4c   : > { %6625 = vst [vmem:[#allocation22_spill] sm:$0xff] %v5314_v7  ;;  %4502 = vmatmul.mubr.msk.bf16.gmra.mxu1 %vm790_vm2, %v5314_v7  ;;  %v518_v51 = vshll.u32 %v5301_v42, 16  ;;  %v689_v59 = vor.u32 %v688_v26, %v685_v45  ;;  %v699_v34 = vor.u32 %v698_v63, %v694_v46  ;;  %v524_v43 = vshll.u32 %v5318_v47, 16 }
  0x4d   : > { %v517_v55 = vrot.slane %v515_v35, 4  ;;  %v513_v60 = vsel %vm5035_vm3, %v508_v61, %v512_v48  ;;  %v528_v7 = vshrl.u32 %v5318_v47, 16  ;;  %v534_v0 = vshll.u32 %v5321_v36, 16 }
  0x4e   : > { %v520_v54 = vrot.slane %v518_v51, 5  ;;  %v5340_v19 = vcombine.low %v503_v53, %v513_v60  ;;  %v690_v45 = vrot.slane %v689_v59, 4  ;;  %v700_v27 = vrot.slane %v699_v34, 4 }
  0x4f   : > { %v526_v26 = vrot.slane %v524_v43, 5  ;;  %v530_v35 = vrot.slane %v528_v7, 4  ;;  %v536_v17 = vrot.slane %v534_v0, 5  ;;  %v707_v9 = vshrl.u32 %v5331_v62, 16 }
  0x50   : > { %6626 = vst [vmem:[#allocation23_spill] sm:$0xff] %v5340_v19  ;;  %v521_v63 = vor.u32 %v520_v54, %v517_v55  ;;  %4489 = vmatprep.mubr.msk.bf16.mxu0 %vm790_vm2, %v5340_v19  ;;  %v695_v48 = vsel %vm5035_vm3, %v690_v45, %v694_v46  ;;  %v705_v60 = vsel %vm5035_vm3, %v700_v27, %v704_v39  ;;  %v710_v53 = vshll.u32 %v5331_v62, 16 }
  0x51   : > { %v716_v61 = vshll.u32 %v5338_v49, 16  ;;  %v5354_v54 = vcombine.low %v695_v48, %v705_v60  ;;  %v531_v51 = vor.u32 %v530_v35, %v526_v26  ;;  %v709_v59 = vrot.slane %v707_v9, 4 }
  0x52   : > { %v522_v7 = vrot.slane %v521_v63, 4  ;;  %v712_v34 = vrot.slane %v710_v53, 5  ;;  %v720_v43 = vshrl.u32 %v5338_v49, 16  ;;  %v726_v0 = vshll.u32 %v5343_v24, 16 }
  0x53   : > { %6627 = vst [vmem:[#allocation24_spill] sm:$0xff] %v5354_v54  ;;  %v718_v55 = vrot.slane %v716_v61, 5  ;;  %4505 = vmatprep.mubr.msk.bf16.mxu1 %vm790_vm2, %v5354_v54  ;;  %v532_v45 = vrot.slane %v531_v51, 4  ;;  %v3911_v9 = vrot.slane %v4997_v4, 9  ;;  %v1322_v27 = vrot.slane %v5000_v5, 5 }
  0x54   : > { %v527_v39 = vsel %vm5035_vm3, %v522_v7, %v526_v26  ;;  %v713_v63 = vor.u32 %v712_v34, %v709_v59  ;;  %v722_v35 = vrot.slane %v720_v43, 4  ;;  %v728_v48 = vrot.slane %v726_v0, 5 }
  0x55   : > { %v5372_v60 = vcombine.low %v5023_v20, %v5031_v29  ;;  %v537_v53 = vsel %vm5035_vm3, %v532_v45, %v536_v17  ;;  %v1323_v61 = vsel %vm5360_vm6, %v3911_v9, %v1322_v27  ;;  %v1324_v54 = vrot.slane %v1322_v27, 4 }
  0x56   : > { %v3912_v26 = vrot.slane %v5023_v20, 9  ;;  %v5379_v7 = vcombine.low %v527_v39, %v537_v53  ;;  %v714_v51 = vrot.slane %v713_v63, 4  ;;  %v723_v19 = vor.u32 %v722_v35, %v718_v55 }
  0x57   : > { %v6630_v59 = vrot.slane %v5031_v29, 5  ;;  %v6631_v43 = vrot.slane %v5003_v6, 5  ;;  %v5393_v20 = vcombine.low %v5070_v8, %v5078_v22  ;;  %v3913_v39 = vrot.slane %v5070_v8, 9 }
  0x58   : > { %4490 = vmatmul.mubr.msk.bf16.gmra.mxu0 %vm790_vm2, %v5379_v7  ;;  %v719_v6 = vsel %vm5035_vm3, %v714_v51, %v718_v55  ;;  %v724_v9 = vrot.slane %v723_v19, 4  ;;  %v1336_v35 = vrot.slane %v5078_v22, 5  ;;  %v1339_v53 = vrot.slane %v5085_v25, 5 }
  0x59   : > { %v1331_v34 = vrot.slane %v6630_v59, 4  ;;  %v1326_v0 = vsel %vm5360_vm6, %v1324_v54, %v6631_v43  ;;  %v6632_v17 = vmov %v6630_v59  ;;  %v6633_v54 = vrot.slane %v5041_v40, 5 }
  0x5a   : > { %v1330_v45 = vsel %vm5360_vm6, %v3912_v26, %v6632_v17  ;;  %v3927_v27 = vcombine.low %v1323_v61, %v1326_v0  ;;  %v5410_v8 = vcombine.low %v5122_v1, %v5129_v16  ;;  %v729_v55 = vsel %vm5035_vm3, %v724_v9, %v728_v48  ;;  %v4899_v0 = vld [vmem:[%s6552_s1 + $0x40] sm:$0xff]  }
  0x5b   : > { %v1333_v29 = vsel %vm5360_vm6, %v1331_v34, %v6633_v54  ;;  %v3877_v19 = vcombine.low %v4997_v4, %v5000_v5  ;;  %v1343_v40 = vrot.slane %v5129_v16, 5  ;;  %v5418_v61 = vcombine.low %v719_v6, %v729_v55  ;;  %v5463_v55 = vld [vmem:[%s6552_s1 + $0x68] sm:$0xff]  }
  0x5c   : > { %v5404_v63 = vcombine.low %v1330_v45, %v1333_v29  ;;  %4549 = vmatprep.mubr.msk.bf16.mxu0 %vm790_vm2, %v3927_v27  ;;  %v1337_v22 = vsel %vm5360_vm6, %v3913_v39, %v1336_v35  ;;  %v1338_v25 = vrot.slane %v1336_v35, 4  ;;  %v1350_v26 = vrot.slane %v5183_v21, 5 }
  0x5d   : > { %4506 = vmatmul.mubr.msk.bf16.gmra.mxu1 %vm790_vm2, %v5418_v61  ;;  %v3914_v4 = vrot.slane %v5122_v1, 9  ;;  %v1345_v5 = vrot.slane %v1343_v40, 4  ;;  %v1346_v51 = vrot.slane %v5136_v23, 5  ;;  %v3915_v59 = vrot.slane %v5177_v3, 9 }
  0x5e   : > { %v1340_v48 = vsel %vm5360_vm6, %v1338_v25, %v1339_v53  ;;  %4513 = vmatprep.mubr.msk.bf16.mxu1 %vm790_vm2, %v3877_v19  ;;  %v1352_v34 = vrot.slane %v1350_v26, 4  ;;  %v1353_v43 = vrot.slane %v5188_v33, 5  ;;  %v1357_v17 = vrot.slane %v5218_v31, 5  ;;  %v4897_v53 = vld [vmem:[%s6552_s1 + $0x30] sm:$0xff]  }
  0x5f   : > { %v5430_v16 = vcombine.low %v1337_v22, %v1340_v48  ;;  %v1364_v1 = vrot.slane %v5268_v28, 5  ;;  %v1344_v23 = vsel %vm5360_vm6, %v3914_v4, %v1343_v40  ;;  %v1347_v33 = vsel %vm5360_vm6, %v1345_v5, %v1346_v51  ;;  %v5487_v4 = vld [vmem:[%s6552_s1 + $0x58] sm:$0xff]  }
  0x60   : > { %4550 = vmatmul.mubr.msk.bf16.vlgmr.msra.gmra.mxu0 %vm790_vm2, %v5404_v63  ;;  %v3916_v45 = vrot.slane %v5213_v12, 9  ;;  %v1351_v39 = vsel %vm5360_vm6, %v3915_v59, %v1350_v26  ;;  %v1354_v6 = vsel %vm5360_vm6, %v1352_v34, %v1353_v43  ;;  %v1360_v9 = vrot.slane %v5231_v56, 5 }
  0x61   : > { %4618 = vmatpush3.bf16.msra.mxu0 %v5118_v58  ;;  %4553 = vmatprep.mubr.msk.bf16.mxu0 %vm790_vm2, %v5430_v16  ;;  %v3917_v58 = vrot.slane %v5265_v37, 9  ;;  %v1359_v27 = vrot.slane %v1357_v17, 4  ;;  %v1366_v54 = vrot.slane %v1364_v1, 4  ;;  %v1367_v29 = vrot.slane %v5272_v13, 5 }
  0x62   : > { %4619 = vmatprep.subr.bf16.mxu0 %v4899_v0  ;;  %v1371_v35 = vrot.slane %v5318_v47, 5  ;;  %v5465_v19 = vcombine.low %v1344_v23, %v1347_v33  ;;  %v5469_v56 = vcombine.low %v1351_v39, %v1354_v6  ;;  %v1358_v13 = vsel %vm5360_vm6, %v3916_v45, %v1357_v17  ;;  %v6634_v6 = vld [vmem:[#allocation16_spill] sm:$0xff] }
  0x63   : > { %v1365_v40 = vsel %vm5360_vm6, %v3917_v58, %v1364_v1  ;;  %v3918_v22 = vrot.slane %v5301_v42, 9  ;;  %v1361_v25 = vsel %vm5360_vm6, %v1359_v27, %v1360_v9  ;;  %v1368_v26 = vsel %vm5360_vm6, %v1366_v54, %v1367_v29  ;;  %v6635_v58 = vld [vmem:[#allocation19_spill] sm:$0xff]  ;;  %v6636_v27 = vld [vmem:[#allocation17_spill] sm:$0xff] }
  0x64   : > { %v1373_v48 = vrot.slane %v1371_v35, 4  ;;  %v5494_v5 = vcombine.low %v5177_v3, %v5183_v21  ;;  %v5498_v51 = vcombine.low %v5213_v12, %v5218_v31  ;;  %v3919_v59 = vrot.slane %v5010_v11, 9 }
  0x65   : > { %4514 = vmatmul.mubr.msk.bf16.vlgmr.msra.gmra.mxu1 %vm790_vm2, %v5372_v60  ;;  %4620 = vmatpush3.bf16.msra.mxu0 %v4899_v0  ;;  %v1378_v34 = vrot.slane %v5017_v14, 5  ;;  %v5510_v43 = vcombine.low %v5148_v38, %v5156_v44  ;;  %v3922_v3 = vrot.slane %v5148_v38, 9  ;;  %v5513_v21 = vcombine.low %v1358_v13, %v1361_v25 }
  0x66   : > { %4582 = vmatpush3.bf16.msra.mxu1 %v5168_v2  ;;  %4517 = vmatprep.mubr.msk.bf16.mxu1 %vm790_vm2, %v5393_v20  ;;  %v1374_v2 = vrot.slane %v5321_v36, 5  ;;  %v5502_v36 = vcombine.low %v5265_v37, %v5268_v28  ;;  %v5515_v12 = vcombine.low %v1365_v40, %v1368_v26  ;;  %v1372_v31 = vsel %vm5360_vm6, %v3918_v22, %v1371_v35  ;;  %v6637_v22 = vld [vmem:[#allocation20_spill] sm:$0xff] }
  0x67   : > { %4583 = vmatprep.subr.bf16.mxu1 %v4897_v53  ;;  %4689 = vmatprep.subr.bf16.mxu0 %v5463_v55  ;;  %v1381_v37 = vrot.slane %v5020_v15, 5  ;;  %v1399_v14 = vrot.slane %v5156_v44, 5  ;;  %v1402_v28 = vrot.slane %v5163_v52, 5  ;;  %v5526_v38 = vcombine.low %v5193_v41, %v5202_v50 }
  0x68   : > { %4554 = vmatmul.mubr.msk.bf16.gmra.mxu0 %vm790_vm2, %v5465_v19  ;;  %v1375_v11 = vsel %vm5360_vm6, %v1373_v48, %v1374_v2  ;;  %v1385_v0 = vrot.slane %v5056_v57, 5  ;;  %v3923_v17 = vrot.slane %v5193_v41, 9  ;;  %v1406_v15 = vrot.slane %v5202_v50, 5 }
  0x69   : > { %4557 = vmatprep.mubr.msk.bf16.mxu0 %vm790_vm2, %v5469_v56  ;;  %v1409_v1 = vrot.slane %v5210_v10, 5  ;;  %v1380_v44 = vrot.slane %v1378_v34, 4  ;;  %v1400_v52 = vsel %vm5360_vm6, %v3922_v3, %v1399_v14  ;;  %v1401_v23 = vrot.slane %v1399_v14, 4  ;;  %v6638_v3 = vld [vmem:[#allocation8_spill] sm:$0xff] }
  0x6a   : > { %4584 = vmatpush3.bf16.msra.mxu1 %v4897_v53  ;;  %v5539_v33 = vcombine.low %v5234_v32, %v5240_v18  ;;  %v1407_v41 = vsel %vm5360_vm6, %v3923_v17, %v1406_v15  ;;  %v1408_v50 = vrot.slane %v1406_v15, 4  ;;  %v3924_v10 = vrot.slane %v5234_v32, 9 }
  0x6b   : > { %4653 = vmatprep.subr.bf16.mxu1 %v5487_v4  ;;  %v1413_v45 = vrot.slane %v5240_v18, 5  ;;  %v1403_v39 = vsel %vm5360_vm6, %v1401_v23, %v1402_v28  ;;  %v1416_v9 = vrot.slane %v6634_v6, 5  ;;  %v5552_v54 = vcombine.low %v6636_v27, %v6635_v58  ;;  %v6639_v23 = vld [vmem:[#allocation3_spill] sm:$0xff] }
  0x6c   : > { %v3925_v29 = vrot.slane %v6636_v27, 9  ;;  %v5557_v35 = vcombine.low %v1400_v52, %v1403_v39  ;;  %v1410_v32 = vsel %vm5360_vm6, %v1408_v50, %v1409_v1  ;;  %v1420_v40 = vrot.slane %v6635_v58, 5 }
  0x6d   : > { %4518 = vmatmul.mubr.msk.bf16.gmra.mxu1 %vm790_vm2, %v5410_v8  ;;  %v1414_v18 = vsel %vm5360_vm6, %v3924_v10, %v1413_v45  ;;  %v1415_v53 = vrot.slane %v1413_v45, 4  ;;  %v5565_v13 = vcombine.low %v1407_v41, %v1410_v32  ;;  %v1423_v25 = vrot.slane %v6637_v22, 5  ;;  %v6642_v45 = vld [vmem:[#allocation9_spill] sm:$0xff]  ;;  %v4920_v32 = vld [vmem:[%s4994_s10 + $0x64] sm:$0xf] }
  0x6e   : > { %4521 = vmatprep.mubr.msk.bf16.mxu1 %vm790_vm2, %v5494_v5  ;;  %v5571_v26 = vcombine.low %v5331_v62, %v5338_v49  ;;  %v1379_v48 = vsel %vm5360_vm6, %v3919_v59, %v1378_v34  ;;  %v1382_v2 = vsel %vm5360_vm6, %v1380_v44, %v1381_v37  ;;  %v1392_v14 = vrot.slane %v6638_v3, 5  ;;  %v6640_v37 = vld [vmem:[#allocation4_spill] sm:$0xff] }
  0x6f   : > { %v1417_v28 = vsel %vm5360_vm6, %v1415_v53, %v1416_v9  ;;  %v1421_v15 = vsel %vm5360_vm6, %v3925_v29, %v1420_v40  ;;  %v1422_v1 = vrot.slane %v1420_v40, 4  ;;  %v5584_v52 = vcombine.low %v1372_v31, %v1375_v11  ;;  %v6641_v31 = vld [vmem:[#allocation6_spill] sm:$0xff] }
  0x70   : > { %4558 = vmatmul.mubr.msk.bf16.gmra.mxu0 %vm790_vm2, %v5513_v21  ;;  %v5580_v17 = vcombine.low %v1414_v18, %v1417_v28  ;;  %v3920_v41 = vrot.slane %v6639_v23, 9  ;;  %v5589_v59 = vcombine.low %v1379_v48, %v1382_v2  ;;  %v1387_v34 = vrot.slane %v1385_v0, 4  ;;  %v4919_v29 = vld [vmem:[%s4994_s10 + $0x60] sm:$0xf] }
  0x71   : > { %4561 = vmatprep.mubr.msk.bf16.mxu0 %vm790_vm2, %v5515_v12  ;;  %v1388_v44 = vrot.slane %v6640_v37, 5  ;;  %v1424_v50 = vsel %vm5360_vm6, %v1422_v1, %v1423_v25  ;;  %v3921_v11 = vrot.slane %v6641_v31, 9  ;;  %v1394_v10 = vrot.slane %v1392_v14, 4  ;;  %v5674_v28 = vld [vmem:[%s4994_s10 + $0xc0] sm:$0xf] }
  0x72   : > { %v1395_v39 = vrot.slane %v6642_v45, 5  ;;  %v5598_v6 = vcombine.low %v1421_v15, %v1424_v50  ;;  %v5604_v9 = vcombine.low %v5301_v42, %v5318_v47  ;;  %v1386_v58 = vsel %vm5360_vm6, %v3920_v41, %v1385_v0  ;;  %v303_v15 = vld [vmem:[%s4994_s10 + $0xc8] sm:$0x1]  ;;  %v4908_v45 = vld [vmem:[%s6552_s1 + $0x50] sm:$0xff]  }
  0x73   : > { %v1389_v27 = vsel %vm5360_vm6, %v1387_v34, %v1388_v44  ;;  %v5614_v18 = vcombine.low %v4919_v29, %v4920_v32  ;;  %v1393_v53 = vsel %vm5360_vm6, %v3921_v11, %v1392_v14  ;;  %v5632_v0 = vcombine.low %v6639_v23, %v5056_v57  ;;  %v6643_v34 = vld [vmem:[#allocation7_spill] sm:$0xff]  ;;  %v6650_v29 = vld [vmem:[#allocation10_spill] sm:$0xff]  ;;  %v6651_v32 = vld [vmem:[#allocation12_spill] sm:$0xff] }
  0x74   : > { %v1396_v42 = vsel %vm5360_vm6, %v1394_v10, %v1395_v39  ;;  %v5620_v47 = vcombine.low %v1386_v58, %v1389_v27  ;;  %v5638_v22 = vcombine.low %v6641_v31, %v6638_v3  ;;  %v1427_v57 = vrot.slane %v5338_v49, 5  ;;  %v4909_v31 = vld [vmem:[%s6552_s1 + $0x60] sm:$0xff]   ;;  %v6644_v11 = vld [vmem:[#allocation11_spill] sm:$0xff]  ;;  %v6645_v10 = vld [vmem:[#allocation13_spill] sm:$0xff] }
  0x75   : > { %4522 = vmatmul.mubr.msk.bf16.gmra.mxu1 %vm790_vm2, %v5498_v51  ;;  %v5624_v40 = vcombine.low %v1393_v53, %v1396_v42  ;;  %v3926_v25 = vrot.slane %v5331_v62, 9  ;;  %v1430_v2 = vrot.slane %v5343_v24, 5  ;;  %v5668_v24 = vld [vmem:[%s4994_s10 + $0xc4] sm:$0xf]  ;;  %v3999_v1 = vrot.slane %v5674_v28, 9  ;;  %v6646_v39 = vld [vmem:[#allocation15_spill] sm:$0xff] }
  0x76   : > { %4525 = vmatprep.mubr.msk.bf16.mxu1 %vm790_vm2, %v5502_v36  ;;  %v1429_v48 = vrot.slane %v1427_v57, 4  ;;  %v2184_v62 = vrot.slane %v5668_v24, 5  ;;  %v2187_v41 = vrot.slane %v303_v15, 5  ;;  %v6647_v58 = vld [vmem:[#allocation21_spill] sm:$0xff]  ;;  %v6652_v53 = vld [vmem:[#allocation14_spill] sm:$0xff]  ;;  %v1947_v42 = vshrl.u32 %v5674_v28, 16 }
  0x77   : > { %v1428_v49 = vsel %vm5360_vm6, %v3926_v25, %v1427_v57  ;;  %v6649_v27 = vld [vmem:[#allocation5_spill] sm:$0xff]  ;;  %v1950_v57 = vshll.u32 %v5674_v28, 16  ;;  %v1960_v25 = vshrl.u32 %v5668_v24, 16 }
  0x78   : > { %4562 = vmatmul.mubr.msk.bf16.gmra.mxu0 %vm790_vm2, %v5584_v52  ;;  %v1431_v3 = vsel %vm5360_vm6, %v1429_v48, %v1430_v2  ;;  %v2186_v23 = vrot.slane %v2184_v62, 4  ;;  %v2185_v37 = vsel %vm5360_vm6, %v3999_v1, %v2184_v62  ;;  %v1956_v48 = vshll.u32 %v5668_v24, 16  ;;  %v6653_v1 = vld [vmem:[#allocation18_spill] sm:$0xff] }
  0x79   : > { %4565 = vmatprep.mubr.msk.bf16.mxu0 %vm790_vm2, %v5589_v59  ;;  %v5663_v14 = vcombine.low %v1428_v49, %v1431_v3  ;;  %v1949_v2 = vrot.slane %v1947_v42, 4  ;;  %v1952_v49 = vrot.slane %v1950_v57, 5  ;;  %v1962_v62 = vrot.slane %v1960_v25, 4  ;;  %v6655_v57 = vld [vmem:[#allocation24_spill] sm:$0xff] }
  0x7a   : > { %v2188_v44 = vsel %vm5360_vm6, %v2186_v23, %v2187_v41  ;;  %v1958_v3 = vrot.slane %v1956_v48, 5  ;;  %v6654_v23 = vld [vmem:[#allocation22_spill] sm:$0xff] }
  0x7b   : > { %v5686_v50 = vcombine.low %v2185_v37, %v2188_v44  ;;  %v1953_v41 = vor.u32 %v1952_v49, %v1949_v2  ;;  %v1966_v44 = vshll.u32 %v303_v15, 16  ;;  %v3961_v2 = vcombine.low %v5674_v28, %v5668_v24  ;;  %v4914_v49 = vld [vmem:[%s6552_s1 + $0x80] sm:$0xff]  }
  0x7c   : > { %v1963_v37 = vor.u32 %v1962_v62, %v1958_v3 }
  0x7d   : > { %4526 = vmatmul.mubr.msk.bf16.gmra.mxu1 %vm790_vm2, %v5604_v9  ;;  %v1968_v42 = vrot.slane %v1966_v44, 5 }
  0x7e   : > { %4529 = vmatprep.mubr.msk.bf16.mxu1 %vm790_vm2, %v5614_v18 }
  0x80   : > { %4566 = vmatmul.mubr.msk.bf16.gmra.mxu0 %vm790_vm2, %v5620_v47 }
  0x81   : > { %4569 = vmatprep.mubr.msk.bf16.mxu0 %vm790_vm2, %v5624_v40 }
  0x85   : > { %4530 = vmatmul.mubr.msk.bf16.gmra.mxu1 %vm790_vm2, %v5632_v0 }
  0x86   : > { %4533 = vmatprep.mubr.msk.bf16.mxu1 %vm790_vm2, %v5638_v22 }
  0x88   : > { %4570 = vmatmul.mubr.msk.bf16.gmra.mxu0 %vm790_vm2, %v5557_v35 }
  0x89   : > { %4573 = vmatprep.mubr.msk.bf16.mxu0 %vm790_vm2, %v5565_v13 }
  0x8d   : > { %4534 = vmatmul.mubr.msk.bf16.gmra.mxu1 %vm790_vm2, %v5510_v43 }
  0x8e   : > { %4537 = vmatprep.mubr.msk.bf16.mxu1 %vm790_vm2, %v5526_v38 }
  0x90   : > { %4574 = vmatmul.mubr.msk.bf16.gmra.mxu0 %vm790_vm2, %v5580_v17 }
  0x91   : > { %4577 = vmatprep.mubr.msk.bf16.mxu0 %vm790_vm2, %v5598_v6 }
  0x95   : > { %4538 = vmatmul.mubr.msk.bf16.gmra.mxu1 %vm790_vm2, %v5539_v33 }
  0x96   : > { %4541 = vmatprep.mubr.msk.bf16.mxu1 %vm790_vm2, %v5552_v54 }
  0x98   : > { %4578 = vmatmul.mubr.msk.bf16.gmra.mxu0 %vm790_vm2, %v5663_v14 }
  0x99   : > { %4621 = vmatprep.mubr.msk.bf16.mxu0 %vm790_vm2, %v6643_v34 }
  0x9d   : > { %4542 = vmatmul.mubr.msk.bf16.gmra.mxu1 %vm790_vm2, %v5571_v26 }
  0x9e   : > { %4585 = vmatprep.mubr.msk.bf16.mxu1 %vm790_vm2, %v5372_v60  ;;  %v4912_v60 = vld [vmem:[%s6552_s1 + $0x88] sm:$0xff]  }
  0xa0   : > { %4622 = vmatmul.mubr.msk.bf16.vlgmr.msra.gmra.mxu0 %vm790_vm2, %v6644_v11 }
  0xa1   : > { %4690 = vmatpush3.bf16.msra.mxu0 %v5463_v55  ;;  %4625 = vmatprep.mubr.msk.bf16.mxu0 %vm790_vm2, %v6645_v10  ;;  %v4911_v55 = vld [vmem:[%s6552_s1 + $0x78] sm:$0xff]  }
  0xa2   : > { %4691 = vmatprep.subr.bf16.mxu0 %v4909_v31 }
  0xa5   : > { %4586 = vmatmul.mubr.msk.bf16.vlgmr.msra.gmra.mxu1 %vm790_vm2, %v5393_v20  ;;  %4692 = vmatpush3.bf16.msra.mxu0 %v4909_v31  ;;  %v1954_v31 = vrot.slane %v1953_v41, 4 }
  0xa6   : > { %4654 = vmatpush3.bf16.msra.mxu1 %v5487_v4  ;;  %4589 = vmatprep.mubr.msk.bf16.mxu1 %vm790_vm2, %v5410_v8  ;;  %v6648_v4 = vld [vmem:[#allocation23_spill] sm:$0xff] }
  0xa7   : > { %4655 = vmatprep.subr.bf16.mxu1 %v4908_v45  ;;  %4761 = vmatprep.subr.bf16.mxu0 %v4912_v60  ;;  %v1959_v25 = vsel %vm5035_vm3, %v1954_v31, %v1958_v3  ;;  %v5884_v31 = vld [vmem:[%s4994_s10 + $0xd0] sm:$0xf] }
  0xa8   : > { %4626 = vmatmul.mubr.msk.bf16.gmra.mxu0 %vm790_vm2, %v6646_v39 }
  0xa9   : > { %4629 = vmatprep.mubr.msk.bf16.mxu0 %vm790_vm2, %v6647_v58 }
  0xaa   : > { %4656 = vmatpush3.bf16.msra.mxu1 %v4908_v45  ;;  %v1964_v45 = vrot.slane %v1963_v37, 4 }
  0xab   : > { %4725 = vmatprep.subr.bf16.mxu1 %v4911_v55 }
  0xac   : > { %v1969_v15 = vsel %vm5035_vm3, %v1964_v45, %v1968_v42 }
  0xad   : > { %4590 = vmatmul.mubr.msk.bf16.gmra.mxu1 %vm790_vm2, %v5494_v5  ;;  %v5766_v48 = vcombine.low %v1959_v25, %v1969_v15 }
  0xae   : > { %4593 = vmatprep.mubr.msk.bf16.mxu1 %vm790_vm2, %v5498_v51 }
  0xb0   : > { %4630 = vmatmul.mubr.msk.bf16.gmra.mxu0 %vm790_vm2, %v6648_v4 }
  0xb1   : > { %4633 = vmatprep.mubr.msk.bf16.mxu0 %vm790_vm2, %v5379_v7 }
  0xb5   : > { %4594 = vmatmul.mubr.msk.bf16.gmra.mxu1 %vm790_vm2, %v5502_v36 }
  0xb6   : > { %4597 = vmatprep.mubr.msk.bf16.mxu1 %vm790_vm2, %v5604_v9 }
  0xb8   : > { %4634 = vmatmul.mubr.msk.bf16.gmra.mxu0 %vm790_vm2, %v6649_v27 }
  0xb9   : > { %4637 = vmatprep.mubr.msk.bf16.mxu0 %vm790_vm2, %v6650_v29 }
  0xbd   : > { %4598 = vmatmul.mubr.msk.bf16.gmra.mxu1 %vm790_vm2, %v5614_v18 }
  0xbe   : > { %4601 = vmatprep.mubr.msk.bf16.mxu1 %vm790_vm2, %v5632_v0 }
  0xc0   : > { %4638 = vmatmul.mubr.msk.bf16.gmra.mxu0 %vm790_vm2, %v6651_v32 }
  0xc1   : > { %4641 = vmatprep.mubr.msk.bf16.mxu0 %vm790_vm2, %v6652_v53 }
  0xc5   : > { %4602 = vmatmul.mubr.msk.bf16.gmra.mxu1 %vm790_vm2, %v5638_v22 }
  0xc6   : > { %4605 = vmatprep.mubr.msk.bf16.mxu1 %vm790_vm2, %v5510_v43 }
  0xc8   : > { %4642 = vmatmul.mubr.msk.bf16.gmra.mxu0 %vm790_vm2, %v6653_v1 }
  0xc9   : > { %4645 = vmatprep.mubr.msk.bf16.mxu0 %vm790_vm2, %v6654_v23 }
  0xcd   : > { %4606 = vmatmul.mubr.msk.bf16.gmra.mxu1 %vm790_vm2, %v5526_v38 }
  0xce   : > { %4609 = vmatprep.mubr.msk.bf16.mxu1 %vm790_vm2, %v5539_v33 }
  0xd0   : > { %4646 = vmatmul.mubr.msk.bf16.gmra.mxu0 %vm790_vm2, %v6655_v57 }
  0xd1   : > { %4649 = vmatprep.mubr.msk.bf16.mxu0 %vm790_vm2, %v5418_v61 }
  0xd5   : > { %4610 = vmatmul.mubr.msk.bf16.gmra.mxu1 %vm790_vm2, %v5552_v54 }
  0xd6   : > { %4613 = vmatprep.mubr.msk.bf16.mxu1 %vm790_vm2, %v5571_v26 }
  0xd8   : > { %4650 = vmatmul.mubr.msk.bf16.gmra.mxu0 %vm790_vm2, %v5766_v48 }
  0xd9   : > { %4693 = vmatprep.mubr.msk.bf16.mxu0 %vm790_vm2, %v5393_v20  ;;  %v4913_v20 = vld [vmem:[%s6552_s1 + $0x70] sm:$0xff]  }
  0xdd   : > { %4614 = vmatmul.mubr.msk.bf16.gmra.mxu1 %vm790_vm2, %v3961_v2 }
  0xde   : > { %4657 = vmatprep.mubr.msk.bf16.mxu1 %vm790_vm2, %v5404_v63 }
  0xe0   : > { %4694 = vmatmul.mubr.msk.bf16.vlgmr.msra.gmra.mxu0 %vm790_vm2, %v5410_v8 }
  0xe1   : > { %4762 = vmatpush3.bf16.msra.mxu0 %v4912_v60  ;;  %4697 = vmatprep.mubr.msk.bf16.mxu0 %vm790_vm2, %v5494_v5 }
  0xe2   : > { %4763 = vmatprep.subr.bf16.mxu0 %v4914_v49 }
  0xe5   : > { %4658 = vmatmul.mubr.msk.bf16.vlgmr.msra.gmra.mxu1 %vm790_vm2, %v5430_v16  ;;  %4764 = vmatpush3.bf16.msra.mxu0 %v4914_v49  ;;  %v5797_v63 = vpop.f32.mrf.mxu0 }
  0xe6   : > { %4726 = vmatpush3.bf16.msra.mxu1 %v4911_v55  ;;  %4661 = vmatprep.mubr.msk.bf16.mxu1 %vm790_vm2, %v5465_v19 }
  0xe7   : > { %4727 = vmatprep.subr.bf16.mxu1 %v4913_v20  ;;  %v5801_v8 = vpop.f32.mrf.mxu0 }
  0xe8   : > { %4698 = vmatmul.mubr.msk.bf16.gmra.mxu0 %vm790_vm2, %v5498_v51 }
  0xe9   : > { %4701 = vmatprep.mubr.msk.bf16.mxu0 %vm790_vm2, %v5502_v36  ;;  %v5811_v51 = vpop.f32.mrf.mxu0 }
  0xea   : > { %4728 = vmatpush3.bf16.msra.mxu1 %v4913_v20  ;;  %v5805_v5 = vpop.f32.mrf.mxu1 }
  0xeb   : > { %v5817_v24 = vpop.f32.mrf.mxu0 }
  0xec   : > { %v5815_v36 = vpop.f32.mrf.mxu1 }
  0xed   : > { %4662 = vmatmul.mubr.msk.bf16.gmra.mxu1 %vm790_vm2, %v5469_v56 }
  0xee   : > { %4665 = vmatprep.mubr.msk.bf16.mxu1 %vm790_vm2, %v5513_v21  ;;  %v5821_v28 = vpop.f32.mrf.mxu1 }
  0xf0   : > { %4702 = vmatmul.mubr.msk.bf16.gmra.mxu0 %vm790_vm2, %v5604_v9 }
  0xf1   : > { %4705 = vmatprep.mubr.msk.bf16.mxu0 %vm790_vm2, %v5614_v18  ;;  %v5831_v18 = vpop.f32.mrf.mxu1 }
  0xf2   : > { %6656 = vst [vmem:[#allocation16_spill] sm:$0xff] %v5831_v18 }
  0xf5   : > { %4666 = vmatmul.mubr.msk.bf16.gmra.mxu1 %vm790_vm2, %v5515_v12 }
  0xf6   : > { %4669 = vmatprep.mubr.msk.bf16.mxu1 %vm790_vm2, %v5584_v52  ;;  %v5827_v9 = vpop.f32.mrf.mxu0 }
  0xf8   : > { %4706 = vmatmul.mubr.msk.bf16.gmra.mxu0 %vm790_vm2, %v5632_v0  ;;  %v5833_v60 = vpop.f32.mrf.mxu0 }
  0xf9   : > { %4709 = vmatprep.mubr.msk.bf16.mxu0 %vm790_vm2, %v5638_v22 }
  0xfa   : > { %v5837_v55 = vpop.f32.mrf.mxu1  ;;  %v5843_v0 = vpop.f32.mrf.mxu0 }
  0xfc   : > { %v5847_v22 = vpop.f32.mrf.mxu1  ;;  %v5849_v3 = vpop.f32.mrf.mxu0 }
  0xfd   : > { %4670 = vmatmul.mubr.msk.bf16.gmra.mxu1 %vm790_vm2, %v5589_v59 }
  0xfe   : > { %4673 = vmatprep.mubr.msk.bf16.mxu1 %vm790_vm2, %v5620_v47  ;;  %v5853_v62 = vpop.f32.mrf.mxu1 }
 0x100   : > { %4710 = vmatmul.mubr.msk.bf16.gmra.mxu0 %vm790_vm2, %v5510_v43 }
 0x101   : > { %4713 = vmatprep.mubr.msk.bf16.mxu0 %vm790_vm2, %v5526_v38  ;;  %v5861_v38 = vpop.f32.mrf.mxu1 }
 0x102   : > { %6657 = vst [vmem:[#allocation19_spill] sm:$0xff] %v5861_v38 }
 0x105   : > { %4674 = vmatmul.mubr.msk.bf16.gmra.mxu1 %vm790_vm2, %v5624_v40 }
 0x106   : > { %4677 = vmatprep.mubr.msk.bf16.mxu1 %vm790_vm2, %v5557_v35 }
 0x108   : > { %4714 = vmatmul.mubr.msk.bf16.gmra.mxu0 %vm790_vm2, %v5539_v33  ;;  %v5859_v43 = vpop.f32.mrf.mxu0 }
 0x109   : > { %4717 = vmatprep.mubr.msk.bf16.mxu0 %vm790_vm2, %v5552_v54  ;;  %v5881_v54 = vld [vmem:[%s4994_s10 + $0xcc] sm:$0xf] }
 0x10a   : > { %v5865_v41 = vpop.f32.mrf.mxu0  ;;  %v4019_v42 = vcombine.low %v5881_v54, %v5884_v31 }
 0x10c   : > { %v5869_v37 = vpop.f32.mrf.mxu1  ;;  %v5875_v33 = vpop.f32.mrf.mxu0 }
 0x10d   : > { %4678 = vmatmul.mubr.msk.bf16.gmra.mxu1 %vm790_vm2, %v5565_v13 }
 0x10e   : > { %4681 = vmatprep.mubr.msk.bf16.mxu1 %vm790_vm2, %v5580_v17  ;;  %v5877_v44 = vpop.f32.mrf.mxu1  ;;  %v5886_v45 = vpop.f32.mrf.mxu0 }
 0x10f   : > { %6658 = vst [vmem:[#allocation17_spill] sm:$0xff] %v5877_v44 }
 0x110   : > { %4718 = vmatmul.mubr.msk.bf16.gmra.mxu0 %vm790_vm2, %v5571_v26  ;;  %v5892_v25 = vpop.f32.mrf.mxu1 }
 0x111   : > { %4721 = vmatprep.mubr.msk.bf16.mxu0 %vm790_vm2, %v3961_v2  ;;  %6659 = vst [vmem:[#allocation20_spill] sm:$0xff] %v5892_v25 }
 0x112   : > { %v5899_v15 = vpop.f32.mrf.mxu1 }
 0x113   : > { %6660 = vst [vmem:[#allocation8_spill] sm:$0xff] %v5899_v15 }
 0x115   : > { %4682 = vmatmul.mubr.msk.bf16.gmra.mxu1 %vm790_vm2, %v5598_v6 }
 0x116   : > { %4685 = vmatprep.mubr.msk.bf16.mxu1 %vm790_vm2, %v5663_v14 }
 0x118   : > { %v5896_v26 = vpop.f32.mrf.mxu0  ;;  %4722 = vmatmul.mubr.msk.bf16.gmra.mxu0 %vm790_vm2, %v4019_v42 }
 0x119   : > { %4765 = vmatprep.mubr.msk.bf16.mxu0 %vm790_vm2, %v5430_v16 }
 0x11a   : > { %v5903_v2 = vpop.f32.mrf.mxu0 }
 0x11c   : > { %v5905_v49 = vpop.f32.mrf.mxu0 }
 0x11d   : > { %v5907_v20 = vpop.f32.mrf.mxu1  ;;  %4686 = vmatmul.mubr.msk.bf16.gmra.mxu1 %vm790_vm2, %v5686_v50 }
 0x11e   : > { %6661 = vst [vmem:[#allocation3_spill] sm:$0xff] %v5907_v20  ;;  %v5911_v38 = vpop.f32.mrf.mxu0  ;;  %4729 = vmatprep.mubr.msk.bf16.mxu1 %vm790_vm2, %v6644_v11 }
 0x11f   : > { %v5915_v42 = vpop.f32.mrf.mxu1 }
 0x120   : > { %6662 = vst [vmem:[#allocation4_spill] sm:$0xff] %v5915_v42  ;;  %v4551_v18 = vpop.f32.mrf.mxu0  ;;  %4766 = vmatmul.mubr.msk.bf16.vlgmr.msra.gmra.mxu0 %vm790_vm2, %v5465_v19 }
 0x121   : > { %v5919_v16 = vpop.f32.mrf.mxu1  ;;  %4769 = vmatprep.mubr.msk.bf16.mxu0 %vm790_vm2, %v5469_v56 }
 0x122   : > { %6663 = vst [vmem:[#allocation6_spill] sm:$0xff] %v5919_v16  ;;  %v1574_v34 = vpop.f32.mrf.mxu0 }
 0x123   : > { %v5923_v20 = vpop.f32.mrf.mxu1 }
 0x124   : > { %6664 = vst [vmem:[#allocation9_spill] sm:$0xff] %v5923_v20  ;;  %v4552_v15 = vpop.f32.mrf.mxu0 }
 0x125   : > { %v4515_v25 = vpop.f32.mrf.mxu1  ;;  %4730 = vmatmul.mubr.msk.bf16.vlgmr.msra.gmra.mxu1 %vm790_vm2, %v6645_v10 }
 0x126   : > { %v1183_v11 = vadd.f32 %v4515_v25, %v5797_v63  ;;  %v1577_v42 = vpop.f32.mrf.mxu0  ;;  %4733 = vmatprep.mubr.msk.bf16.mxu1 %vm790_vm2, %v6646_v39 }
 0x127   : > { %v1174_v19 = vpop.f32.mrf.mxu1 }
 0x128   : > { %v5930_v44 = vadd.f32 %v4551_v18, %v1183_v11  ;;  %v1175_v16 = vadd.f32 %v1174_v19, %v5801_v8  ;;  %v4555_v56 = vpop.f32.mrf.mxu0  ;;  %4770 = vmatmul.mubr.msk.bf16.gmra.mxu0 %vm790_vm2, %v5513_v21 }
 0x129   : > { %v4516_v20 = vpop.f32.mrf.mxu1  ;;  %4773 = vmatprep.mubr.msk.bf16.mxu0 %vm790_vm2, %v5515_v12 }
 0x12a   : > { %v5937_v10 = vadd.f32 %v1574_v34, %v1175_v16  ;;  %v1186_v63 = vadd.f32 %v4516_v20, %v5811_v51  ;;  %v1590_v25 = vpop.f32.mrf.mxu0 }
 0x12b   : > { %v1177_v30 = vpop.f32.mrf.mxu1 }
 0x12c   : > { %v5940_v39 = vadd.f32 %v4552_v15, %v1186_v63  ;;  %v1178_v11 = vadd.f32 %v1177_v30, %v5817_v24  ;;  %v4556_v18 = vpop.f32.mrf.mxu0 }
 0x12d   : > { %v4519_v8 = vpop.f32.mrf.mxu1  ;;  %4734 = vmatmul.mubr.msk.bf16.gmra.mxu1 %vm790_vm2, %v6647_v58 }
 0x12e   : > { %v5945_v21 = vadd.f32 %v1577_v42, %v1178_v11  ;;  %v1199_v19 = vadd.f32 %v4519_v8, %v5827_v9  ;;  %v1593_v12 = vpop.f32.mrf.mxu0  ;;  %4737 = vmatprep.mubr.msk.bf16.mxu1 %vm790_vm2, %v6648_v4 }
 0x12f   : > { %v1190_v34 = vpop.f32.mrf.mxu1 }
 0x130   : > { %v5950_v51 = vadd.f32 %v4555_v56, %v1199_v19  ;;  %v1191_v15 = vadd.f32 %v1190_v34, %v5833_v60  ;;  %v4559_v20 = vpop.f32.mrf.mxu0  ;;  %4774 = vmatmul.mubr.msk.bf16.gmra.mxu0 %vm790_vm2, %v5584_v52 }
 0x131   : > { %v4520_v30 = vpop.f32.mrf.mxu1  ;;  %4777 = vmatprep.mubr.msk.bf16.mxu0 %vm790_vm2, %v5589_v59 }
 0x132   : > { %v5957_v24 = vadd.f32 %v1590_v25, %v1191_v15  ;;  %v1202_v9 = vadd.f32 %v4520_v30, %v5843_v0  ;;  %v1606_v42 = vpop.f32.mrf.mxu0 }
 0x133   : > { %v1193_v16 = vpop.f32.mrf.mxu1 }
 0x134   : > { %v5960_v63 = vadd.f32 %v4556_v18, %v1202_v9  ;;  %v1194_v56 = vadd.f32 %v1193_v16, %v5849_v3  ;;  %v4560_v11 = vpop.f32.mrf.mxu0  ;;  %v4916_v3 = vld [vmem:[%s6555_s4 + $0x8] sm:$0xff]  }
 0x135   : > { %v4523_v60 = vpop.f32.mrf.mxu1  ;;  %4738 = vmatmul.mubr.msk.bf16.gmra.mxu1 %vm790_vm2, %v5379_v7  ;;  %4797 = vmatprep.subr.bf16.mxu1 %v4916_v3 }
 0x136   : > { %v5965_v52 = vadd.f32 %v1593_v12, %v1194_v56  ;;  %v1215_v8 = vadd.f32 %v4523_v60, %v5859_v43  ;;  %v1609_v59 = vpop.f32.mrf.mxu0  ;;  %4741 = vmatprep.mubr.msk.bf16.mxu1 %vm790_vm2, %v6649_v27  ;;  %v4917_v43 = vld [vmem:[%s6554_s3] sm:$0xff]   ;;  %4798 = vmatpush3.bf16.msra.mxu1 %v4916_v3 }
 0x137   : > { %v1206_v0 = vpop.f32.mrf.mxu1  ;;  %4833 = vmatprep.subr.bf16.mxu0 %v4917_v43 }
 0x138   : > { %v5970_v25 = vadd.f32 %v4559_v20, %v1215_v8  ;;  %v1207_v18 = vadd.f32 %v1206_v0, %v5865_v41  ;;  %v4563_v19 = vpop.f32.mrf.mxu0  ;;  %4778 = vmatmul.mubr.msk.bf16.gmra.mxu0 %vm790_vm2, %v5620_v47 }
 0x139   : > { %v4524_v12 = vpop.f32.mrf.mxu1  ;;  %4781 = vmatprep.mubr.msk.bf16.mxu0 %vm790_vm2, %v5624_v40  ;;  %4834 = vmatpush3.bf16.msra.mxu0 %v4917_v43 }
 0x13a   : > { %v5983_v34 = vadd.f32 %v1606_v42, %v1207_v18  ;;  %v1218_v41 = vadd.f32 %v4524_v12, %v5875_v33  ;;  %v1622_v15 = vpop.f32.mrf.mxu0  ;;  %v2617_v12 = vshll.u32 %v5881_v54, 16 }
 0x13b   : > { %v1209_v47 = vpop.f32.mrf.mxu1 }
 0x13c   : > { %v5986_v20 = vadd.f32 %v4560_v11, %v1218_v41  ;;  %v1210_v30 = vadd.f32 %v1209_v47, %v5886_v45  ;;  %v4564_v9 = vpop.f32.mrf.mxu0  ;;  %v2627_v41 = vshrl.u32 %v5884_v31, 16 }
 0x13d   : > { %v4527_v16 = vpop.f32.mrf.mxu1  ;;  %4742 = vmatmul.mubr.msk.bf16.gmra.mxu1 %vm790_vm2, %v6650_v29 }
 0x13e   : > { %v5991_v40 = vadd.f32 %v1609_v59, %v1210_v30  ;;  %v1231_v42 = vadd.f32 %v4527_v16, %v5896_v26  ;;  %v1625_v33 = vpop.f32.mrf.mxu0  ;;  %4745 = vmatprep.mubr.msk.bf16.mxu1 %vm790_vm2, %v6651_v32 }
 0x13f   : > { %v1222_v56 = vpop.f32.mrf.mxu1 }
 0x140   : > { %v5996_v60 = vadd.f32 %v4563_v19, %v1231_v42  ;;  %v1223_v11 = vadd.f32 %v1222_v56, %v5903_v2  ;;  %v4567_v8 = vpop.f32.mrf.mxu0  ;;  %4782 = vmatmul.mubr.msk.bf16.gmra.mxu0 %vm790_vm2, %v5557_v35  ;;  %v2614_v2 = vshrl.u32 %v5881_v54, 16  ;;  %v2851_v56 = vrot.slane %v5884_v31, 5 }
 0x141   : > { %v4528_v45 = vpop.f32.mrf.mxu1  ;;  %4785 = vmatprep.mubr.msk.bf16.mxu0 %vm790_vm2, %v5565_v13  ;;  %v2623_v13 = vshll.u32 %v5884_v31, 16 }
 0x142   : > { %v6003_v59 = vadd.f32 %v1622_v15, %v1223_v11  ;;  %v1234_v26 = vadd.f32 %v4528_v45, %v5905_v49  ;;  %v1638_v0 = vpop.f32.mrf.mxu0  ;;  %v2616_v42 = vrot.slane %v2614_v2, 4  ;;  %v2629_v45 = vrot.slane %v2627_v41, 4 }
 0x143   : > { %v1225_v18 = vpop.f32.mrf.mxu1  ;;  %v2625_v11 = vrot.slane %v2623_v13, 5  ;;  %v4057_v2 = vrot.slane %v5881_v54, 9 }
 0x144   : > { %v6006_v3 = vadd.f32 %v4564_v9, %v1234_v26  ;;  %v1226_v19 = vadd.f32 %v1225_v18, %v5911_v38  ;;  %v4568_v43 = vpop.f32.mrf.mxu0 }
 0x145   : > { %v4531_v35 = vpop.f32.mrf.mxu1  ;;  %4746 = vmatmul.mubr.msk.bf16.gmra.mxu1 %vm790_vm2, %v6652_v53 }
 0x146   : > { %v6015_v49 = vadd.f32 %v1625_v33, %v1226_v19  ;;  %v1247_v15 = vadd.f32 %v4531_v35, %v5805_v5  ;;  %v6018_v47 = vpop.f32.mrf.mxu0  ;;  %4749 = vmatprep.mubr.msk.bf16.mxu1 %vm790_vm2, %v6653_v1  ;;  %v2619_v33 = vrot.slane %v2617_v12, 5  ;;  %v306_v19 = vld [vmem:[%s4994_s10 + $0xd4] sm:$0x1]  ;;  %v2853_v12 = vrot.slane %v2851_v56, 4 }
 0x147   : > { %v1238_v38 = vpop.f32.mrf.mxu1  ;;  %v2854_v13 = vrot.slane %v306_v19, 5 }
 0x148   : > { %v6022_v30 = vadd.f32 %v4567_v8, %v1247_v15  ;;  %v1239_v9 = vadd.f32 %v1238_v38, %v5815_v36  ;;  %v4571_v16 = vpop.f32.mrf.mxu0  ;;  %4786 = vmatmul.mubr.msk.bf16.gmra.mxu0 %vm790_vm2, %v5580_v17 }
 0x149   : > { %v4532_v5 = vpop.f32.mrf.mxu1  ;;  %4789 = vmatprep.mubr.msk.bf16.mxu0 %vm790_vm2, %v5598_v6  ;;  %v2620_v6 = vor.u32 %v2619_v33, %v2616_v42  ;;  %v2852_v33 = vsel %vm5360_vm6, %v4057_v2, %v2851_v56 }
 0x14a   : > { %v6030_v26 = vadd.f32 %v1638_v0, %v1239_v9  ;;  %v1250_v8 = vadd.f32 %v4532_v5, %v5821_v28  ;;  %v1654_v18 = vpop.f32.mrf.mxu0  ;;  %v2630_v28 = vor.u32 %v2629_v45, %v2625_v11  ;;  %v2855_v5 = vsel %vm5360_vm6, %v2853_v12, %v2854_v13  ;;  %v6666_v13 = vld [vmem:[#allocation17_spill] sm:$0xff] }
 0x14b   : > { %v6033_v36 = vpop.f32.mrf.mxu1 }
 0x14c   : > { %v6036_v35 = vadd.f32 %v4568_v43, %v1250_v8  ;;  %v4572_v17 = vpop.f32.mrf.mxu0  ;;  %v2633_v43 = vshll.u32 %v306_v19, 16  ;;  %v2631_v8 = vrot.slane %v2630_v28, 4 }
 0x14d   : > { %v4535_v31 = vpop.f32.mrf.mxu1  ;;  %4750 = vmatmul.mubr.msk.bf16.gmra.mxu1 %vm790_vm2, %v6654_v23 }
 0x14e   : > { %v1263_v0 = vadd.f32 %v4535_v31, %v5837_v55  ;;  %v6042_v41 = vpop.f32.mrf.mxu0  ;;  %4753 = vmatprep.mubr.msk.bf16.mxu1 %vm790_vm2, %v6655_v57  ;;  %v2621_v55 = vrot.slane %v2620_v6, 4  ;;  %v2635_v19 = vrot.slane %v2633_v43, 5 }
 0x14f   : > { %v1254_v15 = vpop.f32.mrf.mxu1 }
 0x150   : > { %v6046_v38 = vadd.f32 %v4571_v16, %v1263_v0  ;;  %v1255_v54 = vadd.f32 %v1254_v15, %v5847_v22  ;;  %v4575_v9 = vpop.f32.mrf.mxu0  ;;  %4790 = vmatmul.mubr.msk.bf16.gmra.mxu0 %vm790_vm2, %v5663_v14 }
 0x151   : > { %v4536_v42 = vpop.f32.mrf.mxu1  ;;  %4793 = vmatprep.mubr.msk.bf16.mxu0 %vm790_vm2, %v5686_v50  ;;  %v4058_v50 = vcombine.low %v2852_v33, %v2855_v5 }
 0x152   : > { %v6057_v45 = vadd.f32 %v1654_v18, %v1255_v54  ;;  %v1266_v16 = vadd.f32 %v4536_v42, %v5853_v62  ;;  %v1670_v22 = vpop.f32.mrf.mxu0  ;;  %v2626_v18 = vsel %vm5035_vm3, %v2621_v55, %v2625_v11  ;;  %v6667_v11 = vld [vmem:[#allocation20_spill] sm:$0xff] }
 0x153   : > { %v6060_v31 = vpop.f32.mrf.mxu1 }
 0x154   : > { %v6062_v14 = vadd.f32 %v4572_v17, %v1266_v16  ;;  %v4576_v0 = vpop.f32.mrf.mxu0  ;;  %v2636_v17 = vsel %vm5035_vm3, %v2631_v8, %v2635_v19  ;;  %v6668_v16 = vld [vmem:[#allocation8_spill] sm:$0xff] }
 0x155   : > { %v4539_v6 = vpop.f32.mrf.mxu1  ;;  %4754 = vmatmul.mubr.msk.bf16.gmra.mxu1 %vm790_vm2, %v5418_v61  ;;  %v4038_v54 = vcombine.low %v2626_v18, %v2636_v17 }
 0x156   : > { %v1279_v46 = vadd.f32 %v4539_v6, %v5869_v37  ;;  %v6067_v56 = vpop.f32.mrf.mxu0  ;;  %4757 = vmatprep.mubr.msk.bf16.mxu1 %vm790_vm2, %v5766_v48  ;;  %v4918_v37 = vld [vmem:[%s6555_s4] sm:$0xff]   ;;  %v6669_v6 = vld [vmem:[#allocation3_spill] sm:$0xff] }
 0x157   : > { %v1270_v2 = vpop.f32.mrf.mxu1  ;;  %4799 = vmatprep.subr.bf16.mxu1 %v4918_v37 }
 0x158   : > { %v6075_v12 = vadd.f32 %v4575_v9, %v1279_v46  ;;  %v1271_v28 = vadd.f32 %v1270_v2, %v6666_v13  ;;  %v4579_v43 = vpop.f32.mrf.mxu0  ;;  %4794 = vmatmul.mubr.msk.bf16.gmra.mxu0 %vm790_vm2, %v4058_v50  ;;  %4800 = vmatpush3.bf16.msra.mxu1 %v4918_v37  ;;  %v6672_v2 = vld [vmem:[#allocation4_spill] sm:$0xff] }
 0x159   : > { %v4540_v15 = vpop.f32.mrf.mxu1 }
 0x15a   : > { %v6082_v42 = vadd.f32 %v1670_v22, %v1271_v28  ;;  %v1282_v55 = vadd.f32 %v4540_v15, %v6667_v11  ;;  %v1686_v33 = vpop.f32.mrf.mxu0  ;;  %v6671_v22 = vld [vmem:[#allocation7_spill] sm:$0xff]  ;;  %v6673_v15 = vld [vmem:[#allocation6_spill] sm:$0xff] }
 0x15b   : > { %v1273_v5 = vpop.f32.mrf.mxu1 }
 0x15c   : > { %v6085_v9 = vadd.f32 %v4576_v0, %v1282_v55  ;;  %v6088_v8 = vadd.f32 %v1273_v5, %v6668_v16  ;;  %v4580_v19 = vpop.f32.mrf.mxu0  ;;  %v6674_v16 = vld [vmem:[#allocation9_spill] sm:$0xff] }
 0x15d   : > { %v4543_v50 = vpop.f32.mrf.mxu1  ;;  %4758 = vmatmul.mubr.msk.bf16.gmra.mxu1 %vm790_vm2, %v4038_v54 }
 0x15e   : > { %v1295_v46 = vadd.f32 %v4543_v50, %v6669_v6  ;;  %v6092_v62 = vpop.f32.mrf.mxu0  ;;  %4801 = vmatprep.mubr.msk.bf16.mxu1 %vm790_vm2, %v6671_v22 }
 0x15f   : > { %6670 = vst [vmem:[#allocation21_spill] sm:$0xff] %v6092_v62  ;;  %v1286_v18 = vpop.f32.mrf.mxu1  ;;  %v6675_v62 = vld [vmem:[#allocation11_spill] sm:$0xff] }
 0x160   : > { %v6096_v17 = vadd.f32 %v4579_v43, %v1295_v46  ;;  %v1287_v0 = vadd.f32 %v1286_v18, %v6672_v2  ;;  %v4623_v13 = vpop.f32.mrf.mxu0 }
 0x161   : > { %v4544_v28 = vpop.f32.mrf.mxu1 }
 0x162   : > { %v6099_v37 = vadd.f32 %v1686_v33, %v1287_v0  ;;  %v1298_v11 = vadd.f32 %v4544_v28, %v6673_v15  ;;  %v2022_v55 = vpop.f32.mrf.mxu0  ;;  %v6677_v33 = vld [vmem:[#allocation13_spill] sm:$0xff] }
 0x163   : > { %v1289_v54 = vpop.f32.mrf.mxu1 }
 0x164   : > { %v6102_v5 = vadd.f32 %v4580_v19, %v1298_v11  ;;  %v6105_v50 = vadd.f32 %v1289_v54, %v6674_v16  ;;  %v4624_v6 = vpop.f32.mrf.mxu0 }
 0x165   : > { %v4587_v22 = vpop.f32.mrf.mxu1  ;;  %4802 = vmatmul.mubr.msk.bf16.vlgmr.msra.gmra.mxu1 %vm790_vm2, %v6675_v62 }
 0x166   : > { %v1916_v43 = vadd.f32 %v4587_v22, %v5930_v44  ;;  %v6110_v46 = vpop.f32.mrf.mxu0  ;;  %4805 = vmatprep.mubr.msk.bf16.mxu1 %vm790_vm2, %v6677_v33 }
 0x167   : > { %6676 = vst [vmem:[#allocation23_spill] sm:$0xff] %v6110_v46  ;;  %v1787_v18 = vpop.f32.mrf.mxu1  ;;  %v6678_v46 = vld [vmem:[#allocation15_spill] sm:$0xff] }
 0x168   : > { %v6114_v2 = vadd.f32 %v4623_v13, %v1916_v43  ;;  %v1914_v19 = vadd.f32 %v1787_v18, %v5937_v10  ;;  %v4627_v0 = vpop.f32.mrf.mxu0 }
 0x169   : > { %v4588_v28 = vpop.f32.mrf.mxu1 }
 0x16a   : > { %v6117_v15 = vadd.f32 %v2022_v55, %v1914_v19  ;;  %v1917_v11 = vadd.f32 %v4588_v28, %v5940_v39  ;;  %v2038_v54 = vpop.f32.mrf.mxu0 }
 0x16b   : > { %v1790_v62 = vpop.f32.mrf.mxu1 }
 0x16c   : > { %v6120_v16 = vadd.f32 %v4624_v6, %v1917_v11  ;;  %v6123_v44 = vadd.f32 %v1790_v62, %v5945_v21  ;;  %v4628_v22 = vpop.f32.mrf.mxu0 }
 0x16d   : > { %v4591_v33 = vpop.f32.mrf.mxu1  ;;  %4806 = vmatmul.mubr.msk.bf16.gmra.mxu1 %vm790_vm2, %v6678_v46 }
 0x16e   : > { %v1920_v10 = vadd.f32 %v4591_v33, %v5950_v51  ;;  %v6128_v13 = vpop.f32.mrf.mxu0  ;;  %4809 = vmatprep.mubr.msk.bf16.mxu1 %vm790_vm2, %v6647_v58 }
 0x16f   : > { %v1803_v39 = vpop.f32.mrf.mxu1 }
 0x170   : > { %v6132_v55 = vadd.f32 %v4627_v0, %v1920_v10  ;;  %v1918_v6 = vadd.f32 %v1803_v39, %v5957_v24  ;;  %v4631_v43 = vpop.f32.mrf.mxu0 }
 0x171   : > { %v4592_v21 = vpop.f32.mrf.mxu1 }
 0x172   : > { %v6135_v18 = vadd.f32 %v2038_v54, %v1918_v6  ;;  %v1921_v19 = vadd.f32 %v4592_v21, %v5960_v63  ;;  %v2054_v28 = vpop.f32.mrf.mxu0 }
 0x173   : > { %v1806_v46 = vpop.f32.mrf.mxu1 }
 0x174   : > { %v6138_v11 = vadd.f32 %v4628_v22, %v1921_v19  ;;  %v6141_v51 = vadd.f32 %v1806_v46, %v5965_v52  ;;  %v4632_v62 = vpop.f32.mrf.mxu0 }
 0x175   : > { %v4595_v58 = vpop.f32.mrf.mxu1  ;;  %4810 = vmatmul.mubr.msk.bf16.gmra.mxu1 %vm790_vm2, %v6648_v4 }
 0x176   : > { %v1924_v24 = vadd.f32 %v4595_v58, %v5970_v25  ;;  %v6146_v0 = vpop.f32.mrf.mxu0  ;;  %4813 = vmatprep.mubr.msk.bf16.mxu1 %vm790_vm2, %v5379_v7 }
 0x177   : > { %v1819_v63 = vpop.f32.mrf.mxu1 }
 0x178   : > { %v6150_v54 = vadd.f32 %v4631_v43, %v1924_v24  ;;  %v1922_v22 = vadd.f32 %v1819_v63, %v5983_v34  ;;  %v4635_v33 = vpop.f32.mrf.mxu0 }
 0x179   : > { %v4596_v52 = vpop.f32.mrf.mxu1 }
 0x17a   : > { %v6153_v10 = vadd.f32 %v2054_v28, %v1922_v22  ;;  %v1925_v39 = vadd.f32 %v4596_v52, %v5986_v20  ;;  %v2070_v6 = vpop.f32.mrf.mxu0 }
 0x17b   : > { %v1822_v4 = vpop.f32.mrf.mxu1 }
 0x17c   : > { %v6156_v21 = vadd.f32 %v4632_v62, %v1925_v39  ;;  %v6159_v25 = vadd.f32 %v1822_v4, %v5991_v40  ;;  %v4636_v19 = vpop.f32.mrf.mxu0 }
 0x17d   : > { %v4599_v7 = vpop.f32.mrf.mxu1  ;;  %4814 = vmatmul.mubr.msk.bf16.gmra.mxu1 %vm790_vm2, %v6649_v27 }
 0x17e   : > { %v1928_v34 = vadd.f32 %v4599_v7, %v5996_v60  ;;  %v6164_v43 = vpop.f32.mrf.mxu0  ;;  %4817 = vmatprep.mubr.msk.bf16.mxu1 %vm790_vm2, %v6650_v29 }
 0x17f   : > { %v1835_v20 = vpop.f32.mrf.mxu1 }
 0x180   : > { %v6168_v28 = vadd.f32 %v4635_v33, %v1928_v34  ;;  %v1926_v46 = vadd.f32 %v1835_v20, %v6003_v59  ;;  %v4639_v62 = vpop.f32.mrf.mxu0  ;;  %v6679_v33 = vld [vmem:[#allocation16_spill] sm:$0xff] }
 0x181   : > { %v4600_v40 = vpop.f32.mrf.mxu1  ;;  %v1242_v59 = vadd.f32 %v6033_v36, %v6679_v33 }
 0x182   : > { %v6171_v58 = vadd.f32 %v2070_v6, %v1926_v46  ;;  %v1929_v24 = vadd.f32 %v4600_v40, %v6006_v3  ;;  %v2086_v63 = vpop.f32.mrf.mxu0 }
 0x183   : > { %v1838_v27 = vpop.f32.mrf.mxu1  ;;  %v1718_v34 = vadd.f32 %v6018_v47, %v1242_v59 }
 0x184   : > { %v6174_v22 = vadd.f32 %v4636_v19, %v1929_v24  ;;  %v6177_v60 = vadd.f32 %v1838_v27, %v6015_v49  ;;  %v4640_v52 = vpop.f32.mrf.mxu0 }
 0x185   : > { %v4603_v29 = vpop.f32.mrf.mxu1  ;;  %4818 = vmatmul.mubr.msk.bf16.gmra.mxu1 %vm790_vm2, %v6651_v32 }
 0x186   : > { %v1932_v39 = vadd.f32 %v4603_v29, %v6022_v30  ;;  %v2089_v6 = vpop.f32.mrf.mxu0  ;;  %4821 = vmatprep.mubr.msk.bf16.mxu1 %vm790_vm2, %v6652_v53 }
 0x187   : > { %v1851_v3 = vpop.f32.mrf.mxu1 }
 0x188   : > { %v6186_v4 = vadd.f32 %v4639_v62, %v1932_v39  ;;  %v1930_v49 = vadd.f32 %v1851_v3, %v6030_v26  ;;  %v4643_v19 = vpop.f32.mrf.mxu0  ;;  %v6680_v62 = vld [vmem:[#allocation19_spill] sm:$0xff] }
 0x189   : > { %v4604_v7 = vpop.f32.mrf.mxu1  ;;  %v1258_v26 = vadd.f32 %v6060_v31, %v6680_v62 }
 0x18a   : > { %v6190_v20 = vadd.f32 %v2086_v63, %v1930_v49  ;;  %v1933_v32 = vadd.f32 %v4604_v7, %v6036_v35  ;;  %v2102_v36 = vpop.f32.mrf.mxu0 }
 0x18b   : > { %v1854_v46 = vpop.f32.mrf.mxu1 }
 0x18c   : > { %v6193_v30 = vadd.f32 %v4640_v52, %v1933_v32  ;;  %v1931_v40 = vadd.f32 %v1854_v46, %v1718_v34  ;;  %v4644_v24 = vpop.f32.mrf.mxu0 }
 0x18d   : > { %v4607_v53 = vpop.f32.mrf.mxu1  ;;  %4822 = vmatmul.mubr.msk.bf16.gmra.mxu1 %vm790_vm2, %v6653_v1  ;;  %v1722_v1 = vadd.f32 %v6042_v41, %v1258_v26 }
 0x18e   : > { %v6199_v27 = vadd.f32 %v2089_v6, %v1931_v40  ;;  %v1936_v47 = vadd.f32 %v4607_v53, %v6046_v38  ;;  %v2105_v63 = vpop.f32.mrf.mxu0  ;;  %4825 = vmatprep.mubr.msk.bf16.mxu1 %vm790_vm2, %v6654_v23  ;;  %v1726_v40 = vadd.f32 %v6067_v56, %v6088_v8 }
 0x18f   : > { %v1867_v35 = vpop.f32.mrf.mxu1 }
 0x190   : > { %v6204_v52 = vadd.f32 %v4643_v19, %v1936_v47  ;;  %v1934_v29 = vadd.f32 %v1867_v35, %v6057_v45  ;;  %v4647_v33 = vpop.f32.mrf.mxu0 }
 0x191   : > { %v4608_v59 = vpop.f32.mrf.mxu1 }
 0x192   : > { %v6208_v39 = vadd.f32 %v2102_v36, %v1934_v29  ;;  %v1937_v31 = vadd.f32 %v4608_v59, %v6062_v14  ;;  %v2118_v6 = vpop.f32.mrf.mxu0  ;;  %v6682_v59 = vld [vmem:[#allocation21_spill] sm:$0xff] }
 0x193   : > { %v1870_v3 = vpop.f32.mrf.mxu1 }
 0x194   : > { %v6211_v38 = vadd.f32 %v4644_v24, %v1937_v31  ;;  %v1935_v49 = vadd.f32 %v1870_v3, %v1722_v1  ;;  %v4648_v7 = vpop.f32.mrf.mxu0  ;;  %v1730_v1 = vadd.f32 %v6682_v59, %v6105_v50 }
 0x195   : > { %v4611_v23 = vpop.f32.mrf.mxu1  ;;  %4826 = vmatmul.mubr.msk.bf16.gmra.mxu1 %vm790_vm2, %v6655_v57 }
 0x196   : > { %v6215_v19 = vadd.f32 %v2105_v63, %v1935_v49  ;;  %v1940_v45 = vadd.f32 %v4611_v23, %v6075_v12  ;;  %v2121_v34 = vpop.f32.mrf.mxu0  ;;  %4829 = vmatprep.mubr.msk.bf16.mxu1 %vm790_vm2, %v5418_v61 }
 0x197   : > { %v1883_v41 = vpop.f32.mrf.mxu1 }
 0x198   : > { %v6220_v14 = vadd.f32 %v4647_v33, %v1940_v45  ;;  %v1938_v32 = vadd.f32 %v1883_v41, %v6082_v42  ;;  %v4651_v36 = vpop.f32.mrf.mxu0 }
 0x199   : > { %v4612_v46 = vpop.f32.mrf.mxu1 }
 0x19a   : > { %v6225_v24 = vadd.f32 %v2118_v6, %v1938_v32  ;;  %v1941_v57 = vadd.f32 %v4612_v46, %v6085_v9  ;;  %v2134_v53 = vpop.f32.mrf.mxu0 }
 0x19b   : > { %v1886_v12 = vpop.f32.mrf.mxu1 }
 0x19c   : > { %v6228_v62 = vadd.f32 %v4648_v7, %v1941_v57  ;;  %v1939_v26 = vadd.f32 %v1886_v12, %v1726_v40  ;;  %v4652_v61 = vpop.f32.mrf.mxu0 }
 0x19d   : > { %v4615_v47 = vpop.f32.mrf.mxu1  ;;  %4830 = vmatmul.mubr.msk.bf16.gmra.mxu1 %vm790_vm2, %v5766_v48 }
 0x19e   : > { %v6232_v42 = vadd.f32 %v2121_v34, %v1939_v26  ;;  %v1944_v63 = vadd.f32 %v4615_v47, %v6096_v17  ;;  %v2137_v35 = vpop.f32.mrf.mxu0 }
 0x19f   : > { %v1899_v56 = vpop.f32.mrf.mxu1 }
 0x1a0   : > { %6681 = vst [vmem:[#allocation5_spill] sm:$0xff] %v6232_v42  ;;  %v6235_v8 = vadd.f32 %v4651_v36, %v1944_v63  ;;  %v1942_v9 = vadd.f32 %v1899_v56, %v6099_v37  ;;  %v4695_v29 = vpop.f32.mrf.mxu0 }
 0x1a1   : > { %v4616_v33 = vpop.f32.mrf.mxu1 }
 0x1a2   : > { %v6240_v31 = vadd.f32 %v2134_v53, %v1942_v9  ;;  %v1945_v6 = vadd.f32 %v4616_v33, %v6102_v5  ;;  %v2454_v48 = vpop.f32.mrf.mxu0 }
 0x1a3   : > { %v1902_v3 = vpop.f32.mrf.mxu1 }
 0x1a4   : > { %v6243_v49 = vadd.f32 %v4652_v61, %v1945_v6  ;;  %v1943_v17 = vadd.f32 %v1902_v3, %v1730_v1  ;;  %v6245_v7 = vpop.f32.mrf.mxu0 }
 0x1a5   : > { %v4659_v23 = vpop.f32.mrf.mxu1 }
 0x1a6   : > { %v6247_v45 = vadd.f32 %v2137_v35, %v1943_v17  ;;  %v2370_v37 = vadd.f32 %v4659_v23, %v6114_v2  ;;  %v6250_v34 = vpop.f32.mrf.mxu0 }
 0x1a7   : > { %v2241_v41 = vpop.f32.mrf.mxu1 }
 0x1a8   : > { %6683 = vst [vmem:[#allocation10_spill] sm:$0xff] %v6247_v45  ;;  %v6252_v50 = vadd.f32 %v4695_v29, %v2370_v37  ;;  %v2368_v32 = vadd.f32 %v2241_v41, %v6117_v15  ;;  %v4699_v5 = vpop.f32.mrf.mxu0 }
 0x1a9   : > { %v6255_v36 = vpop.f32.mrf.mxu1 }
 0x1aa   : > { %v6257_v46 = vadd.f32 %v2454_v48, %v2368_v32  ;;  %v2470_v40 = vpop.f32.mrf.mxu0 }
 0x1ab   : > { %v6259_v57 = vpop.f32.mrf.mxu1 }
 0x1ac   : > { %v6261_v53 = vpop.f32.mrf.mxu0 }
 0x1ad   : > { %v4663_v12 = vpop.f32.mrf.mxu1 }
 0x1ae   : > { %v2374_v2 = vadd.f32 %v4663_v12, %v6132_v55  ;;  %v6264_v26 = vpop.f32.mrf.mxu0 }
 0x1af   : > { %v2257_v61 = vpop.f32.mrf.mxu1 }
 0x1b0   : > { %v6266_v47 = vadd.f32 %v4699_v5, %v2374_v2  ;;  %v2372_v15 = vadd.f32 %v2257_v61, %v6135_v18  ;;  %v4703_v63 = vpop.f32.mrf.mxu0 }
 0x1b1   : > { %v6269_v35 = vpop.f32.mrf.mxu1 }
 0x1b2   : > { %v6271_v56 = vadd.f32 %v2470_v40, %v2372_v15  ;;  %v2486_v9 = vpop.f32.mrf.mxu0 }
 0x1b3   : > { %v6273_v29 = vpop.f32.mrf.mxu1 }
 0x1b4   : > { %v4704_v33 = vpop.f32.mrf.mxu0 }
 0x1b5   : > { %v4667_v59 = vpop.f32.mrf.mxu1 }
 0x1b6   : > { %v2378_v1 = vadd.f32 %v4667_v59, %v6150_v54  ;;  %v6276_v55 = vpop.f32.mrf.mxu0 }
 0x1b7   : > { %v2273_v6 = vpop.f32.mrf.mxu1 }
 0x1b8   : > { %v6278_v48 = vadd.f32 %v4703_v63, %v2378_v1  ;;  %v2376_v3 = vadd.f32 %v2273_v6, %v6153_v10  ;;  %v4707_v18 = vpop.f32.mrf.mxu0 }
 0x1b9   : > { %v4668_v17 = vpop.f32.mrf.mxu1 }
 0x1ba   : > { %v6281_v23 = vadd.f32 %v2486_v9, %v2376_v3  ;;  %v2379_v37 = vadd.f32 %v4668_v17, %v6156_v21  ;;  %v2502_v41 = vpop.f32.mrf.mxu0 }
 0x1bb   : > { %v6284_v32 = vpop.f32.mrf.mxu1 }
 0x1bc   : > { %v6286_v5 = vadd.f32 %v4704_v33, %v2379_v37  ;;  %v4708_v40 = vpop.f32.mrf.mxu0 }
 0x1bd   : > { %v4671_v54 = vpop.f32.mrf.mxu1 }
 0x1be   : > { %v2382_v12 = vadd.f32 %v4671_v54, %v6168_v28  ;;  %v6289_v2 = vpop.f32.mrf.mxu0 }
 0x1bf   : > { %v2289_v61 = vpop.f32.mrf.mxu1 }
 0x1c0   : > { %v6291_v15 = vadd.f32 %v4707_v18, %v2382_v12  ;;  %v2380_v10 = vadd.f32 %v2289_v61, %v6171_v58  ;;  %v4711_v63 = vpop.f32.mrf.mxu0 }
 0x1c1   : > { %v4672_v9 = vpop.f32.mrf.mxu1 }
 0x1c2   : > { %v6294_v59 = vadd.f32 %v2502_v41, %v2380_v10  ;;  %v2383_v21 = vadd.f32 %v4672_v9, %v6174_v22  ;;  %v2518_v1 = vpop.f32.mrf.mxu0 }
 0x1c3   : > { %v6297_v33 = vpop.f32.mrf.mxu1 }
 0x1c4   : > { %v6299_v6 = vadd.f32 %v4708_v40, %v2383_v21  ;;  %v4712_v3 = vpop.f32.mrf.mxu0 }
 0x1c5   : > { %v4675_v28 = vpop.f32.mrf.mxu1 }
 0x1c6   : > { %v2386_v17 = vadd.f32 %v4675_v28, %v6186_v4  ;;  %v6302_v37 = vpop.f32.mrf.mxu0 }
 0x1c7   : > { %v2305_v18 = vpop.f32.mrf.mxu1 }
 0x1c8   : > { %v6304_v54 = vadd.f32 %v4711_v63, %v2386_v17  ;;  %v2384_v58 = vadd.f32 %v2305_v18, %v6190_v20  ;;  %v4715_v41 = vpop.f32.mrf.mxu0 }
 0x1c9   : > { %v4676_v12 = vpop.f32.mrf.mxu1 }
 0x1ca   : > { %v6307_v61 = vadd.f32 %v2518_v1, %v2384_v58  ;;  %v2387_v22 = vadd.f32 %v4676_v12, %v6193_v30  ;;  %v2534_v10 = vpop.f32.mrf.mxu0 }
 0x1cb   : > { %v6310_v40 = vpop.f32.mrf.mxu1 }
 0x1cc   : > { %v6312_v9 = vadd.f32 %v4712_v3, %v2387_v22  ;;  %v4716_v21 = vpop.f32.mrf.mxu0 }
 0x1cd   : > { %v4679_v4 = vpop.f32.mrf.mxu1 }
 0x1ce   : > { %v2390_v28 = vadd.f32 %v4679_v4, %v6204_v52  ;;  %v6315_v45 = vpop.f32.mrf.mxu0 }
 0x1cf   : > { %6684 = vst [vmem:[#allocation12_spill] sm:$0xff] %v6315_v45  ;;  %v2321_v63 = vpop.f32.mrf.mxu1 }
 0x1d0   : > { %v6317_v17 = vadd.f32 %v4715_v41, %v2390_v28  ;;  %v2388_v20 = vadd.f32 %v2321_v63, %v6208_v39  ;;  %v4719_v1 = vpop.f32.mrf.mxu0 }
 0x1d1   : > { %v4680_v18 = vpop.f32.mrf.mxu1 }
 0x1d2   : > { %v6320_v58 = vadd.f32 %v2534_v10, %v2388_v20  ;;  %v2391_v30 = vadd.f32 %v4680_v18, %v6211_v38  ;;  %v2550_v12 = vpop.f32.mrf.mxu0 }
 0x1d3   : > { %v6323_v3 = vpop.f32.mrf.mxu1 }
 0x1d4   : > { %v6325_v22 = vadd.f32 %v4716_v21, %v2391_v30  ;;  %v4720_v42 = vpop.f32.mrf.mxu0 }
 0x1d5   : > { %v4683_v52 = vpop.f32.mrf.mxu1 }
 0x1d6   : > { %6685 = vst [vmem:[#allocation14_spill] sm:$0xff] %v6325_v22  ;;  %v2394_v4 = vadd.f32 %v4683_v52, %v6220_v14  ;;  %v6328_v45 = vpop.f32.mrf.mxu0 }
 0x1d7   : > { %6686 = vst [vmem:[#allocation18_spill] sm:$0xff] %v6328_v45  ;;  %v2337_v41 = vpop.f32.mrf.mxu1 }
 0x1d8   : > { %v6330_v28 = vadd.f32 %v4719_v1, %v2394_v4  ;;  %v2392_v39 = vadd.f32 %v2337_v41, %v6225_v24  ;;  %v4723_v10 = vpop.f32.mrf.mxu0 }
 0x1d9   : > { %v4684_v63 = vpop.f32.mrf.mxu1 }
 0x1da   : > { %v6333_v20 = vadd.f32 %v2550_v12, %v2392_v39  ;;  %v2395_v38 = vadd.f32 %v4684_v63, %v6228_v62  ;;  %v2566_v18 = vpop.f32.mrf.mxu0 }
 0x1db   : > { %v6336_v21 = vpop.f32.mrf.mxu1 }
 0x1dc   : > { %v6338_v30 = vadd.f32 %v4720_v42, %v2395_v38  ;;  %v4724_v22 = vpop.f32.mrf.mxu0  ;;  %v6690_v38 = vld [vmem:[#allocation23_spill] sm:$0xff] }
 0x1dd   : > { %v4687_v14 = vpop.f32.mrf.mxu1 }
 0x1de   : > { %6687 = vst [vmem:[#allocation22_spill] sm:$0xff] %v6338_v30  ;;  %v2398_v52 = vadd.f32 %v4687_v14, %v6235_v8  ;;  %v6341_v45 = vpop.f32.mrf.mxu0  ;;  %v2150_v30 = vadd.f32 %v6690_v38, %v6123_v44  ;;  %v2371_v8 = vadd.f32 %v6255_v36, %v6120_v16  ;;  %v6364_v16 = vld [vmem:[%s6553_s2] ss:$0 sm:$0xff] }
 0x1df   : > { %6688 = vst [vmem:[#allocation24_spill] sm:$0xff] %v6341_v45  ;;  %v2353_v1 = vpop.f32.mrf.mxu1 }
 0x1e0   : > { %v6343_v4 = vadd.f32 %v4723_v10, %v2398_v52  ;;  %v2396_v24 = vadd.f32 %v2353_v1, %v6240_v31  ;;  %v4767_v12 = vpop.f32.mrf.mxu0  ;;  %v2369_v31 = vadd.f32 %v6259_v57, %v2150_v30 }
 0x1e1   : > { %v4688_v41 = vpop.f32.mrf.mxu1 }
 0x1e2   : > { %v6346_v39 = vadd.f32 %v2566_v18, %v2396_v24  ;;  %v2399_v62 = vadd.f32 %v4688_v41, %v6243_v49  ;;  %v2908_v63 = vpop.f32.mrf.mxu0  ;;  %v2584_v49 = vadd.f32 %v6245_v7, %v2371_v8  ;;  %v2582_v36 = vadd.f32 %v6250_v34, %v2369_v31 }
 0x1e3   : > { %v6349_v42 = vpop.f32.mrf.mxu1  ;;  %v2375_v8 = vadd.f32 %v6269_v35, %v6138_v11 }
 0x1e4   : > { %6689 = vst [vmem:[#allocation2_spill] sm:$0xff] %v6346_v39  ;;  %v6355_v14 = vadd.f32 %v4724_v22, %v2399_v62  ;;  %v4768_v10 = vpop.f32.mrf.mxu0 }
 0x1e5   : > { %v4731_v52 = vpop.f32.mrf.mxu1  ;;  %v2588_v11 = vadd.f32 %v6261_v53, %v2375_v8 }
 0x1e6   : > { %v2818_v18 = vadd.f32 %v4731_v52, %v6252_v50  ;;  %v2911_v1 = vpop.f32.mrf.mxu0  ;;  %v2154_v50 = vadd.f32 %v6128_v13, %v6141_v51 }
 0x1e7   : > { %v2689_v24 = vpop.f32.mrf.mxu1 }
 0x1e8   : > { %v3037_v41 = vadd.f32 %v4767_v12, %v2818_v18  ;;  %v2816_v45 = vadd.f32 %v2689_v24, %v6257_v46  ;;  %v4771_v39 = vpop.f32.mrf.mxu0  ;;  %v2373_v52 = vadd.f32 %v6273_v29, %v2154_v50 }
 0x1e9   : > { %v4732_v44 = vpop.f32.mrf.mxu1 }
 0x1ea   : > { %v3035_v22 = vadd.f32 %v2908_v63, %v2816_v45  ;;  %v2819_v57 = vadd.f32 %v4732_v44, %v2584_v49  ;;  %v2924_v30 = vpop.f32.mrf.mxu0  ;;  %v3076_v7 = vadd.f32 %v6364_v16, %v3037_v41  ;;  %v2586_v35 = vadd.f32 %v6264_v26, %v2373_v52 }
 0x1eb   : > { %v2692_v62 = vpop.f32.mrf.mxu1 }
 0x1ec   : > { %v3038_v12 = vadd.f32 %v4768_v10, %v2819_v57  ;;  %v2817_v46 = vadd.f32 %v2692_v62, %v2582_v36  ;;  %v4772_v38 = vpop.f32.mrf.mxu0  ;;  %v3074_v34 = vadd.f32 %v6364_v16, %v3035_v22  ;;  %v3108_v24 = vmax.f32 %v3076_v7, 0.0 }
 0x1ed   : > { %v4735_v18 = vpop.f32.mrf.mxu1 }
 0x1ee   : > { %v3077_v45 = vadd.f32 %v6364_v16, %v3038_v12  ;;  %v3036_v63 = vadd.f32 %v2911_v1, %v2817_v46  ;;  %v2822_v31 = vadd.f32 %v4735_v18, %v6266_v47  ;;  %v2927_v13 = vpop.f32.mrf.mxu0  ;;  %v3106_v22 = vmax.f32 %v3074_v34, 0.0 }
 0x1ef   : > { %v2705_v51 = vpop.f32.mrf.mxu1 }
 0x1f0   : > { %v3109_v49 = vmax.f32 %v3077_v45, 0.0  ;;  %v3075_v10 = vadd.f32 %v6364_v16, %v3036_v63  ;;  %v2820_v41 = vadd.f32 %v2705_v51, %v6271_v56  ;;  %v4775_v44 = vpop.f32.mrf.mxu0  ;;  %v3041_v29 = vadd.f32 %v4771_v39, %v2822_v31 }
 0x1f1   : > { %v4736_v36 = vpop.f32.mrf.mxu1  ;;  %v2158_v56 = vadd.f32 %v6146_v0, %v6159_v25 }
 0x1f2   : > { %v3139_v57 = vpack.c.bf16 %v3109_v49, %v3108_v24  ;;  %v3107_v1 = vmax.f32 %v3075_v10, 0.0  ;;  %v3039_v50 = vadd.f32 %v2924_v30, %v2820_v41  ;;  %v2940_v47 = vpop.f32.mrf.mxu0  ;;  %v2823_v62 = vadd.f32 %v4736_v36, %v2588_v11 }
 0x1f3   : > { %v2708_v12 = vpop.f32.mrf.mxu1  ;;  %v3080_v53 = vadd.f32 %v6364_v16, %v3041_v29  ;;  %v2377_v45 = vadd.f32 %v6284_v32, %v2158_v56 }
 0x1f4   : > { %v3138_v7 = vpack.c.bf16 %v3107_v1, %v3106_v22  ;;  %v2821_v46 = vadd.f32 %v2708_v12, %v2586_v35  ;;  %v4776_v18 = vpop.f32.mrf.mxu0  ;;  %v3042_v8 = vadd.f32 %v4772_v38, %v2823_v62  ;;  %v3078_v39 = vadd.f32 %v6364_v16, %v3039_v50 }
 0x1f5   : > { %v4739_v26 = vpop.f32.mrf.mxu1  ;;  %v3112_v24 = vmax.f32 %v3080_v53, 0.0  ;;  %v2590_v32 = vadd.f32 %v6276_v55, %v2377_v45  ;;  %v2162_v22 = vadd.f32 %v6164_v43, %v6177_v60 }
 0x1f6   : > { %v3040_v52 = vadd.f32 %v2927_v13, %v2821_v46  ;;  %v2826_v34 = vadd.f32 %v4739_v26, %v6278_v48  ;;  %4835 = vmatprep.mubr.msk.bf16.mxu0 %vm3339_vm7, %v3138_v7  ;;  %v2943_v30 = vpop.f32.mrf.mxu0  ;;  %v3081_v63 = vadd.f32 %v6364_v16, %v3042_v8  ;;  %v3110_v48 = vmax.f32 %v3078_v39, 0.0 }
 0x1f7   : > { %v2721_v31 = vpop.f32.mrf.mxu1  ;;  %4836 = vmatmul.mubr.msk.bf16.vlgmr.msra.gmra.mxu0 %vm3339_vm7, %v3139_v57  ;;  %v2381_v12 = vadd.f32 %v6297_v33, %v2162_v22 }
 0x1f8   : > { %v3079_v0 = vadd.f32 %v6364_v16, %v3040_v52  ;;  %v3045_v25 = vadd.f32 %v4775_v44, %v2826_v34  ;;  %v2824_v38 = vadd.f32 %v2721_v31, %v6281_v23  ;;  %v4779_v51 = vpop.f32.mrf.mxu0  ;;  %v3113_v13 = vmax.f32 %v3081_v63, 0.0 }
 0x1f9   : > { %v4740_v49 = vpop.f32.mrf.mxu1 }
 0x1fa   : > { %v3111_v10 = vmax.f32 %v3079_v0, 0.0  ;;  %v2827_v41 = vadd.f32 %v4740_v49, %v6286_v5  ;;  %v2956_v11 = vpop.f32.mrf.mxu0  ;;  %v3141_v35 = vpack.c.bf16 %v3113_v13, %v3112_v24  ;;  %v3043_v29 = vadd.f32 %v2940_v47, %v2824_v38 }
 0x1fb   : > { %v2724_v36 = vpop.f32.mrf.mxu1  ;;  %v3084_v23 = vadd.f32 %v6364_v16, %v3045_v25 }
 0x1fc   : > { %v3140_v44 = vpack.c.bf16 %v3111_v10, %v3110_v48  ;;  %v3046_v57 = vadd.f32 %v4776_v18, %v2827_v41  ;;  %v4780_v1 = vpop.f32.mrf.mxu0  ;;  %v2825_v50 = vadd.f32 %v2724_v36, %v2590_v32  ;;  %v3082_v47 = vadd.f32 %v6364_v16, %v3043_v29 }
 0x1fd   : > { %v4743_v62 = vpop.f32.mrf.mxu1  ;;  %v3116_v60 = vmax.f32 %v3084_v23, 0.0 }
 0x1fe   : > { %v3085_v5 = vadd.f32 %v6364_v16, %v3046_v57  ;;  %v2830_v7 = vadd.f32 %v4743_v62, %v6291_v15  ;;  %4839 = vmatprep.mubr.msk.bf16.mxu0 %vm3339_vm7, %v3140_v44  ;;  %v2959_v55 = vpop.f32.mrf.mxu0  ;;  %v3044_v46 = vadd.f32 %v2943_v30, %v2825_v50  ;;  %v2594_v15 = vadd.f32 %v6289_v2, %v2381_v12 }
 0x1ff   : > { %v2737_v43 = vpop.f32.mrf.mxu1  ;;  %4840 = vmatmul.mubr.msk.bf16.gmra.mxu0 %vm3339_vm7, %v3141_v35  ;;  %v3114_v30 = vmax.f32 %v3082_v47, 0.0 }
 0x200   : > { %v3117_v18 = vmax.f32 %v3085_v5, 0.0  ;;  %v3049_v56 = vadd.f32 %v4779_v51, %v2830_v7  ;;  %v2828_v53 = vadd.f32 %v2737_v43, %v6294_v59  ;;  %v4783_v8 = vpop.f32.mrf.mxu0  ;;  %v3083_v33 = vadd.f32 %v6364_v16, %v3044_v46 }
 0x201   : > { %v4744_v26 = vpop.f32.mrf.mxu1  ;;  %v2385_v59 = vadd.f32 %v6310_v40, %v6199_v27 }
 0x202   : > { %v3143_v39 = vpack.c.bf16 %v3117_v18, %v3116_v60  ;;  %v3047_v52 = vadd.f32 %v2956_v11, %v2828_v53  ;;  %v2831_v34 = vadd.f32 %v4744_v26, %v6299_v6  ;;  %v2972_v45 = vpop.f32.mrf.mxu0  ;;  %v3115_v63 = vmax.f32 %v3083_v33, 0.0 }
 0x203   : > { %v2740_v31 = vpop.f32.mrf.mxu1  ;;  %v3088_v0 = vadd.f32 %v6364_v16, %v3049_v56  ;;  %v2598_v40 = vadd.f32 %v6302_v37, %v2385_v59  ;;  %v2389_v18 = vadd.f32 %v6323_v3, %v6215_v19  ;;  %v6692_v19 = vld [vmem:[#allocation12_spill] sm:$0xff] }
 0x204   : > { %v3050_v25 = vadd.f32 %v4780_v1, %v2831_v34  ;;  %v2829_v38 = vadd.f32 %v2740_v31, %v2594_v15  ;;  %v4784_v51 = vpop.f32.mrf.mxu0  ;;  %v3142_v24 = vpack.c.bf16 %v3115_v63, %v3114_v30  ;;  %v3086_v2 = vadd.f32 %v6364_v16, %v3047_v52 }
 0x205   : > { %v4747_v13 = vpop.f32.mrf.mxu1  ;;  %v3120_v11 = vmax.f32 %v3088_v0, 0.0  ;;  %v2602_v3 = vadd.f32 %v6692_v19, %v2389_v18 }
 0x206   : > { %v3089_v49 = vadd.f32 %v6364_v16, %v3050_v25  ;;  %v3048_v48 = vadd.f32 %v2959_v55, %v2829_v38  ;;  %v2834_v6 = vadd.f32 %v4747_v13, %v6304_v54  ;;  %v2975_v10 = vpop.f32.mrf.mxu0  ;;  %4843 = vmatprep.mubr.msk.bf16.mxu0 %vm3339_vm7, %v3142_v24  ;;  %v3118_v44 = vmax.f32 %v3086_v2, 0.0  ;;  %v6693_v2 = vld [vmem:[#allocation5_spill] sm:$0xff] }
 0x207   : > { %v2753_v41 = vpop.f32.mrf.mxu1  ;;  %4844 = vmatmul.mubr.msk.bf16.gmra.mxu0 %vm3339_vm7, %v3143_v39 }
 0x208   : > { %v3121_v32 = vmax.f32 %v3089_v49, 0.0  ;;  %v3087_v35 = vadd.f32 %v6364_v16, %v3048_v48  ;;  %v2832_v29 = vadd.f32 %v2753_v41, %v6307_v61  ;;  %v4787_v27 = vpop.f32.mrf.mxu0  ;;  %v3053_v36 = vadd.f32 %v4783_v8, %v2834_v6 }
 0x209   : > { %v4748_v22 = vpop.f32.mrf.mxu1  ;;  %v2393_v49 = vadd.f32 %v6336_v21, %v6693_v2 }
 0x20a   : > { %v3145_v23 = vpack.c.bf16 %v3121_v32, %v3120_v11  ;;  %v3119_v54 = vmax.f32 %v3087_v35, 0.0  ;;  %v3051_v57 = vadd.f32 %v2972_v45, %v2832_v29  ;;  %v2988_v1 = vpop.f32.mrf.mxu0  ;;  %v2835_v50 = vadd.f32 %v4748_v22, %v6312_v9  ;;  %v6691_v45 = vld [vmem:[#allocation14_spill] sm:$0xff] }
 0x20b   : > { %v2756_v62 = vpop.f32.mrf.mxu1  ;;  %v3092_v61 = vadd.f32 %v6364_v16, %v3053_v36 }
 0x20c   : > { %v3144_v12 = vpack.c.bf16 %v3119_v54, %v3118_v44  ;;  %v2833_v5 = vadd.f32 %v2756_v62, %v2598_v40  ;;  %v4788_v7 = vpop.f32.mrf.mxu0  ;;  %v3054_v55 = vadd.f32 %v4784_v51, %v2835_v50  ;;  %v3090_v46 = vadd.f32 %v6364_v16, %v3051_v57  ;;  %v6694_v44 = vld [vmem:[#allocation18_spill] sm:$0xff] }
 0x20d   : > { %v4751_v47 = vpop.f32.mrf.mxu1  ;;  %v3124_v15 = vmax.f32 %v3092_v61, 0.0  ;;  %v6695_v57 = vld [vmem:[#allocation22_spill] sm:$0xff] }
 0x20e   : > { %v3052_v37 = vadd.f32 %v2975_v10, %v2833_v5  ;;  %v2838_v43 = vadd.f32 %v4751_v47, %v6317_v17  ;;  %4847 = vmatprep.mubr.msk.bf16.mxu0 %vm3339_vm7, %v3144_v12  ;;  %v2991_v60 = vpop.f32.mrf.mxu0  ;;  %v3093_v9 = vadd.f32 %v6364_v16, %v3054_v55  ;;  %v3122_v52 = vmax.f32 %v3090_v46, 0.0 }
 0x20f   : > { %v2769_v56 = vpop.f32.mrf.mxu1  ;;  %4848 = vmatmul.mubr.msk.bf16.gmra.mxu0 %vm3339_vm7, %v3145_v23 }
 0x210   : > { %v3091_v53 = vadd.f32 %v6364_v16, %v3052_v37  ;;  %v3057_v8 = vadd.f32 %v4787_v27, %v2838_v43  ;;  %v2836_v33 = vadd.f32 %v2769_v56, %v6320_v58  ;;  %v4791_v26 = vpop.f32.mrf.mxu0  ;;  %v3125_v39 = vmax.f32 %v3093_v9, 0.0 }
 0x211   : > { %v4752_v17 = vpop.f32.mrf.mxu1 }
 0x212   : > { %v3123_v34 = vmax.f32 %v3091_v53, 0.0  ;;  %v2839_v30 = vadd.f32 %v4752_v17, %v6691_v45  ;;  %v3004_v63 = vpop.f32.mrf.mxu0  ;;  %v3147_v31 = vpack.c.bf16 %v3125_v39, %v3124_v15  ;;  %v3055_v0 = vadd.f32 %v2988_v1, %v2836_v33 }
 0x213   : > { %v2772_v25 = vpop.f32.mrf.mxu1  ;;  %v3096_v51 = vadd.f32 %v6364_v16, %v3057_v8 }
 0x214   : > { %v3146_v38 = vpack.c.bf16 %v3123_v34, %v3122_v52  ;;  %v3058_v58 = vadd.f32 %v4788_v7, %v2839_v30  ;;  %v4792_v59 = vpop.f32.mrf.mxu0  ;;  %v2837_v24 = vadd.f32 %v2772_v25, %v2602_v3  ;;  %v3094_v41 = vadd.f32 %v6364_v16, %v3055_v0 }
 0x215   : > { %v4755_v13 = vpop.f32.mrf.mxu1  ;;  %v3128_v35 = vmax.f32 %v3096_v51, 0.0 }
 0x216   : > { %v3097_v48 = vadd.f32 %v6364_v16, %v3058_v58  ;;  %v2842_v6 = vadd.f32 %v4755_v13, %v6330_v28  ;;  %4851 = vmatprep.mubr.msk.bf16.mxu0 %vm3339_vm7, %v3146_v38  ;;  %v3007_v10 = vpop.f32.mrf.mxu0  ;;  %v3056_v11 = vadd.f32 %v2991_v60, %v2837_v24  ;;  %v2606_v28 = vadd.f32 %v6694_v44, %v2393_v49 }
 0x217   : > { %v2785_v32 = vpop.f32.mrf.mxu1  ;;  %4852 = vmatmul.mubr.msk.bf16.gmra.mxu0 %vm3339_vm7, %v3147_v31  ;;  %v3126_v50 = vmax.f32 %v3094_v41, 0.0 }
 0x218   : > { %v3129_v29 = vmax.f32 %v3097_v48, 0.0  ;;  %v3061_v27 = vadd.f32 %v4791_v26, %v2842_v6  ;;  %v2840_v40 = vadd.f32 %v2785_v32, %v6333_v20  ;;  %v3095_v21 = vadd.f32 %v6364_v16, %v3056_v11  ;;  %v4795_v22 = vpop.f32.mrf.mxu0  ;;  %v6696_v20 = vld [vmem:[#allocation10_spill] sm:$0xff] }
 0x219   : > { %v4756_v36 = vpop.f32.mrf.mxu1  ;;  %v2397_v55 = vadd.f32 %v6349_v42, %v6696_v20  ;;  %v6697_v26 = vld [vmem:[#allocation2_spill] sm:$0xff]  ;;  %v6698_v42 = vld [vmem:[#allocation24_spill] sm:$0xff] }
 0x21a   : > { %v3149_v23 = vpack.c.bf16 %v3129_v29, %v3128_v35  ;;  %v3059_v54 = vadd.f32 %v3004_v63, %v2840_v40  ;;  %v2843_v1 = vadd.f32 %v4756_v36, %v6695_v57  ;;  %v3127_v62 = vmax.f32 %v3095_v21, 0.0  ;;  %v3020_v37 = vpop.f32.mrf.mxu0 }
 0x21b   : > { %v2788_v12 = vpop.f32.mrf.mxu1  ;;  %v3100_v5 = vadd.f32 %v6364_v16, %v3061_v27  ;;  %v2610_v39 = vadd.f32 %v6698_v42, %v2397_v55 }
 0x21c   : > { %v3062_v7 = vadd.f32 %v4792_v59, %v2843_v1  ;;  %v2841_v61 = vadd.f32 %v2788_v12, %v2606_v28  ;;  %v3148_v47 = vpack.c.bf16 %v3127_v62, %v3126_v50  ;;  %v3098_v43 = vadd.f32 %v6364_v16, %v3059_v54  ;;  %v4796_v34 = vpop.f32.mrf.mxu0  ;;  %v6475_v62 = vld [vmem:[%s6556_s5] ss:$0 sm:$0xff] }
 0x21d   : > { %v4759_v46 = vpop.f32.mrf.mxu1  ;;  %v3132_v53 = vmax.f32 %v3100_v5, 0.0 }
 0x21e   : > { %v3101_v60 = vadd.f32 %v6364_v16, %v3062_v7  ;;  %v3060_v18 = vadd.f32 %v3007_v10, %v2841_v61  ;;  %v2846_v9 = vadd.f32 %v4759_v46, %v6343_v4  ;;  %4855 = vmatprep.mubr.msk.bf16.mxu0 %vm3339_vm7, %v3148_v47  ;;  %v3130_v45 = vmax.f32 %v3098_v43, 0.0  ;;  %v3023_v51 = vpop.f32.mrf.mxu0 }
 0x21f   : > { %v2801_v56 = vpop.f32.mrf.mxu1  ;;  %4856 = vmatmul.mubr.msk.bf16.gmra.mxu0 %vm3339_vm7, %v3149_v23 }
 0x220   : > { %v3133_v8 = vmax.f32 %v3101_v60, 0.0  ;;  %v3099_v33 = vadd.f32 %v6364_v16, %v3060_v18  ;;  %v2844_v15 = vadd.f32 %v2801_v56, %v6697_v26  ;;  %v3065_v17 = vadd.f32 %v4795_v22, %v2846_v9 }
 0x221   : > { %v4760_v52 = vpop.f32.mrf.mxu1 }
 0x222   : > { %v3151_v30 = vpack.c.bf16 %v3133_v8, %v3132_v53  ;;  %v3131_v63 = vmax.f32 %v3099_v33, 0.0  ;;  %v3063_v4 = vadd.f32 %v3020_v37, %v2844_v15  ;;  %v2847_v19 = vadd.f32 %v4760_v52, %v6355_v14 }
 0x223   : > { %v2804_v3 = vpop.f32.mrf.mxu1  ;;  %v3104_v25 = vadd.f32 %v6364_v16, %v3065_v17 }
 0x224   : > { %v3150_v31 = vpack.c.bf16 %v3131_v63, %v3130_v45  ;;  %v2845_v0 = vadd.f32 %v2804_v3, %v2610_v39  ;;  %v3066_v38 = vadd.f32 %v4796_v34, %v2847_v19  ;;  %v3102_v58 = vadd.f32 %v6364_v16, %v3063_v4 }
 0x225   : > { %v3136_v2 = vmax.f32 %v3104_v25, 0.0  ;;  %v4803_v41 = vpop.f32.mrf.mxu1 }
 0x226   : > { %v3064_v59 = vadd.f32 %v3023_v51, %v2845_v0  ;;  %4859 = vmatprep.mubr.msk.bf16.mxu0 %vm3339_vm7, %v3150_v31  ;;  %v3105_v24 = vadd.f32 %v6364_v16, %v3066_v38  ;;  %v3134_v49 = vmax.f32 %v3102_v58, 0.0 }
 0x227   : > { %4860 = vmatmul.mubr.msk.bf16.gmra.mxu0 %vm3339_vm7, %v3151_v30  ;;  %v3206_v11 = vpop.f32.mrf.mxu1 }
 0x228   : > { %v3103_v13 = vadd.f32 %v6364_v16, %v3064_v59  ;;  %v3137_v14 = vmax.f32 %v3105_v24, 0.0 }
 0x229   : > { %v4804_v32 = vpop.f32.mrf.mxu1 }
 0x22a   : > { %v3135_v48 = vmax.f32 %v3103_v13, 0.0  ;;  %v3153_v6 = vpack.c.bf16 %v3137_v14, %v3136_v2 }
 0x22b   : > { %v3209_v35 = vpop.f32.mrf.mxu1 }
 0x22c   : > { %v3152_v10 = vpack.c.bf16 %v3135_v48, %v3134_v49 }
 0x22d   : > { %v4807_v29 = vpop.f32.mrf.mxu1 }
 0x22e   : > { %4863 = vmatprep.mubr.msk.bf16.mxu0 %vm3339_vm7, %v3152_v10 }
 0x22f   : > { %4864 = vmatmul.mubr.msk.bf16.gmra.mxu0 %vm3339_vm7, %v3153_v6  ;;  %v3222_v27 = vpop.f32.mrf.mxu1 }
 0x231   : > { %v4808_v40 = vpop.f32.mrf.mxu1 }
 0x233   : > { %v3225_v16 = vpop.f32.mrf.mxu1 }
 0x235   : > { %v4811_v21 = vpop.f32.mrf.mxu1 }
 0x237   : > { %v3238_v36 = vpop.f32.mrf.mxu1 }
 0x239   : > { %v4812_v22 = vpop.f32.mrf.mxu1 }
 0x23b   : > { %v6462_v44 = vpop.f32.mrf.mxu1 }
 0x23d   : > { %v6464_v28 = vpop.f32.mrf.mxu1 }
 0x23f   : > { %v6466_v23 = vpop.f32.mrf.mxu1 }
 0x241   : > { %v6468_v54 = vpop.f32.mrf.mxu1 }
 0x243   : > { %v6470_v57 = vpop.f32.mrf.mxu1 }
 0x245   : > { %v6477_v7 = vpop.f32.mrf.mxu1 }
 0x247   : > { %v6483_v60 = vpop.f32.mrf.mxu1 }
 0x249   : > { %v6491_v17 = vpop.f32.mrf.mxu1 }
 0x24b   : > { %v6498_v31 = vpop.f32.mrf.mxu1 }
 0x24d   : > { %v4823_v14 = vpop.f32.mrf.mxu1 }
 0x2b7   : > { %v4837_v1 = vpop.f32.mrf.mxu0 }
 0x2b8   : > { %v3431_v50 = vadd.f32 %v4837_v1, %v4803_v41 }
 0x2b9   : > { %v3422_v12 = vpop.f32.mrf.mxu0 }
 0x2ba   : > { %v3423_v5 = vadd.f32 %v3422_v12, %v3206_v11  ;;  %v3558_v20 = vadd.f32 %v6475_v62, %v3431_v50 }
 0x2bb   : > { %v4838_v61 = vpop.f32.mrf.mxu0 }
 0x2bc   : > { %v3434_v55 = vadd.f32 %v4838_v61, %v4804_v32  ;;  %v3556_v46 = vadd.f32 %v6475_v62, %v3423_v5  ;;  %v3590_v9 = vmax.f32 %v3558_v20, 0.0  ;;  %v3286_v32 = vpop.f32.mrf.mxu1 }
 0x2bd   : > { %v3425_v47 = vpop.f32.mrf.mxu0 }
 0x2be   : > { %v3559_v37 = vadd.f32 %v6475_v62, %v3434_v55  ;;  %v3426_v43 = vadd.f32 %v3425_v47, %v3209_v35  ;;  %v3588_v26 = vmax.f32 %v3556_v46, 0.0 }
 0x2bf   : > { %v4841_v18 = vpop.f32.mrf.mxu0 }
 0x2c0   : > { %v3591_v56 = vmax.f32 %v3559_v37, 0.0  ;;  %v3557_v53 = vadd.f32 %v6475_v62, %v3426_v43  ;;  %v3447_v8 = vadd.f32 %v4841_v18, %v4807_v29 }
 0x2c1   : > { %v3438_v33 = vpop.f32.mrf.mxu0 }
 0x2c2   : > { %v4189_v15 = vpack.c.bf16 %v3591_v56, %v3590_v9  ;;  %v3589_v42 = vmax.f32 %v3557_v53, 0.0  ;;  %v3439_v39 = vadd.f32 %v3438_v33, %v3222_v27  ;;  %v3562_v45 = vadd.f32 %v6475_v62, %v3447_v8 }
 0x2c3   : > { %v4842_v52 = vpop.f32.mrf.mxu0 }
 0x2c4   : > { %4261 = vst [vmem:[%s6489_s8 + $0x8] sm:$0xff] %v4189_v15   ;;  %v4184_v34 = vpack.c.bf16 %v3589_v42, %v3588_v26  ;;  %v3450_v30 = vadd.f32 %v4842_v52, %v4808_v40  ;;  %v3560_v4 = vadd.f32 %v6475_v62, %v3439_v39  ;;  %v3594_v0 = vmax.f32 %v3562_v45, 0.0 }
 0x2c5   : > { %v3441_v63 = vpop.f32.mrf.mxu0 }
 0x2c6   : > { %4185 = vst [vmem:[%s6489_s8] sm:$0xff] %v4184_v34   ;;  %v3563_v19 = vadd.f32 %v6475_v62, %v3450_v30  ;;  %v3442_v3 = vadd.f32 %v3441_v63, %v3225_v16  ;;  %v3592_v59 = vmax.f32 %v3560_v4, 0.0 }
 0x2c7   : > { %v4845_v51 = vpop.f32.mrf.mxu0 }
 0x2c8   : > { %v3595_v25 = vmax.f32 %v3563_v19, 0.0  ;;  %v3561_v38 = vadd.f32 %v6475_v62, %v3442_v3  ;;  %v3463_v58 = vadd.f32 %v4845_v51, %v4811_v21 }
 0x2c9   : > { %v3454_v2 = vpop.f32.mrf.mxu0 }
 0x2ca   : > { %v4199_v24 = vpack.c.bf16 %v3595_v25, %v3594_v0  ;;  %v3593_v13 = vmax.f32 %v3561_v38, 0.0  ;;  %v3455_v49 = vadd.f32 %v3454_v2, %v3238_v36  ;;  %v3566_v10 = vadd.f32 %v6475_v62, %v3463_v58 }
 0x2cb   : > { %v4846_v6 = vpop.f32.mrf.mxu0 }
 0x2cc   : > { %4263 = vst [vmem:[%s6489_s8 + $0x18] sm:$0xff] %v4199_v24   ;;  %v4194_v48 = vpack.c.bf16 %v3593_v13, %v3592_v59  ;;  %v3466_v41 = vadd.f32 %v4846_v6, %v4812_v22  ;;  %v3564_v35 = vadd.f32 %v6475_v62, %v3455_v49  ;;  %v3598_v16 = vmax.f32 %v3566_v10, 0.0  ;;  %v4824_v22 = vpop.f32.mrf.mxu1 }
 0x2cd   : > { %v3457_v11 = vpop.f32.mrf.mxu0 }
 0x2ce   : > { %4262 = vst [vmem:[%s6489_s8 + $0x10] sm:$0xff] %v4194_v48   ;;  %v3567_v29 = vadd.f32 %v6475_v62, %v3466_v41  ;;  %v3458_v27 = vadd.f32 %v3457_v11, %v6462_v44  ;;  %v3596_v12 = vmax.f32 %v3564_v35, 0.0  ;;  %v3289_v43 = vpop.f32.mrf.mxu1 }
 0x2cf   : > { %v4849_v40 = vpop.f32.mrf.mxu0 }
 0x2d0   : > { %v3599_v21 = vmax.f32 %v3567_v29, 0.0  ;;  %v3565_v36 = vadd.f32 %v6475_v62, %v3458_v27  ;;  %v3479_v1 = vadd.f32 %v4849_v40, %v6464_v28 }
 0x2d1   : > { %v3470_v50 = vpop.f32.mrf.mxu0 }
 0x2d2   : > { %v4209_v5 = vpack.c.bf16 %v3599_v21, %v3598_v16  ;;  %v3597_v61 = vmax.f32 %v3565_v36, 0.0  ;;  %v3471_v20 = vadd.f32 %v3470_v50, %v6466_v23  ;;  %v3570_v44 = vadd.f32 %v6475_v62, %v3479_v1 }
 0x2d3   : > { %v4850_v55 = vpop.f32.mrf.mxu0 }
 0x2d4   : > { %4265 = vst [vmem:[%s6489_s8 + $0x28] sm:$0xff] %v4209_v5   ;;  %v4204_v47 = vpack.c.bf16 %v3597_v61, %v3596_v12  ;;  %v3482_v46 = vadd.f32 %v4850_v55, %v6468_v54  ;;  %v3568_v28 = vadd.f32 %v6475_v62, %v3471_v20  ;;  %v3602_v53 = vmax.f32 %v3570_v44, 0.0  ;;  %v4827_v54 = vpop.f32.mrf.mxu1 }
 0x2d5   : > { %v3473_v37 = vpop.f32.mrf.mxu0 }
 0x2d6   : > { %4264 = vst [vmem:[%s6489_s8 + $0x20] sm:$0xff] %v4204_v47   ;;  %v3571_v18 = vadd.f32 %v6475_v62, %v3482_v46  ;;  %v3474_v9 = vadd.f32 %v3473_v37, %v6470_v57  ;;  %v3600_v15 = vmax.f32 %v3568_v28, 0.0  ;;  %v3302_v4 = vpop.f32.mrf.mxu1 }
 0x2d7   : > { %v4853_v56 = vpop.f32.mrf.mxu0 }
 0x2d8   : > { %v3603_v23 = vmax.f32 %v3571_v18, 0.0  ;;  %v3569_v8 = vadd.f32 %v6475_v62, %v3474_v9  ;;  %v3495_v33 = vadd.f32 %v4853_v56, %v6477_v7  ;;  %v4828_v59 = vpop.f32.mrf.mxu1 }
 0x2d9   : > { %v3486_v26 = vpop.f32.mrf.mxu0 }
 0x2da   : > { %v4219_v42 = vpack.c.bf16 %v3603_v23, %v3602_v53  ;;  %v3601_v39 = vmax.f32 %v3569_v8, 0.0  ;;  %v3487_v52 = vadd.f32 %v3486_v26, %v6483_v60  ;;  %v3574_v57 = vadd.f32 %v6475_v62, %v3495_v33  ;;  %v3305_v41 = vpop.f32.mrf.mxu1 }
 0x2db   : > { %v4854_v34 = vpop.f32.mrf.mxu0 }
 0x2dc   : > { %4267 = vst [vmem:[%s6489_s8 + $0x38] sm:$0xff] %v4219_v42   ;;  %v4214_v45 = vpack.c.bf16 %v3601_v39, %v3600_v15  ;;  %v3498_v30 = vadd.f32 %v4854_v34, %v6491_v17  ;;  %v3572_v7 = vadd.f32 %v6475_v62, %v3487_v52  ;;  %v3606_v25 = vmax.f32 %v3574_v57, 0.0  ;;  %v4831_v21 = vpop.f32.mrf.mxu1 }
 0x2dd   : > { %v3489_v63 = vpop.f32.mrf.mxu0 }
 0x2de   : > { %4266 = vst [vmem:[%s6489_s8 + $0x30] sm:$0xff] %v4214_v45   ;;  %v3575_v19 = vadd.f32 %v6475_v62, %v3498_v30  ;;  %v3490_v3 = vadd.f32 %v3489_v63, %v6498_v31  ;;  %v3604_v17 = vmax.f32 %v3572_v7, 0.0  ;;  %v3318_v47 = vpop.f32.mrf.mxu1 }
 0x2df   : > { %v4857_v0 = vpop.f32.mrf.mxu0 }
 0x2e0   : > { %v3607_v60 = vmax.f32 %v3575_v19, 0.0  ;;  %v3573_v38 = vadd.f32 %v6475_v62, %v3490_v3  ;;  %v3511_v51 = vadd.f32 %v4857_v0, %v4823_v14  ;;  %v4832_v23 = vpop.f32.mrf.mxu1 }
 0x2e1   : > { %v3502_v58 = vpop.f32.mrf.mxu0 }
 0x2e2   : > { %v4229_v24 = vpack.c.bf16 %v3607_v60, %v3606_v25  ;;  %v3605_v13 = vmax.f32 %v3573_v38, 0.0  ;;  %v3503_v2 = vadd.f32 %v3502_v58, %v3286_v32  ;;  %v3578_v6 = vadd.f32 %v6475_v62, %v3511_v51  ;;  %v3321_v45 = vpop.f32.mrf.mxu1 }
 0x2e3   : > { %v4858_v49 = vpop.f32.mrf.mxu0 }
 0x2e4   : > { %4269 = vst [vmem:[%s6489_s8 + $0x48] sm:$0xff] %v4229_v24   ;;  %v4224_v48 = vpack.c.bf16 %v3605_v13, %v3604_v17  ;;  %v3514_v10 = vadd.f32 %v4858_v49, %v4824_v22  ;;  %v3576_v11 = vadd.f32 %v6475_v62, %v3503_v2  ;;  %v3610_v27 = vmax.f32 %v3578_v6, 0.0 }
 0x2e5   : > { %v3505_v31 = vpop.f32.mrf.mxu0 }
 0x2e6   : > { %4268 = vst [vmem:[%s6489_s8 + $0x40] sm:$0xff] %v4224_v48   ;;  %v3579_v14 = vadd.f32 %v6475_v62, %v3514_v10  ;;  %v3506_v35 = vadd.f32 %v3505_v31, %v3289_v43  ;;  %v3608_v1 = vmax.f32 %v3576_v11, 0.0 }
 0x2e7   : > { %v4861_v29 = vpop.f32.mrf.mxu0 }
 0x2e8   : > { %v3611_v40 = vmax.f32 %v3579_v14, 0.0  ;;  %v3577_v32 = vadd.f32 %v6475_v62, %v3506_v35  ;;  %v3527_v16 = vadd.f32 %v4861_v29, %v4827_v54 }
 0x2e9   : > { %v3518_v36 = vpop.f32.mrf.mxu0 }
 0x2ea   : > { %v4239_v50 = vpack.c.bf16 %v3611_v40, %v3610_v27  ;;  %v3609_v22 = vmax.f32 %v3577_v32, 0.0  ;;  %v3519_v12 = vadd.f32 %v3518_v36, %v3302_v4  ;;  %v3582_v20 = vadd.f32 %v6475_v62, %v3527_v16 }
 0x2eb   : > { %v4862_v5 = vpop.f32.mrf.mxu0 }
 0x2ec   : > { %4271 = vst [vmem:[%s6489_s8 + $0x58] sm:$0xff] %v4239_v50   ;;  %v4234_v61 = vpack.c.bf16 %v3609_v22, %v3608_v1  ;;  %v3530_v55 = vadd.f32 %v4862_v5, %v4828_v59  ;;  %v3580_v46 = vadd.f32 %v6475_v62, %v3519_v12  ;;  %v3614_v18 = vmax.f32 %v3582_v20, 0.0 }
 0x2ed   : > { %v3521_v44 = vpop.f32.mrf.mxu0 }
 0x2ee   : > { %4270 = vst [vmem:[%s6489_s8 + $0x50] sm:$0xff] %v4234_v61   ;;  %v3583_v37 = vadd.f32 %v6475_v62, %v3530_v55  ;;  %v3522_v43 = vadd.f32 %v3521_v44, %v3305_v41  ;;  %v3612_v33 = vmax.f32 %v3580_v46, 0.0 }
 0x2ef   : > { %v4865_v28 = vpop.f32.mrf.mxu0 }
 0x2f0   : > { %v3615_v9 = vmax.f32 %v3583_v37, 0.0  ;;  %v3581_v56 = vadd.f32 %v6475_v62, %v3522_v43  ;;  %v3543_v53 = vadd.f32 %v4865_v28, %v4831_v21 }
 0x2f1   : > { %v3534_v8 = vpop.f32.mrf.mxu0 }
 0x2f2   : > { %v4249_v26 = vpack.c.bf16 %v3615_v9, %v3614_v18  ;;  %v3613_v54 = vmax.f32 %v3581_v56, 0.0  ;;  %v3535_v15 = vadd.f32 %v3534_v8, %v3318_v47  ;;  %v3586_v52 = vadd.f32 %v6475_v62, %v3543_v53 }
 0x2f3   : > { %v4866_v42 = vpop.f32.mrf.mxu0 }
 0x2f4   : > { %4273 = vst [vmem:[%s6489_s8 + $0x68] sm:$0xff] %v4249_v26   ;;  %v4244_v39 = vpack.c.bf16 %v3613_v54, %v3612_v33  ;;  %v3546_v34 = vadd.f32 %v4866_v42, %v4832_v23  ;;  %v3584_v30 = vadd.f32 %v6475_v62, %v3535_v15  ;;  %v3618_v7 = vmax.f32 %v3586_v52, 0.0 }
 0x2f5   : > { %v3537_v57 = vpop.f32.mrf.mxu0 }
 0x2f6   : > { %4272 = vst [vmem:[%s6489_s8 + $0x60] sm:$0xff] %v4244_v39   ;;  %v3587_v63 = vadd.f32 %v6475_v62, %v3546_v34  ;;  %v3538_v4 = vadd.f32 %v3537_v57, %v3321_v45  ;;  %v3616_v0 = vmax.f32 %v3584_v30, 0.0 }
 0x2f8   : > { %v3619_v19 = vmax.f32 %v3587_v63, 0.0  ;;  %v3585_v3 = vadd.f32 %v6475_v62, %v3538_v4 }
 0x2fa   : > { %v4259_v25 = vpack.c.bf16 %v3619_v19, %v3618_v7  ;;  %v3617_v60 = vmax.f32 %v3585_v3, 0.0 }
 0x2fc   : > { %4275 = vst [vmem:[%s6489_s8 + $0x78] sm:$0xff] %v4259_v25   ;;  %v4254_v38 = vpack.c.bf16 %v3617_v60, %v3616_v0 }
 0x2fe   : > { %4274 = vst [vmem:[%s6489_s8 + $0x70] sm:$0xff] %v4254_v38  }
 0x2ff PF: > { %s16_s21 = sadd.s32 1, %s4927_s21  }
 0x300   : > { %p13_p4 = scmp.ge.s32.totalorder %s16_s21, 4  }
 0x302   :  { %15 = sbr.rel (!%p13_p4) target bundleno = 1 (0x1), region = 74 }

// kernel: forward.3
= control target key start
LH: loop header
LB: loop body
LE: loop exit
PB: predicated region body
PF: predicated region fallthrough
CT: control target
= control target key end

     0   :  { %s4802_s21 = smov 0   ;;  %s6370_s0 = inlined_call_operand.vmem [shape: bf16[2,18,18,4], index: 0, kind: input, shape index: {}]   ;;  %s6371_s1 = inlined_call_operand.vmem [shape: bf16[36,16], index: 1, kind: input, shape index: {}]   ;;  %s6372_s2 = inlined_call_operand.vmem [shape: f32[1,16], index: 2, kind: input, shape index: {}]   ;;  %s6373_s3 = inlined_call_operand.vmem [shape: bf16[16,128], index: 3, kind: input, shape index: {}]   ;;  %s6374_s4 = inlined_call_operand.vmem [shape: bf16[4,128], index: 4, kind: input, shape index: {}]   ;;  %s6375_s5 = inlined_call_operand.vmem [shape: f32[1,128], index: 5, kind: input, shape index: {}]   ;;  %s6376_s6 = inlined_call_operand.vmem [shape: bf16[2,256,128], index: 6, kind: output, shape index: {}]  }
   0x1 LB: > { %s3728_s22 = sadd.s32 4294967295, %s4765_s21   ;;  %p3732_p0 = scmp.ge.s32.totalorder %s4765_s21, 1  ;;  %s4765_s21 = sphi %s4802_s21, %s16_s21  }
   0x2   : > { %p212_p1 = scmp.lt.s32.totalorder %s4765_s21, 3 }
   0x4   : > { %p213_p2 = pnand %p3732_p0, %p212_p1 }
   0x6   : > { %216 = sbr.rel (%p213_p2) target bundleno = 767 (0x2ff), region = 44 }
   0xb   : > { %v307_v0 = vld [vmem:[%s6371_s1] sm:$0xf]  ;;  %p242_p3 = scmp.lt.s32.totalorder %s3728_s22, 1  ;;  %v308_v2 = vld [vmem:[%s6371_s1 + $0x4] sm:$0xf]  ;;  %vm800_vm0 = vcmask 1041408  }
   0xc   : > { %v3752_v1 = vcombine.low %v307_v0, %v307_v0  ;;  %v3850_v3 = vcombine.low %v308_v2, %v308_v2  ;;  %vm312_vm1 = vsmask.f32 3328  ;;  %vm313_vm2 = vsmask.f32 7440 }
   0xd   : > { %s6519_s22 = smov (!%p242_p3, %s3728_s22), 1  ;;  %v4828_v6 = vsel %vm800_vm0, %v307_v0, 0  ;;  %v4833_v8 = vsel %vm800_vm0, %v308_v2, 0  ;;  %vm751_vm3 = vcmask 31744   ;;  %vm4874_vm4 = vmor %vm312_vm1, %vm313_vm2  ;;  %v6422_v35 = vmov 0 }
   0xe   : > { %v750_v4 = vrot.slane %v3752_v1, 2  ;;  %s4727_s27 = smul.u32 216, %s6519_s22  ;;  %v4830_v7 = vrot.slane %v3850_v3, 2  ;;  %v6423_v35 = vsel %vm4874_vm4, 4294967295, %v6422_v35  ;;  %vm1273_vm5 = vcmask 1042432   ;;  %s4025_s23 = sshll.u32 %s6519_s22, 7 }
   0xf   : > { %6424 = vst [vmem:[#allocation2_spill] sm:$0xff] %v6423_v35  ;;  %vm1274_vm6 = vcmask 1046532   ;;  %vm3232_vm8 = vcmask 130048   ;;  %s6308_s26 = scalar_lea.vmem %s6376_s6, %s4025_s23 }
  0x10   : > { %4717 = vmatprep.subr.msk.bf16.mxu1 %vm800_vm0, %v750_v4  ;;  %4716 = vmatprep.subr.msk.bf16.mxu0 %vm800_vm0, %v750_v4  ;;  %v802_v5 = vsel %vm800_vm0, %v750_v4, 0  ;;  %s4825_s30 = scalar_lea.vmem %s6370_s0, %s4727_s27  ;;  %vm5190_vm7 = vmor %vm1273_vm5, %vm1274_vm6 }
  0x11   : > { %4715 = vmatpush3.bf16.msra.mxu1 %v802_v5  ;;  %4341 = vmatpush3.bf16.msra.mxu0 %v802_v5  ;;  %v4836_v9 = vld [vmem:[%s4825_s30] sm:$0xf]  ;;  %v4839_v10 = vld [vmem:[%s4825_s30 + $0x4] sm:$0xf]  ;;  %v4842_v11 = vld [vmem:[%s4825_s30 + $0x8] sm:$0x1] }
  0x12   : > { %4718 = vmatprep.subr.msk.bf16.mxu1 %vm800_vm0, %v307_v0  ;;  %4719 = vmatprep.subr.msk.bf16.mxu0 %vm800_vm0, %v308_v2  ;;  %v316_v12 = vshrl.u32 %v4836_v9, 16  ;;  %v319_v13 = vshll.u32 %v4836_v9, 16  ;;  %v325_v14 = vshll.u32 %v4839_v10, 16  ;;  %v329_v15 = vshrl.u32 %v4839_v10, 16  ;;  %v4851_v16 = vld [vmem:[%s4825_s30 + $0x60] sm:$0xf] }
  0x13   : > { %v335_v17 = vshll.u32 %v4842_v11, 16  ;;  %v4856_v19 = vld [vmem:[%s4825_s30 + $0x64] sm:$0xf]  ;;  %v4859_v20 = vld [vmem:[%s4825_s30 + $0x68] sm:$0x1]  ;;  %v508_v27 = vshrl.u32 %v4851_v16, 16 }
  0x14   : > { %v318_v21 = vrot.slane %v316_v12, 4  ;;  %v321_v22 = vrot.slane %v319_v13, 5  ;;  %v327_v23 = vrot.slane %v325_v14, 5  ;;  %v331_v24 = vrot.slane %v329_v15, 4  ;;  %v4862_v25 = vld [vmem:[%s4825_s30 + $0xc] sm:$0xf] }
  0x15   : > { %v337_v26 = vrot.slane %v335_v17, 5  ;;  %v511_v28 = vshll.u32 %v4851_v16, 16  ;;  %v517_v29 = vshll.u32 %v4856_v19, 16  ;;  %v521_v32 = vshrl.u32 %v4856_v19, 16  ;;  %v4870_v34 = vld [vmem:[%s4825_s30 + $0x10] sm:$0xf] }
  0x16   : > { %v322_v30 = vor.u32 %v321_v22, %v318_v21  ;;  %v332_v31 = vor.u32 %v331_v24, %v327_v23  ;;  %v527_v33 = vshll.u32 %v4859_v20, 16  ;;  %v510_v36 = vrot.slane %v508_v27, 4  ;;  %v4880_v45 = vld [vmem:[%s4825_s30 + $0x14] sm:$0x1]  ;;  %v4890_v53 = vld [vmem:[%s4825_s30 + $0x6c] sm:$0xf] }
  0x17   : > { %v513_v37 = vrot.slane %v511_v28, 5  ;;  %v519_v38 = vrot.slane %v517_v29, 5  ;;  %v340_v39 = vshrl.u32 %v4862_v25, 16  ;;  %v523_v42 = vrot.slane %v521_v32, 4  ;;  %6425 = vst [vmem:[#allocation3_spill] sm:$0xff] %v4890_v53 }
  0x18   : > { %v323_v40 = vrot.slane %v322_v30, 4  ;;  %v333_v41 = vrot.slane %v332_v31, 4  ;;  %v529_v43 = vrot.slane %v527_v33, 5  ;;  %v343_v47 = vshll.u32 %v4862_v25, 16  ;;  %v4895_v62 = vld [vmem:[%s4825_s30 + $0x70] sm:$0xf] }
  0x19   : > { %v514_v44 = vor.u32 %v513_v37, %v510_v36  ;;  %v342_v46 = vrot.slane %v340_v39, 4  ;;  %v349_v48 = vshll.u32 %v4870_v34, 16  ;;  %v524_v51 = vor.u32 %v523_v42, %v519_v38  ;;  %v4902_v2 = vld [vmem:[%s4825_s30 + $0x74] sm:$0x1]  ;;  %v4909_v14 = vld [vmem:[%s4825_s30 + $0x18] sm:$0xf] }
  0x1a   : > { %v328_v49 = vsel %vm4874_vm4, %v323_v40, %v327_v23  ;;  %v338_v50 = vsel %vm4874_vm4, %v333_v41, %v337_v26  ;;  %v353_v52 = vshrl.u32 %v4870_v34, 16  ;;  %v345_v56 = vrot.slane %v343_v47, 5  ;;  %6426 = vst [vmem:[#allocation4_spill] sm:$0xff] %v4902_v2  ;;  %v4917_v28 = vld [vmem:[%s4825_s30 + $0x1c] sm:$0xf] }
  0x1b   : > { %v3736_v54 = vcombine.low %v328_v49, %v338_v50  ;;  %v515_v55 = vrot.slane %v514_v44, 4  ;;  %v351_v57 = vrot.slane %v349_v48, 5  ;;  %v525_v58 = vrot.slane %v524_v51, 4  ;;  %v4924_v31 = vld [vmem:[%s4825_s30 + $0x20] sm:$0x1] }
  0x1c   : > { %v355_v59 = vrot.slane %v353_v52, 4  ;;  %v359_v60 = vshll.u32 %v4880_v45, 16  ;;  %v346_v0 = vor.u32 %v345_v56, %v342_v46  ;;  %v532_v3 = vshrl.u32 %v4890_v53, 16  ;;  %v4931_v40 = vld [vmem:[%s4825_s30 + $0x78] sm:$0xf] }
  0x1d   : > { %4342 = vmatprep.mubr.msk.bf16.mxu0 %vm751_vm3, %v3736_v54  ;;  %v520_v63 = vsel %vm4874_vm4, %v515_v55, %v519_v38  ;;  %v530_v4 = vsel %vm4874_vm4, %v525_v58, %v529_v43  ;;  %v535_v13 = vshll.u32 %v4890_v53, 16  ;;  %v541_v22 = vshll.u32 %v4895_v62, 16  ;;  %6428 = vst [vmem:[#allocation6_spill] sm:$0xff] %v4931_v40  ;;  %v4939_v46 = vld [vmem:[%s6371_s1 + $0x8] sm:$0xf] }
  0x1e   : > { %v356_v5 = vor.u32 %v355_v59, %v351_v57  ;;  %v361_v12 = vrot.slane %v359_v60, 5  ;;  %v4911_v15 = vcombine.low %v520_v63, %v530_v4  ;;  %v347_v17 = vrot.slane %v346_v0, 4  ;;  %v4944_v51 = vld [vmem:[%s4825_s30 + $0x7c] sm:$0xf]  ;;  %v4949_v55 = vld [vmem:[%s4825_s30 + $0x80] sm:$0x1] }
  0x1f   : > { %v534_v21 = vrot.slane %v532_v3, 4  ;;  %v537_v24 = vrot.slane %v535_v13, 5  ;;  %v545_v26 = vshrl.u32 %v4895_v62, 16  ;;  %v551_v27 = vshll.u32 %v4902_v2, 16  ;;  %6430 = vst [vmem:[#allocation8_spill] sm:$0xff] %v4944_v51  ;;  %6431 = vst [vmem:[#allocation9_spill] sm:$0xff] %v4949_v55 }
  0x20   : > { %6427 = vst [vmem:[#allocation5_spill] sm:$0xff] %v4911_v15  ;;  %v357_v23 = vrot.slane %v356_v5, 4  ;;  %4358 = vmatprep.mubr.msk.bf16.mxu1 %vm751_vm3, %v4911_v15  ;;  %v352_v29 = vsel %vm4874_vm4, %v347_v17, %v351_v57  ;;  %v543_v30 = vrot.slane %v541_v22, 5  ;;  %v364_v32 = vshrl.u32 %v4909_v14, 16  ;;  %v4967_v22 = vld [vmem:[%s4825_s30 + $0x28] sm:$0xf] }
  0x21   : > { %v367_v33 = vshll.u32 %v4909_v14, 16  ;;  %v538_v37 = vor.u32 %v537_v24, %v534_v21  ;;  %v547_v38 = vrot.slane %v545_v26, 4  ;;  %v553_v39 = vrot.slane %v551_v27, 5  ;;  %v5078_v18 = vld [vmem:[%s4825_s30 + $0xa0] sm:$0xf] }
  0x22   : > { %v362_v36 = vsel %vm4874_vm4, %v357_v23, %v361_v12  ;;  %v366_v42 = vrot.slane %v364_v32, 4  ;;  %v373_v44 = vshll.u32 %v4917_v28, 16  ;;  %v377_v49 = vshrl.u32 %v4917_v28, 16  ;;  %v4958_v12 = vld [vmem:[%s4825_s30 + $0x24] sm:$0xf] }
  0x23   : > { %v4933_v41 = vcombine.low %v352_v29, %v362_v36  ;;  %v369_v43 = vrot.slane %v367_v33, 5  ;;  %v539_v47 = vrot.slane %v538_v37, 4  ;;  %v548_v48 = vor.u32 %v547_v38, %v543_v30  ;;  %v4974_v29 = vld [vmem:[%s4825_s30 + $0x2c] sm:$0x1]  ;;  %v5151_v2 = vld [vmem:[%s4825_s30 + $0x5c] sm:$0x1] }
  0x24   : > { %v383_v50 = vshll.u32 %v4924_v31, 16  ;;  %v375_v54 = vrot.slane %v373_v44, 5  ;;  %v556_v56 = vshrl.u32 %v4931_v40, 16  ;;  %v559_v57 = vshll.u32 %v4931_v40, 16 }
  0x25   : > { %6429 = vst [vmem:[#allocation7_spill] sm:$0xff] %v4933_v41  ;;  %4343 = vmatmul.mubr.msk.bf16.vlgmr.msra.gmra.mxu0 %vm751_vm3, %v4933_v41  ;;  %v370_v52 = vor.u32 %v369_v43, %v366_v42  ;;  %v544_v58 = vsel %vm4874_vm4, %v539_v47, %v543_v30  ;;  %v549_v59 = vrot.slane %v548_v48, 4  ;;  %v379_v60 = vrot.slane %v377_v49, 4  ;;  %v4983_v43 = vld [vmem:[%s4825_s30 + $0x84] sm:$0xf] }
  0x26   : > { %4409 = vmatpush3.bf16.msra.mxu0 %v4833_v8  ;;  %v385_v63 = vrot.slane %v383_v50, 5  ;;  %v558_v3 = vrot.slane %v556_v56, 4  ;;  %v561_v4 = vrot.slane %v559_v57, 5  ;;  %v565_v5 = vshll.u32 %v4944_v51, 16  ;;  %v4990_v50 = vld [vmem:[%s4825_s30 + $0x88] sm:$0xf] }
  0x27   : > { %v371_v0 = vrot.slane %v370_v52, 4  ;;  %4721 = vmatprep.subr.msk.bf16.mxu0 %vm800_vm0, %v4939_v46  ;;  %v554_v13 = vsel %vm4874_vm4, %v549_v59, %v553_v39  ;;  %v380_v17 = vor.u32 %v379_v60, %v375_v54  ;;  %v569_v21 = vshrl.u32 %v4944_v51, 16  ;;  %v5132_v41 = vld [vmem:[%s4825_s30 + $0xb0] sm:$0x1] }
  0x28   : > { %v575_v8 = vshll.u32 %v4949_v55, 16  ;;  %v4969_v23 = vcombine.low %v544_v58, %v554_v13  ;;  %v562_v26 = vor.u32 %v561_v4, %v558_v3  ;;  %v567_v27 = vrot.slane %v565_v5, 5  ;;  %v4997_v58 = vld [vmem:[%s4825_s30 + $0x8c] sm:$0x1]  ;;  %v5008_v13 = vld [vmem:[%s4825_s30 + $0x30] sm:$0xf] }
  0x29   : > { %v376_v24 = vsel %vm4874_vm4, %v371_v0, %v375_v54  ;;  %v381_v30 = vrot.slane %v380_v17, 4  ;;  %v571_v32 = vrot.slane %v569_v21, 4  ;;  %v388_v36 = vshrl.u32 %v4958_v12, 16  ;;  %6443 = vst [vmem:[#allocation21_spill] sm:$0xff] %v5132_v41 }
  0x2a   : > { %6432 = vst [vmem:[#allocation10_spill] sm:$0xff] %v4969_v23  ;;  %v577_v33 = vrot.slane %v575_v8, 5  ;;  %4359 = vmatmul.mubr.msk.bf16.vlgmr.msra.gmra.mxu1 %vm751_vm3, %v4969_v23  ;;  %v563_v37 = vrot.slane %v562_v26, 4  ;;  %v391_v38 = vshll.u32 %v4958_v12, 16  ;;  %v397_v39 = vshll.u32 %v4967_v22, 16 }
  0x2b   : > { %v401_v42 = vshrl.u32 %v4967_v22, 16  ;;  %4375 = vmatpush3.bf16.msra.mxu1 %v4828_v6  ;;  %v386_v44 = vsel %vm4874_vm4, %v381_v30, %v385_v63  ;;  %v572_v47 = vor.u32 %v571_v32, %v567_v27  ;;  %v390_v48 = vrot.slane %v388_v36, 4  ;;  %v5014_v26 = vld [vmem:[%s4825_s30 + $0x34] sm:$0xf] }
  0x2c   : > { %v407_v49 = vshll.u32 %v4974_v29, 16  ;;  %v4992_v52 = vcombine.low %v376_v24, %v386_v44  ;;  %v568_v54 = vsel %vm4874_vm4, %v563_v37, %v567_v27  ;;  %v393_v56 = vrot.slane %v391_v38, 5  ;;  %4720 = vmatprep.subr.msk.bf16.mxu1 %vm800_vm0, %v4830_v7 }
  0x2d   : > { %v399_v57 = vrot.slane %v397_v39, 5  ;;  %v573_v6 = vrot.slane %v572_v47, 4  ;;  %v403_v59 = vrot.slane %v401_v42, 4  ;;  %v580_v63 = vshrl.u32 %v4983_v43, 16  ;;  %v5024_v47 = vld [vmem:[%s4825_s30 + $0x38] sm:$0x1] }
  0x2e   : > { %6433 = vst [vmem:[#allocation11_spill] sm:$0xff] %v4992_v52  ;;  %v409_v60 = vrot.slane %v407_v49, 5  ;;  %4346 = vmatprep.mubr.msk.bf16.mxu0 %vm751_vm3, %v4992_v52  ;;  %v394_v0 = vor.u32 %v393_v56, %v390_v48  ;;  %v583_v3 = vshll.u32 %v4983_v43, 16  ;;  %v589_v4 = vshll.u32 %v4990_v50, 16 }
  0x2f   : > { %v593_v5 = vshrl.u32 %v4990_v50, 16  ;;  %v578_v17 = vsel %vm4874_vm4, %v573_v6, %v577_v33  ;;  %v404_v21 = vor.u32 %v403_v59, %v399_v57  ;;  %v582_v8 = vrot.slane %v580_v63, 4 }
  0x30   : > { %v599_v24 = vshll.u32 %v4997_v58, 16  ;;  %v5016_v27 = vcombine.low %v568_v54, %v578_v17  ;;  %v395_v30 = vrot.slane %v394_v0, 4  ;;  %v585_v32 = vrot.slane %v583_v3, 5  ;;  %v5029_v54 = vld [vmem:[%s4825_s30 + $0x90] sm:$0xf] }
  0x31   : > { %v591_v36 = vrot.slane %v589_v4, 5  ;;  %v405_v37 = vrot.slane %v404_v21, 4  ;;  %v595_v38 = vrot.slane %v593_v5, 4  ;;  %v412_v42 = vshrl.u32 %v5008_v13, 16  ;;  %v5035_v0 = vld [vmem:[%s4825_s30 + $0x94] sm:$0xf] }
  0x32   : > { %6434 = vst [vmem:[#allocation12_spill] sm:$0xff] %v5016_v27  ;;  %v601_v39 = vrot.slane %v599_v24, 5  ;;  %4362 = vmatprep.mubr.msk.bf16.mxu1 %vm751_vm3, %v5016_v27  ;;  %v400_v33 = vsel %vm4874_vm4, %v395_v30, %v399_v57  ;;  %v586_v44 = vor.u32 %v585_v32, %v582_v8  ;;  %v415_v48 = vshll.u32 %v5008_v13, 16  ;;  %v5046_v32 = vld [vmem:[%s4825_s30 + $0x98] sm:$0x1] }
  0x33   : > { %v421_v49 = vshll.u32 %v5014_v26, 16  ;;  %v410_v56 = vsel %vm4874_vm4, %v405_v37, %v409_v60  ;;  %v596_v6 = vor.u32 %v595_v38, %v591_v36  ;;  %v414_v59 = vrot.slane %v412_v42, 4  ;;  %v5051_v42 = vld [vmem:[%s4825_s30 + $0x3c] sm:$0xf] }
  0x34   : > { %v425_v63 = vshrl.u32 %v5014_v26, 16  ;;  %v5037_v57 = vcombine.low %v400_v33, %v410_v56  ;;  %v587_v3 = vrot.slane %v586_v44, 4  ;;  %v417_v4 = vrot.slane %v415_v48, 5  ;;  %v5056_v56 = vld [vmem:[%s4825_s30 + $0x40] sm:$0xf] }
  0x35   : > { %v423_v5 = vrot.slane %v421_v49, 5  ;;  %v597_v17 = vrot.slane %v596_v6, 4  ;;  %v431_v8 = vshll.u32 %v5024_v47, 16  ;;  %v604_v60 = vshrl.u32 %v5029_v54, 16 }
  0x36   : > { %6435 = vst [vmem:[#allocation13_spill] sm:$0xff] %v5037_v57  ;;  %v427_v21 = vrot.slane %v425_v63, 4  ;;  %4347 = vmatmul.mubr.msk.bf16.gmra.mxu0 %vm751_vm3, %v5037_v57  ;;  %v592_v24 = vsel %vm4874_vm4, %v587_v3, %v591_v36  ;;  %v418_v30 = vor.u32 %v417_v4, %v414_v59  ;;  %v607_v37 = vshll.u32 %v5029_v54, 16  ;;  %v5102_v57 = vld [vmem:[%s4825_s30 + $0x4c] sm:$0xf] }
  0x37   : > { %v613_v38 = vshll.u32 %v5035_v0, 16  ;;  %v602_v33 = vsel %vm4874_vm4, %v597_v17, %v601_v39  ;;  %v433_v48 = vrot.slane %v431_v8, 5  ;;  %v606_v49 = vrot.slane %v604_v60, 4  ;;  %v5068_v8 = vld [vmem:[%s4825_s30 + $0x44] sm:$0x1] }
  0x38   : > { %v428_v44 = vor.u32 %v427_v21, %v423_v5  ;;  %v5058_v36 = vcombine.low %v592_v24, %v602_v33  ;;  %v419_v6 = vrot.slane %v418_v30, 4  ;;  %v609_v59 = vrot.slane %v607_v37, 5  ;;  %v5073_v30 = vld [vmem:[%s4825_s30 + $0x9c] sm:$0xf] }
  0x39   : > { %v615_v63 = vrot.slane %v613_v38, 5  ;;  %v617_v4 = vshrl.u32 %v5035_v0, 16  ;;  %v623_v1 = vshll.u32 %v5046_v32, 16  ;;  %v436_v39 = vshrl.u32 %v5051_v42, 16 }
  0x3a   : > { %6436 = vst [vmem:[#allocation14_spill] sm:$0xff] %v5058_v36  ;;  %v429_v3 = vrot.slane %v428_v44, 4  ;;  %4363 = vmatmul.mubr.msk.bf16.gmra.mxu1 %vm751_vm3, %v5058_v36  ;;  %v424_v17 = vsel %vm4874_vm4, %v419_v6, %v423_v5  ;;  %v610_v21 = vor.u32 %v609_v59, %v606_v49  ;;  %v439_v60 = vshll.u32 %v5051_v42, 16 }
  0x3b   : > { %v445_v24 = vshll.u32 %v5056_v56, 16  ;;  %v619_v38 = vrot.slane %v617_v4, 4  ;;  %v625_v33 = vrot.slane %v623_v1, 5  ;;  %v438_v44 = vrot.slane %v436_v39, 4 }
  0x3c   : > { %v434_v37 = vsel %vm4874_vm4, %v429_v3, %v433_v48  ;;  %v611_v49 = vrot.slane %v610_v21, 4  ;;  %v441_v6 = vrot.slane %v439_v60, 5  ;;  %v449_v36 = vshrl.u32 %v5056_v56, 16  ;;  %v5090_v3 = vld [vmem:[%s4825_s30 + $0xa4] sm:$0x1] }
  0x3d   : > { %v5080_v5 = vcombine.low %v424_v17, %v434_v37  ;;  %v447_v59 = vrot.slane %v445_v24, 5  ;;  %v620_v61 = vor.u32 %v619_v38, %v615_v63  ;;  %v455_v27 = vshll.u32 %v5068_v8, 16  ;;  %6438 = vst [vmem:[#allocation16_spill] sm:$0xff] %v5090_v3  ;;  %v5095_v17 = vld [vmem:[%s4825_s30 + $0x48] sm:$0xf] }
  0x3e   : > { %v628_v23 = vshrl.u32 %v5073_v30, 16  ;;  %v616_v1 = vsel %vm4874_vm4, %v611_v49, %v615_v63  ;;  %v442_v48 = vor.u32 %v441_v6, %v438_v44  ;;  %v631_v4 = vshll.u32 %v5073_v30, 16 }
  0x3f   : > { %6437 = vst [vmem:[#allocation15_spill] sm:$0xff] %v5080_v5  ;;  %4350 = vmatprep.mubr.msk.bf16.mxu0 %vm751_vm3, %v5080_v5  ;;  %v637_v39 = vshll.u32 %v5078_v18, 16  ;;  %v621_v21 = vrot.slane %v620_v61, 4  ;;  %v451_v60 = vrot.slane %v449_v36, 4  ;;  %v457_v24 = vrot.slane %v455_v27, 5 }
  0x40   : > { %v630_v37 = vrot.slane %v628_v23, 4  ;;  %v443_v38 = vrot.slane %v442_v48, 4  ;;  %v633_v15 = vrot.slane %v631_v4, 5  ;;  %v641_v63 = vshrl.u32 %v5078_v18, 16  ;;  %v5110_v4 = vld [vmem:[%s4825_s30 + $0x50] sm:$0x1] }
  0x41   : > { %v639_v5 = vrot.slane %v637_v39, 5  ;;  %v626_v44 = vsel %vm4874_vm4, %v621_v21, %v625_v33  ;;  %v452_v49 = vor.u32 %v451_v60, %v447_v59  ;;  %v647_v6 = vshll.u32 %v5090_v3, 16  ;;  %v5113_v39 = vld [vmem:[%s4825_s30 + $0xa8] sm:$0xf] }
  0x42   : > { %v460_v61 = vshrl.u32 %v5095_v17, 16  ;;  %v5105_v36 = vcombine.low %v616_v1, %v626_v44  ;;  %v448_v23 = vsel %vm4874_vm4, %v443_v38, %v447_v59  ;;  %v634_v27 = vor.u32 %v633_v15, %v630_v37  ;;  %6440 = vst [vmem:[#allocation18_spill] sm:$0xff] %v5113_v39 }
  0x43   : > { %v643_v48 = vrot.slane %v641_v63, 4  ;;  %v453_v33 = vrot.slane %v452_v49, 4  ;;  %v649_v21 = vrot.slane %v647_v6, 5  ;;  %v463_v52 = vshll.u32 %v5095_v17, 16  ;;  %v5124_v49 = vld [vmem:[%s4825_s30 + $0xac] sm:$0xf] }
  0x44   : > { %6439 = vst [vmem:[#allocation17_spill] sm:$0xff] %v5105_v36  ;;  %v462_v60 = vrot.slane %v460_v61, 4  ;;  %4366 = vmatprep.mubr.msk.bf16.mxu1 %vm751_vm3, %v5105_v36  ;;  %v635_v1 = vrot.slane %v634_v27, 4  ;;  %v469_v59 = vshll.u32 %v5102_v57, 16  ;;  %v473_v15 = vshrl.u32 %v5102_v57, 16  ;;  %6441 = vst [vmem:[#allocation19_spill] sm:$0xff] %v5124_v49 }
  0x45   : > { %v644_v44 = vor.u32 %v643_v48, %v639_v5  ;;  %v458_v37 = vsel %vm4874_vm4, %v453_v33, %v457_v24  ;;  %v465_v38 = vrot.slane %v463_v52, 5  ;;  %v479_v63 = vshll.u32 %v5110_v4, 16  ;;  %v5135_v33 = vld [vmem:[%s4825_s30 + $0x54] sm:$0xf] }
  0x46   : > { %v652_v6 = vshrl.u32 %v5113_v39, 16  ;;  %v5127_v61 = vcombine.low %v448_v23, %v458_v37  ;;  %v640_v27 = vsel %vm4874_vm4, %v635_v1, %v639_v5  ;;  %v471_v36 = vrot.slane %v469_v59, 5 }
  0x47   : > { %v645_v48 = vrot.slane %v644_v44, 4  ;;  %v466_v55 = vor.u32 %v465_v38, %v462_v60  ;;  %v475_v40 = vrot.slane %v473_v15, 4  ;;  %v481_v24 = vrot.slane %v479_v63, 5  ;;  %v5148_v38 = vld [vmem:[%s4825_s30 + $0x58] sm:$0xf] }
  0x48   : > { %6442 = vst [vmem:[#allocation20_spill] sm:$0xff] %v5127_v61  ;;  %v654_v52 = vrot.slane %v652_v6, 4  ;;  %4351 = vmatmul.mubr.msk.bf16.gmra.mxu0 %vm751_vm3, %v5127_v61  ;;  %v655_v23 = vshll.u32 %v5113_v39, 16  ;;  %v661_v1 = vshll.u32 %v5124_v49, 16  ;;  %v665_v60 = vshrl.u32 %v5124_v49, 16 }
  0x49   : > { %v650_v5 = vsel %vm4874_vm4, %v645_v48, %v649_v21  ;;  %v467_v59 = vrot.slane %v466_v55, 4  ;;  %v476_v15 = vor.u32 %v475_v40, %v471_v36  ;;  %v671_v37 = vshll.u32 %v5132_v41, 16  ;;  %v5173_v49 = vld [vmem:[%s4825_s30 + $0xbc] sm:$0x1] }
  0x4a   : > { %v5144_v44 = vcombine.low %v640_v27, %v650_v5  ;;  %v657_v63 = vrot.slane %v655_v23, 5  ;;  %v663_v6 = vrot.slane %v661_v1, 5  ;;  %v667_v61 = vrot.slane %v665_v60, 4  ;;  %v5161_v60 = vld [vmem:[%s4825_s30 + $0xb4] sm:$0xf] }
  0x4b   : > { %v484_v21 = vshrl.u32 %v5135_v33, 16  ;;  %v472_v55 = vsel %vm4874_vm4, %v467_v59, %v471_v36  ;;  %v477_v40 = vrot.slane %v476_v15, 4  ;;  %v673_v27 = vrot.slane %v671_v37, 5  ;;  %v5168_v59 = vld [vmem:[%s4825_s30 + $0xb8] sm:$0xf] }
  0x4c   : > { %6444 = vst [vmem:[#allocation22_spill] sm:$0xff] %v5144_v44  ;;  %4367 = vmatmul.mubr.msk.bf16.gmra.mxu1 %vm751_vm3, %v5144_v44  ;;  %v487_v48 = vshll.u32 %v5135_v33, 16  ;;  %v658_v5 = vor.u32 %v657_v63, %v654_v52  ;;  %v668_v53 = vor.u32 %v667_v61, %v663_v6  ;;  %v493_v1 = vshll.u32 %v5148_v38, 16 }
  0x4d   : > { %v486_v23 = vrot.slane %v484_v21, 4  ;;  %v482_v51 = vsel %vm4874_vm4, %v477_v40, %v481_v24  ;;  %v497_v44 = vshrl.u32 %v5148_v38, 16  ;;  %v503_v36 = vshll.u32 %v5151_v2, 16 }
  0x4e   : > { %v489_v41 = vrot.slane %v487_v48, 5  ;;  %v5170_v15 = vcombine.low %v472_v55, %v482_v51  ;;  %v659_v52 = vrot.slane %v658_v5, 4  ;;  %v669_v61 = vrot.slane %v668_v53, 4 }
  0x4f   : > { %v495_v37 = vrot.slane %v493_v1, 5  ;;  %v499_v21 = vrot.slane %v497_v44, 4  ;;  %v505_v39 = vrot.slane %v503_v36, 5  ;;  %v676_v3 = vshrl.u32 %v5161_v60, 16 }
  0x50   : > { %6445 = vst [vmem:[#allocation23_spill] sm:$0xff] %v5170_v15  ;;  %v490_v63 = vor.u32 %v489_v41, %v486_v23  ;;  %4354 = vmatprep.mubr.msk.bf16.mxu0 %vm751_vm3, %v5170_v15  ;;  %v664_v24 = vsel %vm4874_vm4, %v659_v52, %v663_v6  ;;  %v674_v51 = vsel %vm4874_vm4, %v669_v61, %v673_v27  ;;  %v679_v55 = vshll.u32 %v5161_v60, 16 }
  0x51   : > { %v685_v53 = vshll.u32 %v5168_v59, 16  ;;  %v5184_v41 = vcombine.low %v664_v24, %v674_v51  ;;  %v500_v40 = vor.u32 %v499_v21, %v495_v37  ;;  %v678_v48 = vrot.slane %v676_v3, 4 }
  0x52   : > { %v491_v44 = vrot.slane %v490_v63, 4  ;;  %v681_v5 = vrot.slane %v679_v55, 5  ;;  %v689_v1 = vshrl.u32 %v5168_v59, 16  ;;  %v695_v36 = vshll.u32 %v5173_v49, 16 }
  0x53   : > { %6446 = vst [vmem:[#allocation24_spill] sm:$0xff] %v5184_v41  ;;  %v687_v23 = vrot.slane %v685_v53, 5  ;;  %4370 = vmatprep.mubr.msk.bf16.mxu1 %vm751_vm3, %v5184_v41  ;;  %v501_v52 = vrot.slane %v500_v40, 4  ;;  %v3801_v3 = vrot.slane %v4836_v9, 9  ;;  %v1278_v61 = vrot.slane %v4839_v10, 5 }
  0x54   : > { %v496_v27 = vsel %vm4874_vm4, %v491_v44, %v495_v37  ;;  %v682_v63 = vor.u32 %v681_v5, %v678_v48  ;;  %v691_v21 = vrot.slane %v689_v1, 4  ;;  %v697_v24 = vrot.slane %v695_v36, 5 }
  0x55   : > { %v5202_v51 = vcombine.low %v4862_v25, %v4870_v34  ;;  %v506_v55 = vsel %vm4874_vm4, %v501_v52, %v505_v39  ;;  %v1279_v53 = vsel %vm5190_vm7, %v3801_v3, %v1278_v61  ;;  %v1280_v41 = vrot.slane %v1278_v61, 4 }
  0x56   : > { %v3802_v37 = vrot.slane %v4862_v25, 9  ;;  %v5209_v44 = vcombine.low %v496_v27, %v506_v55  ;;  %v683_v40 = vrot.slane %v682_v63, 4  ;;  %v692_v15 = vor.u32 %v691_v21, %v687_v23 }
  0x57   : > { %v6449_v48 = vrot.slane %v4870_v34, 5  ;;  %v6450_v1 = vrot.slane %v4842_v11, 5  ;;  %v5223_v25 = vcombine.low %v4909_v14, %v4917_v28  ;;  %v3803_v27 = vrot.slane %v4909_v14, 9 }
  0x58   : > { %4355 = vmatmul.mubr.msk.bf16.gmra.mxu0 %vm751_vm3, %v5209_v44  ;;  %v688_v11 = vsel %vm4874_vm4, %v683_v40, %v687_v23  ;;  %v693_v3 = vrot.slane %v692_v15, 4  ;;  %v1292_v21 = vrot.slane %v4917_v28, 5  ;;  %v1295_v55 = vrot.slane %v4924_v31, 5 }
  0x59   : > { %v1287_v5 = vrot.slane %v6449_v48, 4  ;;  %v1282_v36 = vsel %vm5190_vm7, %v1280_v41, %v6450_v1  ;;  %v6451_v39 = vmov %v6449_v48  ;;  %v6452_v41 = vrot.slane %v4880_v45, 5 }
  0x5a   : > { %v1286_v52 = vsel %vm5190_vm7, %v3802_v37, %v6451_v39  ;;  %v3817_v61 = vcombine.low %v1279_v53, %v1282_v36  ;;  %v5240_v14 = vcombine.low %v4958_v12, %v4967_v22  ;;  %v698_v23 = vsel %vm4874_vm4, %v693_v3, %v697_v24 }
  0x5b   : > { %v1289_v34 = vsel %vm5190_vm7, %v1287_v5, %v6452_v41  ;;  %v3769_v15 = vcombine.low %v4836_v9, %v4839_v10  ;;  %v1299_v45 = vrot.slane %v4967_v22, 5  ;;  %v5248_v53 = vcombine.low %v688_v11, %v698_v23 }
  0x5c   : > { %v5234_v63 = vcombine.low %v1286_v52, %v1289_v34  ;;  %4410 = vmatprep.mubr.msk.bf16.mxu0 %vm751_vm3, %v3817_v61  ;;  %v1293_v28 = vsel %vm5190_vm7, %v3803_v27, %v1292_v21  ;;  %v1294_v31 = vrot.slane %v1292_v21, 4  ;;  %v3886_v37 = vcombine.low %v4939_v46, %v4939_v46  ;;  %v5272_v52 = vld [vmem:[%s6371_s1 + $0xc] sm:$0xf] }
  0x5d   : > { %v1919_v40 = vsel %vm800_vm0, %v4939_v46, 0  ;;  %v1306_v24 = vrot.slane %v5014_v26, 5  ;;  %4371 = vmatmul.mubr.msk.bf16.gmra.mxu1 %vm751_vm3, %v5248_v53  ;;  %v3804_v10 = vrot.slane %v4958_v12, 9  ;;  %v1301_v22 = vrot.slane %v1299_v45, 4 }
  0x5e   : > { %v1296_v9 = vsel %vm5190_vm7, %v1294_v31, %v1295_v55  ;;  %v1302_v48 = vrot.slane %v4974_v29, 5  ;;  %4376 = vmatprep.mubr.msk.bf16.mxu1 %vm751_vm3, %v3769_v15  ;;  %v3805_v1 = vrot.slane %v5008_v13, 9  ;;  %v1309_v36 = vrot.slane %v5024_v47, 5 }
  0x5f   : > { %v5264_v5 = vcombine.low %v1293_v28, %v1296_v9  ;;  %v1308_v46 = vrot.slane %v1306_v24, 4  ;;  %v1313_v39 = vrot.slane %v5056_v56, 5  ;;  %v5276_v12 = vrot.slane %v3886_v37, 2 }
  0x60   : > { %4411 = vmatmul.mubr.msk.bf16.vlgmr.msra.gmra.mxu0 %vm751_vm3, %v5234_v63  ;;  %v1320_v29 = vrot.slane %v5102_v57, 5  ;;  %v1693_v27 = vsel %vm800_vm0, %v4830_v7, 0  ;;  %v1300_v47 = vsel %vm5190_vm7, %v3804_v10, %v1299_v45  ;;  %v1303_v11 = vsel %vm5190_vm7, %v1301_v22, %v1302_v48 }
  0x61   : > { %4477 = vmatpush3.bf16.msra.mxu0 %v1919_v40  ;;  %4414 = vmatprep.mubr.msk.bf16.mxu0 %vm751_vm3, %v5264_v5  ;;  %v3806_v3 = vrot.slane %v5051_v42, 9  ;;  %v1307_v61 = vsel %vm5190_vm7, %v3805_v1, %v1306_v24  ;;  %v1310_v41 = vsel %vm5190_vm7, %v1308_v46, %v1309_v36  ;;  %v1316_v7 = vrot.slane %v5068_v8, 5 }
  0x62   : > { %v3807_v34 = vrot.slane %v5095_v17, 9  ;;  %4723 = vmatprep.subr.msk.bf16.mxu0 %vm800_vm0, %v5272_v52  ;;  %v1315_v21 = vrot.slane %v1313_v39, 4  ;;  %v1322_v55 = vrot.slane %v1320_v29, 4  ;;  %v1323_v23 = vrot.slane %v5110_v4, 5 }
  0x63   : > { %v1327_v15 = vrot.slane %v5148_v38, 5  ;;  %v5298_v45 = vcombine.low %v1300_v47, %v1303_v11  ;;  %v5302_v28 = vcombine.low %v1307_v61, %v1310_v41  ;;  %v1314_v8 = vsel %vm5190_vm7, %v3806_v3, %v1313_v39 }
  0x64   : > { %v1321_v31 = vsel %vm5190_vm7, %v3807_v34, %v1320_v29  ;;  %v3808_v4 = vrot.slane %v5135_v33, 9  ;;  %v1317_v37 = vsel %vm5190_vm7, %v1315_v21, %v1316_v7  ;;  %v1324_v40 = vsel %vm5190_vm7, %v1322_v55, %v1323_v23  ;;  %v6453_v7 = vld [vmem:[#allocation16_spill] sm:$0xff]  ;;  %v6454_v21 = vld [vmem:[#allocation19_spill] sm:$0xff]  ;;  %v6455_v55 = vld [vmem:[#allocation18_spill] sm:$0xff] }
  0x65   : > { %4377 = vmatmul.mubr.msk.bf16.vlgmr.msra.gmra.mxu1 %vm751_vm3, %v5202_v51  ;;  %v1329_v24 = vrot.slane %v1327_v15, 4  ;;  %v1330_v9 = vrot.slane %v5151_v2, 5  ;;  %v5322_v10 = vcombine.low %v5008_v13, %v5014_v26  ;;  %v5326_v22 = vcombine.low %v5051_v42, %v5056_v56 }
  0x66   : > { %4443 = vmatpush3.bf16.msra.mxu1 %v1693_v27  ;;  %4380 = vmatprep.mubr.msk.bf16.mxu1 %vm751_vm3, %v5223_v25  ;;  %v5330_v48 = vcombine.low %v5095_v17, %v5102_v57  ;;  %v3809_v2 = vrot.slane %v4851_v16, 9  ;;  %v1334_v1 = vrot.slane %v4856_v19, 5  ;;  %v5338_v46 = vcombine.low %v4983_v43, %v4990_v50 }
  0x67   : > { %4722 = vmatprep.subr.msk.bf16.mxu1 %vm800_vm0, %v5276_v12  ;;  %v3812_v13 = vrot.slane %v4983_v43, 9  ;;  %v5341_v26 = vcombine.low %v1314_v8, %v1317_v37  ;;  %v5343_v42 = vcombine.low %v1321_v31, %v1324_v40  ;;  %v1328_v57 = vsel %vm5190_vm7, %v3808_v4, %v1327_v15  ;;  %v6456_v40 = vld [vmem:[#allocation21_spill] sm:$0xff] }
  0x68   : > { %4415 = vmatmul.mubr.msk.bf16.gmra.mxu0 %vm751_vm3, %v5298_v45  ;;  %v1337_v56 = vrot.slane %v4859_v20, 5  ;;  %v1331_v17 = vsel %vm5190_vm7, %v1329_v24, %v1330_v9  ;;  %v1355_v36 = vrot.slane %v4990_v50, 5  ;;  %v1358_v39 = vrot.slane %v4997_v58, 5 }
  0x69   : > { %4418 = vmatprep.mubr.msk.bf16.mxu0 %vm751_vm3, %v5302_v28  ;;  %v5354_v29 = vcombine.low %v5029_v54, %v5035_v0  ;;  %v1341_v43 = vrot.slane %v4895_v62, 5  ;;  %v3813_v27 = vrot.slane %v5029_v54, 9  ;;  %v1362_v47 = vrot.slane %v5035_v0, 5 }
  0x6a   : > { %v1365_v11 = vrot.slane %v5046_v32, 5  ;;  %v1336_v20 = vrot.slane %v1334_v1, 4  ;;  %v1356_v50 = vsel %vm5190_vm7, %v3812_v13, %v1355_v36  ;;  %v1357_v58 = vrot.slane %v1355_v36, 4 }
  0x6b   : > { %v5366_v3 = vcombine.low %v5073_v30, %v5078_v18  ;;  %v1363_v54 = vsel %vm5190_vm7, %v3813_v27, %v1362_v47  ;;  %v1364_v0 = vrot.slane %v1362_v47, 4  ;;  %v3814_v32 = vrot.slane %v5073_v30, 9 }
  0x6c   : > { %v1369_v61 = vrot.slane %v5078_v18, 5  ;;  %v1359_v41 = vsel %vm5190_vm7, %v1357_v58, %v1358_v39  ;;  %v1372_v34 = vrot.slane %v6453_v7, 5  ;;  %v5379_v23 = vcombine.low %v6455_v55, %v6454_v21  ;;  %v6457_v39 = vld [vmem:[#allocation8_spill] sm:$0xff] }
  0x6d   : > { %4381 = vmatmul.mubr.msk.bf16.gmra.mxu1 %vm751_vm3, %v5240_v14  ;;  %v3815_v15 = vrot.slane %v6455_v55, 9  ;;  %v5384_v8 = vcombine.low %v1356_v50, %v1359_v41  ;;  %v1366_v30 = vsel %vm5190_vm7, %v1364_v0, %v1365_v11  ;;  %v1376_v37 = vrot.slane %v6454_v21, 5  ;;  %v6458_v0 = vld [vmem:[#allocation3_spill] sm:$0xff]  ;;  %v6460_v41 = vld [vmem:[#allocation6_spill] sm:$0xff] }
  0x6e   : > { %4384 = vmatprep.mubr.msk.bf16.mxu1 %vm751_vm3, %v5322_v10  ;;  %v1370_v18 = vsel %vm5190_vm7, %v3814_v32, %v1369_v61  ;;  %v1371_v31 = vrot.slane %v1369_v61, 4  ;;  %v5392_v4 = vcombine.low %v1363_v54, %v1366_v30  ;;  %v1379_v24 = vrot.slane %v6456_v40, 5 }
  0x6f   : > { %v5398_v9 = vcombine.low %v5161_v60, %v5168_v59  ;;  %v1335_v13 = vsel %vm5190_vm7, %v3809_v2, %v1334_v1  ;;  %v1338_v36 = vsel %vm5190_vm7, %v1336_v20, %v1337_v56  ;;  %v1348_v27 = vrot.slane %v6457_v39, 5  ;;  %v6459_v56 = vld [vmem:[#allocation4_spill] sm:$0xff] }
  0x70   : > { %4419 = vmatmul.mubr.msk.bf16.gmra.mxu0 %vm751_vm3, %v5341_v26  ;;  %v1373_v47 = vsel %vm5190_vm7, %v1371_v31, %v1372_v34  ;;  %v1377_v50 = vsel %vm5190_vm7, %v3815_v15, %v1376_v37  ;;  %v1378_v58 = vrot.slane %v1376_v37, 4  ;;  %v5411_v54 = vcombine.low %v1328_v57, %v1331_v17  ;;  %v6461_v17 = vld [vmem:[#allocation9_spill] sm:$0xff] }
  0x71   : > { %4422 = vmatprep.mubr.msk.bf16.mxu0 %vm751_vm3, %v5343_v42  ;;  %v5407_v11 = vcombine.low %v1370_v18, %v1373_v47  ;;  %v3810_v32 = vrot.slane %v6458_v0, 9  ;;  %v5416_v2 = vcombine.low %v1335_v13, %v1338_v36  ;;  %v1343_v1 = vrot.slane %v1341_v43, 4 }
  0x72   : > { %v1344_v20 = vrot.slane %v6459_v56, 5  ;;  %v1380_v61 = vsel %vm5190_vm7, %v1378_v58, %v1379_v24  ;;  %v3811_v7 = vrot.slane %v6460_v41, 9  ;;  %v1350_v57 = vrot.slane %v1348_v27, 4 }
  0x73   : > { %v1351_v34 = vrot.slane %v6461_v17, 5  ;;  %v5425_v21 = vcombine.low %v1377_v50, %v1380_v61  ;;  %v5431_v55 = vcombine.low %v5135_v33, %v5148_v38  ;;  %v1342_v15 = vsel %vm5190_vm7, %v3810_v32, %v1341_v43 }
  0x74   : > { %v1345_v30 = vsel %vm5190_vm7, %v1343_v1, %v1344_v20  ;;  %v5441_v18 = vcombine.low %v4851_v16, %v4856_v19  ;;  %v1349_v31 = vsel %vm5190_vm7, %v3811_v7, %v1348_v27  ;;  %v5459_v16 = vcombine.low %v6458_v0, %v4895_v62  ;;  %v303_v27 = vld [vmem:[%s4825_s30 + $0xc8] sm:$0x1] }
  0x75   : > { %4385 = vmatmul.mubr.msk.bf16.gmra.mxu1 %vm751_vm3, %v5326_v22  ;;  %v1352_v33 = vsel %vm5190_vm7, %v1350_v57, %v1351_v34  ;;  %v5447_v38 = vcombine.low %v1342_v15, %v1345_v30  ;;  %v5465_v19 = vcombine.low %v6460_v41, %v6457_v39  ;;  %v1383_v62 = vrot.slane %v5168_v59, 5  ;;  %v5501_v39 = vld [vmem:[%s4825_s30 + $0xc0] sm:$0xf]  ;;  %v6462_v0 = vld [vmem:[#allocation7_spill] sm:$0xff]  ;;  %v311_v41 = vld [vmem:[%s6371_s1 + $0x10] sm:$0x3] }
  0x76   : > { %4388 = vmatprep.mubr.msk.bf16.mxu1 %vm751_vm3, %v5330_v48  ;;  %v5451_v37 = vcombine.low %v1349_v31, %v1352_v33  ;;  %v3816_v43 = vrot.slane %v5161_v60, 9  ;;  %v1386_v24 = vrot.slane %v5173_v49, 5  ;;  %v5495_v49 = vld [vmem:[%s4825_s30 + $0xc4] sm:$0xf]  ;;  %v3884_v47 = vrot.slane %v5501_v39, 9  ;;  %v6463_v7 = vld [vmem:[#allocation11_spill] sm:$0xff] }
  0x77   : > { %v1385_v40 = vrot.slane %v1383_v62, 4  ;;  %v2117_v60 = vrot.slane %v5495_v49, 5  ;;  %v2120_v58 = vrot.slane %v303_v27, 5  ;;  %v2337_v20 = vsel %vm800_vm0, %v5272_v52, 0  ;;  %v6464_v57 = vld [vmem:[#allocation13_spill] sm:$0xff]  ;;  %v6466_v34 = vld [vmem:[#allocation20_spill] sm:$0xff] }
  0x78   : > { %4423 = vmatmul.mubr.msk.bf16.gmra.mxu0 %vm751_vm3, %v5411_v54  ;;  %v1384_v59 = vsel %vm5190_vm7, %v3816_v43, %v1383_v62  ;;  %v3921_v61 = vcombine.low %v5272_v52, %v5272_v52  ;;  %v6465_v52 = vld [vmem:[#allocation15_spill] sm:$0xff]  ;;  %v6468_v15 = vld [vmem:[#allocation5_spill] sm:$0xff]  ;;  %v6469_v30 = vld [vmem:[#allocation10_spill] sm:$0xff]  ;;  %v1889_v62 = vshrl.u32 %v5501_v39, 16  ;;  %v1892_v43 = vshll.u32 %v5501_v39, 16 }
  0x79   : > { %4426 = vmatprep.mubr.msk.bf16.mxu0 %vm751_vm3, %v5416_v2  ;;  %v1387_v13 = vsel %vm5190_vm7, %v1385_v40, %v1386_v24  ;;  %v2119_v50 = vrot.slane %v2117_v60, 4  ;;  %v2118_v32 = vsel %vm5190_vm7, %v3884_v47, %v2117_v60  ;;  %v6470_v31 = vld [vmem:[#allocation12_spill] sm:$0xff]  ;;  %v6471_v33 = vld [vmem:[#allocation14_spill] sm:$0xff]  ;;  %v1902_v40 = vshrl.u32 %v5495_v49, 16 }
  0x7a   : > { %v5490_v36 = vcombine.low %v1384_v59, %v1387_v13  ;;  %v2562_v17 = vrot.slane %v3921_v61, 2  ;;  %v1898_v24 = vshll.u32 %v5495_v49, 16  ;;  %v1891_v59 = vrot.slane %v1889_v62, 4 }
  0x7b   : > { %v2121_v1 = vsel %vm5190_vm7, %v2119_v50, %v2120_v58  ;;  %v1894_v13 = vrot.slane %v1892_v43, 5  ;;  %v1904_v47 = vrot.slane %v1902_v40, 4  ;;  %v6472_v50 = vld [vmem:[#allocation17_spill] sm:$0xff]  ;;  %v6473_v58 = vld [vmem:[#allocation22_spill] sm:$0xff]  ;;  %v6474_v43 = vld [vmem:[#allocation24_spill] sm:$0xff] }
  0x7c   : > { %v5513_v56 = vcombine.low %v2118_v32, %v2121_v1  ;;  %v1900_v60 = vrot.slane %v1898_v24, 5 }
  0x7d   : > { %4389 = vmatmul.mubr.msk.bf16.gmra.mxu1 %vm751_vm3, %v5431_v55  ;;  %v1895_v32 = vor.u32 %v1894_v13, %v1891_v59  ;;  %v3849_v59 = vcombine.low %v5501_v39, %v5495_v49  ;;  %v2777_v13 = vsel %vm800_vm0, %v311_v41, 0 }
  0x7e   : > { %4392 = vmatprep.mubr.msk.bf16.mxu1 %vm751_vm3, %v5441_v18  ;;  %v1905_v1 = vor.u32 %v1904_v47, %v1900_v60 }
  0x7f   : > { %v1896_v61 = vrot.slane %v1895_v32, 4 }
  0x80   : > { %4427 = vmatmul.mubr.msk.bf16.gmra.mxu0 %vm751_vm3, %v5447_v38 }
  0x81   : > { %4430 = vmatprep.mubr.msk.bf16.mxu0 %vm751_vm3, %v5451_v37  ;;  %v1901_v40 = vsel %vm4874_vm4, %v1896_v61, %v1900_v60  ;;  %v2567_v60 = vsel %vm800_vm0, %v2562_v17, 0  ;;  %v5704_v61 = vld [vmem:[%s4825_s30 + $0xd0] sm:$0xf] }
  0x85   : > { %4393 = vmatmul.mubr.msk.bf16.gmra.mxu1 %vm751_vm3, %v5459_v16 }
  0x86   : > { %4396 = vmatprep.mubr.msk.bf16.mxu1 %vm751_vm3, %v5465_v19 }
  0x88   : > { %4431 = vmatmul.mubr.msk.bf16.gmra.mxu0 %vm751_vm3, %v5384_v8 }
  0x89   : > { %4434 = vmatprep.mubr.msk.bf16.mxu0 %vm751_vm3, %v5392_v4 }
  0x8d   : > { %4397 = vmatmul.mubr.msk.bf16.gmra.mxu1 %vm751_vm3, %v5338_v46 }
  0x8e   : > { %4400 = vmatprep.mubr.msk.bf16.mxu1 %vm751_vm3, %v5354_v29 }
  0x90   : > { %4435 = vmatmul.mubr.msk.bf16.gmra.mxu0 %vm751_vm3, %v5407_v11 }
  0x91   : > { %4438 = vmatprep.mubr.msk.bf16.mxu0 %vm751_vm3, %v5425_v21 }
  0x95   : > { %4401 = vmatmul.mubr.msk.bf16.gmra.mxu1 %vm751_vm3, %v5366_v3 }
  0x96   : > { %4404 = vmatprep.mubr.msk.bf16.mxu1 %vm751_vm3, %v5379_v23 }
  0x98   : > { %4439 = vmatmul.mubr.msk.bf16.gmra.mxu0 %vm751_vm3, %v5490_v36 }
  0x99   : > { %4478 = vmatprep.mubr.msk.bf16.mxu0 %vm751_vm3, %v6462_v0 }
  0x9d   : > { %4405 = vmatmul.mubr.msk.bf16.gmra.mxu1 %vm751_vm3, %v5398_v9 }
  0x9e   : > { %4444 = vmatprep.mubr.msk.bf16.mxu1 %vm751_vm3, %v5202_v51  ;;  %v2133_v51 = vsel %vm800_vm0, %v5276_v12, 0  ;;  %v6467_v12 = vld [vmem:[#allocation23_spill] sm:$0xff] }
  0xa0   : > { %4479 = vmatmul.mubr.msk.bf16.vlgmr.msra.gmra.mxu0 %vm751_vm3, %v6463_v7 }
  0xa1   : > { %4545 = vmatpush3.bf16.msra.mxu0 %v2337_v20  ;;  %4482 = vmatprep.mubr.msk.bf16.mxu0 %vm751_vm3, %v6464_v57  ;;  %v1908_v20 = vshll.u32 %v303_v27, 16 }
  0xa2   : > { %4725 = vmatprep.subr.msk.bf16.mxu0 %vm800_vm0, %v311_v41 }
  0xa3   : > { %v1910_v62 = vrot.slane %v1908_v20, 5 }
  0xa5   : > { %4445 = vmatmul.mubr.msk.bf16.vlgmr.msra.gmra.mxu1 %vm751_vm3, %v5223_v25 }
  0xa6   : > { %4511 = vmatpush3.bf16.msra.mxu1 %v2133_v51  ;;  %4448 = vmatprep.mubr.msk.bf16.mxu1 %vm751_vm3, %v5240_v14  ;;  %v1906_v51 = vrot.slane %v1905_v1, 4 }
  0xa7   : > { %4724 = vmatprep.subr.msk.bf16.mxu1 %vm800_vm0, %v2562_v17 }
  0xa8   : > { %4483 = vmatmul.mubr.msk.bf16.gmra.mxu0 %vm751_vm3, %v6465_v52  ;;  %v1911_v27 = vsel %vm4874_vm4, %v1906_v51, %v1910_v62 }
  0xa9   : > { %4486 = vmatprep.mubr.msk.bf16.mxu0 %vm751_vm3, %v6466_v34  ;;  %v5590_v24 = vcombine.low %v1901_v40, %v1911_v27 }
  0xad   : > { %4449 = vmatmul.mubr.msk.bf16.gmra.mxu1 %vm751_vm3, %v5322_v10 }
  0xae   : > { %4452 = vmatprep.mubr.msk.bf16.mxu1 %vm751_vm3, %v5326_v22 }
  0xb0   : > { %4487 = vmatmul.mubr.msk.bf16.gmra.mxu0 %vm751_vm3, %v6467_v12 }
  0xb1   : > { %4490 = vmatprep.mubr.msk.bf16.mxu0 %vm751_vm3, %v5209_v44 }
  0xb5   : > { %4453 = vmatmul.mubr.msk.bf16.gmra.mxu1 %vm751_vm3, %v5330_v48 }
  0xb6   : > { %4456 = vmatprep.mubr.msk.bf16.mxu1 %vm751_vm3, %v5431_v55 }
  0xb8   : > { %4491 = vmatmul.mubr.msk.bf16.gmra.mxu0 %vm751_vm3, %v6468_v15 }
  0xb9   : > { %4494 = vmatprep.mubr.msk.bf16.mxu0 %vm751_vm3, %v6469_v30 }
  0xbd   : > { %4457 = vmatmul.mubr.msk.bf16.gmra.mxu1 %vm751_vm3, %v5441_v18 }
  0xbe   : > { %4460 = vmatprep.mubr.msk.bf16.mxu1 %vm751_vm3, %v5459_v16 }
  0xc0   : > { %4495 = vmatmul.mubr.msk.bf16.gmra.mxu0 %vm751_vm3, %v6470_v31 }
  0xc1   : > { %4498 = vmatprep.mubr.msk.bf16.mxu0 %vm751_vm3, %v6471_v33 }
  0xc5   : > { %4461 = vmatmul.mubr.msk.bf16.gmra.mxu1 %vm751_vm3, %v5465_v19 }
  0xc6   : > { %4464 = vmatprep.mubr.msk.bf16.mxu1 %vm751_vm3, %v5338_v46 }
  0xc8   : > { %4499 = vmatmul.mubr.msk.bf16.gmra.mxu0 %vm751_vm3, %v6472_v50 }
  0xc9   : > { %4502 = vmatprep.mubr.msk.bf16.mxu0 %vm751_vm3, %v6473_v58 }
  0xcd   : > { %4465 = vmatmul.mubr.msk.bf16.gmra.mxu1 %vm751_vm3, %v5354_v29 }
  0xce   : > { %4468 = vmatprep.mubr.msk.bf16.mxu1 %vm751_vm3, %v5366_v3 }
  0xd0   : > { %4503 = vmatmul.mubr.msk.bf16.gmra.mxu0 %vm751_vm3, %v6474_v43 }
  0xd1   : > { %4506 = vmatprep.mubr.msk.bf16.mxu0 %vm751_vm3, %v5248_v53 }
  0xd5   : > { %4469 = vmatmul.mubr.msk.bf16.gmra.mxu1 %vm751_vm3, %v5379_v23 }
  0xd6   : > { %4472 = vmatprep.mubr.msk.bf16.mxu1 %vm751_vm3, %v5398_v9 }
  0xd8   : > { %4507 = vmatmul.mubr.msk.bf16.gmra.mxu0 %vm751_vm3, %v5590_v24 }
  0xd9   : > { %4546 = vmatprep.mubr.msk.bf16.mxu0 %vm751_vm3, %v5223_v25 }
  0xdd   : > { %4473 = vmatmul.mubr.msk.bf16.gmra.mxu1 %vm751_vm3, %v3849_v59 }
  0xde   : > { %4512 = vmatprep.mubr.msk.bf16.mxu1 %vm751_vm3, %v5234_v63 }
  0xe0   : > { %4547 = vmatmul.mubr.msk.bf16.vlgmr.msra.gmra.mxu0 %vm751_vm3, %v5240_v14 }
  0xe1   : > { %4613 = vmatpush3.bf16.msra.mxu0 %v2777_v13  ;;  %4550 = vmatprep.mubr.msk.bf16.mxu0 %vm751_vm3, %v5322_v10 }
  0xe5   : > { %4513 = vmatmul.mubr.msk.bf16.vlgmr.msra.gmra.mxu1 %vm751_vm3, %v5264_v5  ;;  %v5617_v25 = vpop.f32.mrf.mxu0 }
  0xe6   : > { %4579 = vmatpush3.bf16.msra.mxu1 %v2567_v60  ;;  %4516 = vmatprep.mubr.msk.bf16.mxu1 %vm751_vm3, %v5298_v45 }
  0xe7   : > { %v5621_v63 = vpop.f32.mrf.mxu0 }
  0xe8   : > { %4551 = vmatmul.mubr.msk.bf16.gmra.mxu0 %vm751_vm3, %v5326_v22 }
  0xe9   : > { %4554 = vmatprep.mubr.msk.bf16.mxu0 %vm751_vm3, %v5330_v48  ;;  %v5631_v10 = vpop.f32.mrf.mxu0 }
  0xea   : > { %v5625_v14 = vpop.f32.mrf.mxu1 }
  0xeb   : > { %v5637_v48 = vpop.f32.mrf.mxu0 }
  0xec   : > { %v5635_v22 = vpop.f32.mrf.mxu1 }
  0xed   : > { %4517 = vmatmul.mubr.msk.bf16.gmra.mxu1 %vm751_vm3, %v5302_v28 }
  0xee   : > { %4520 = vmatprep.mubr.msk.bf16.mxu1 %vm751_vm3, %v5341_v26  ;;  %v5641_v49 = vpop.f32.mrf.mxu1 }
  0xf0   : > { %4555 = vmatmul.mubr.msk.bf16.gmra.mxu0 %vm751_vm3, %v5431_v55 }
  0xf1   : > { %4558 = vmatprep.mubr.msk.bf16.mxu0 %vm751_vm3, %v5441_v18  ;;  %v5651_v18 = vpop.f32.mrf.mxu1 }
  0xf2   : > { %6475 = vst [vmem:[#allocation16_spill] sm:$0xff] %v5651_v18 }
  0xf5   : > { %4521 = vmatmul.mubr.msk.bf16.gmra.mxu1 %vm751_vm3, %v5343_v42 }
  0xf6   : > { %4524 = vmatprep.mubr.msk.bf16.mxu1 %vm751_vm3, %v5411_v54  ;;  %v5647_v55 = vpop.f32.mrf.mxu0 }
  0xf8   : > { %4559 = vmatmul.mubr.msk.bf16.gmra.mxu0 %vm751_vm3, %v5459_v16  ;;  %v5653_v39 = vpop.f32.mrf.mxu0 }
  0xf9   : > { %4562 = vmatprep.mubr.msk.bf16.mxu0 %vm751_vm3, %v5465_v19 }
  0xfa   : > { %v5657_v41 = vpop.f32.mrf.mxu1  ;;  %v5663_v16 = vpop.f32.mrf.mxu0 }
  0xfc   : > { %v5667_v19 = vpop.f32.mrf.mxu1  ;;  %v5669_v17 = vpop.f32.mrf.mxu0 }
  0xfd   : > { %4525 = vmatmul.mubr.msk.bf16.gmra.mxu1 %vm751_vm3, %v5416_v2 }
  0xfe   : > { %4528 = vmatprep.mubr.msk.bf16.mxu1 %vm751_vm3, %v5447_v38  ;;  %v5673_v47 = vpop.f32.mrf.mxu1 }
 0x100   : > { %4563 = vmatmul.mubr.msk.bf16.gmra.mxu0 %vm751_vm3, %v5338_v46 }
 0x101   : > { %4566 = vmatprep.mubr.msk.bf16.mxu0 %vm751_vm3, %v5354_v29  ;;  %v5681_v29 = vpop.f32.mrf.mxu1 }
 0x102   : > { %6476 = vst [vmem:[#allocation19_spill] sm:$0xff] %v5681_v29 }
 0x105   : > { %4529 = vmatmul.mubr.msk.bf16.gmra.mxu1 %vm751_vm3, %v5451_v37 }
 0x106   : > { %4532 = vmatprep.mubr.msk.bf16.mxu1 %vm751_vm3, %v5384_v8 }
 0x108   : > { %4567 = vmatmul.mubr.msk.bf16.gmra.mxu0 %vm751_vm3, %v5366_v3  ;;  %v5679_v46 = vpop.f32.mrf.mxu0 }
 0x109   : > { %4570 = vmatprep.mubr.msk.bf16.mxu0 %vm751_vm3, %v5379_v23  ;;  %v5701_v23 = vld [vmem:[%s4825_s30 + $0xcc] sm:$0xf] }
 0x10a   : > { %v5685_v32 = vpop.f32.mrf.mxu0  ;;  %v3903_v62 = vcombine.low %v5701_v23, %v5704_v61 }
 0x10c   : > { %v5689_v1 = vpop.f32.mrf.mxu1  ;;  %v5695_v3 = vpop.f32.mrf.mxu0 }
 0x10d   : > { %4533 = vmatmul.mubr.msk.bf16.gmra.mxu1 %vm751_vm3, %v5392_v4 }
 0x10e   : > { %4536 = vmatprep.mubr.msk.bf16.mxu1 %vm751_vm3, %v5407_v11  ;;  %v5697_v20 = vpop.f32.mrf.mxu1  ;;  %v5706_v51 = vpop.f32.mrf.mxu0 }
 0x10f   : > { %6477 = vst [vmem:[#allocation18_spill] sm:$0xff] %v5697_v20 }
 0x110   : > { %4571 = vmatmul.mubr.msk.bf16.gmra.mxu0 %vm751_vm3, %v5398_v9  ;;  %v5712_v40 = vpop.f32.mrf.mxu1 }
 0x111   : > { %4574 = vmatprep.mubr.msk.bf16.mxu0 %vm751_vm3, %v3849_v59  ;;  %6478 = vst [vmem:[#allocation21_spill] sm:$0xff] %v5712_v40 }
 0x112   : > { %v5719_v27 = vpop.f32.mrf.mxu1 }
 0x113   : > { %6479 = vst [vmem:[#allocation8_spill] sm:$0xff] %v5719_v27 }
 0x115   : > { %4537 = vmatmul.mubr.msk.bf16.gmra.mxu1 %vm751_vm3, %v5425_v21 }
 0x116   : > { %4540 = vmatprep.mubr.msk.bf16.mxu1 %vm751_vm3, %v5490_v36 }
 0x118   : > { %v5716_v9 = vpop.f32.mrf.mxu0  ;;  %4575 = vmatmul.mubr.msk.bf16.gmra.mxu0 %vm751_vm3, %v3903_v62 }
 0x119   : > { %4614 = vmatprep.mubr.msk.bf16.mxu0 %vm751_vm3, %v5264_v5 }
 0x11a   : > { %v5723_v59 = vpop.f32.mrf.mxu0 }
 0x11c   : > { %v5725_v13 = vpop.f32.mrf.mxu0 }
 0x11d   : > { %v5727_v60 = vpop.f32.mrf.mxu1  ;;  %4541 = vmatmul.mubr.msk.bf16.gmra.mxu1 %vm751_vm3, %v5513_v56 }
 0x11e   : > { %6480 = vst [vmem:[#allocation3_spill] sm:$0xff] %v5727_v60  ;;  %v5731_v29 = vpop.f32.mrf.mxu0  ;;  %4580 = vmatprep.mubr.msk.bf16.mxu1 %vm751_vm3, %v6463_v7 }
 0x11f   : > { %v5735_v62 = vpop.f32.mrf.mxu1 }
 0x120   : > { %6481 = vst [vmem:[#allocation4_spill] sm:$0xff] %v5735_v62  ;;  %v4412_v18 = vpop.f32.mrf.mxu0  ;;  %4615 = vmatmul.mubr.msk.bf16.vlgmr.msra.gmra.mxu0 %vm751_vm3, %v5298_v45 }
 0x121   : > { %v5739_v5 = vpop.f32.mrf.mxu1  ;;  %4618 = vmatprep.mubr.msk.bf16.mxu0 %vm751_vm3, %v5302_v28 }
 0x122   : > { %6482 = vst [vmem:[#allocation6_spill] sm:$0xff] %v5739_v5  ;;  %v1521_v0 = vpop.f32.mrf.mxu0 }
 0x123   : > { %v5743_v60 = vpop.f32.mrf.mxu1 }
 0x124   : > { %6483 = vst [vmem:[#allocation9_spill] sm:$0xff] %v5743_v60  ;;  %v4413_v27 = vpop.f32.mrf.mxu0 }
 0x125   : > { %v4378_v40 = vpop.f32.mrf.mxu1  ;;  %4581 = vmatmul.mubr.msk.bf16.vlgmr.msra.gmra.mxu1 %vm751_vm3, %v6464_v57 }
 0x126   : > { %v1139_v7 = vadd.f32 %v4378_v40, %v5617_v25  ;;  %v1524_v62 = vpop.f32.mrf.mxu0  ;;  %4584 = vmatprep.mubr.msk.bf16.mxu1 %vm751_vm3, %v6465_v52 }
 0x127   : > { %v1130_v45 = vpop.f32.mrf.mxu1 }
 0x128   : > { %v5750_v20 = vadd.f32 %v4412_v18, %v1139_v7  ;;  %v1131_v5 = vadd.f32 %v1130_v45, %v5621_v63  ;;  %v4416_v28 = vpop.f32.mrf.mxu0  ;;  %4619 = vmatmul.mubr.msk.bf16.gmra.mxu0 %vm751_vm3, %v5341_v26 }
 0x129   : > { %v4379_v60 = vpop.f32.mrf.mxu1  ;;  %4622 = vmatprep.mubr.msk.bf16.mxu0 %vm751_vm3, %v5343_v42 }
 0x12a   : > { %v5757_v57 = vadd.f32 %v1521_v0, %v1131_v5  ;;  %v1142_v25 = vadd.f32 %v4379_v60, %v5631_v10  ;;  %v1537_v40 = vpop.f32.mrf.mxu0 }
 0x12b   : > { %v1133_v35 = vpop.f32.mrf.mxu1 }
 0x12c   : > { %v5760_v52 = vadd.f32 %v4413_v27, %v1142_v25  ;;  %v1134_v7 = vadd.f32 %v1133_v35, %v5637_v48  ;;  %v4417_v18 = vpop.f32.mrf.mxu0 }
 0x12d   : > { %v4382_v63 = vpop.f32.mrf.mxu1  ;;  %4585 = vmatmul.mubr.msk.bf16.gmra.mxu1 %vm751_vm3, %v6466_v34 }
 0x12e   : > { %v5765_v26 = vadd.f32 %v1524_v62, %v1134_v7  ;;  %v1155_v45 = vadd.f32 %v4382_v63, %v5647_v55  ;;  %v1540_v42 = vpop.f32.mrf.mxu0  ;;  %4588 = vmatprep.mubr.msk.bf16.mxu1 %vm751_vm3, %v6467_v12 }
 0x12f   : > { %v1146_v0 = vpop.f32.mrf.mxu1 }
 0x130   : > { %v5770_v10 = vadd.f32 %v4416_v28, %v1155_v45  ;;  %v1147_v27 = vadd.f32 %v1146_v0, %v5653_v39  ;;  %v4420_v60 = vpop.f32.mrf.mxu0  ;;  %4623 = vmatmul.mubr.msk.bf16.gmra.mxu0 %vm751_vm3, %v5411_v54 }
 0x131   : > { %v4383_v35 = vpop.f32.mrf.mxu1  ;;  %4626 = vmatprep.mubr.msk.bf16.mxu0 %vm751_vm3, %v5416_v2 }
 0x132   : > { %v5777_v48 = vadd.f32 %v1537_v40, %v1147_v27  ;;  %v1158_v55 = vadd.f32 %v4383_v35, %v5663_v16  ;;  %v1553_v62 = vpop.f32.mrf.mxu0 }
 0x133   : > { %v1149_v5 = vpop.f32.mrf.mxu1 }
 0x134   : > { %v5780_v25 = vadd.f32 %v4417_v18, %v1158_v55  ;;  %v1150_v28 = vadd.f32 %v1149_v5, %v5669_v17  ;;  %v4421_v7 = vpop.f32.mrf.mxu0  ;;  %v3061_v17 = vld [vmem:[%s6374_s4] sm:$0x3] }
 0x135   : > { %v4386_v39 = vpop.f32.mrf.mxu1  ;;  %4589 = vmatmul.mubr.msk.bf16.gmra.mxu1 %vm751_vm3, %v5209_v44  ;;  %4726 = vmatprep.subr.msk.bf16.mxu1 %vm800_vm0, %v3061_v17 }
 0x136   : > { %v5785_v54 = vadd.f32 %v1540_v42, %v1150_v28  ;;  %v1171_v63 = vadd.f32 %v4386_v39, %v5679_v46  ;;  %v1556_v2 = vpop.f32.mrf.mxu0  ;;  %4592 = vmatprep.mubr.msk.bf16.mxu1 %vm751_vm3, %v6468_v15  ;;  %v4758_v46 = vld [vmem:[%s6373_s3] sm:$0xff]  }
 0x137   : > { %v1162_v16 = vpop.f32.mrf.mxu1  ;;  %4680 = vmatprep.subr.bf16.mxu0 %v4758_v46 }
 0x138   : > { %v5790_v40 = vadd.f32 %v4420_v60, %v1171_v63  ;;  %v1163_v18 = vadd.f32 %v1162_v16, %v5685_v32  ;;  %v4424_v45 = vpop.f32.mrf.mxu0  ;;  %4627 = vmatmul.mubr.msk.bf16.gmra.mxu0 %vm751_vm3, %v5447_v38  ;;  %v3063_v38 = vsel %vm800_vm0, %v3061_v17, 0 }
 0x139   : > { %v4387_v42 = vpop.f32.mrf.mxu1  ;;  %4630 = vmatprep.mubr.msk.bf16.mxu0 %vm751_vm3, %v5451_v37  ;;  %4647 = vmatpush3.bf16.msra.mxu1 %v3063_v38 }
 0x13a   : > { %v5804_v0 = vadd.f32 %v1553_v62, %v1163_v18  ;;  %v1174_v32 = vadd.f32 %v4387_v42, %v5695_v3  ;;  %v1569_v27 = vpop.f32.mrf.mxu0  ;;  %4681 = vmatpush3.bf16.msra.mxu0 %v4758_v46 }
 0x13b   : > { %v1165_v60 = vpop.f32.mrf.mxu1 }
 0x13c   : > { %v5808_v35 = vadd.f32 %v4421_v7, %v1174_v32  ;;  %v1166_v55 = vadd.f32 %v1165_v60, %v5706_v51  ;;  %v4425_v5 = vpop.f32.mrf.mxu0  ;;  %v2536_v32 = vshll.u32 %v5701_v23, 16 }
 0x13d   : > { %v4390_v28 = vpop.f32.mrf.mxu1  ;;  %4593 = vmatmul.mubr.msk.bf16.gmra.mxu1 %vm751_vm3, %v6469_v30 }
 0x13e   : > { %v5813_v37 = vadd.f32 %v1556_v2, %v1166_v55  ;;  %v1187_v3 = vadd.f32 %v4390_v28, %v5716_v9  ;;  %v1572_v62 = vpop.f32.mrf.mxu0  ;;  %4596 = vmatprep.mubr.msk.bf16.mxu1 %vm751_vm3, %v6470_v31 }
 0x13f   : > { %v1178_v39 = vpop.f32.mrf.mxu1 }
 0x140   : > { %v5818_v63 = vadd.f32 %v4424_v45, %v1187_v3  ;;  %v1179_v7 = vadd.f32 %v1178_v39, %v5723_v59  ;;  %v4428_v16 = vpop.f32.mrf.mxu0  ;;  %4631 = vmatmul.mubr.msk.bf16.gmra.mxu0 %vm751_vm3, %v5384_v8  ;;  %v2533_v59 = vshrl.u32 %v5701_v23, 16  ;;  %v2765_v39 = vrot.slane %v5704_v61, 5 }
 0x141   : > { %v4391_v51 = vpop.f32.mrf.mxu1  ;;  %4634 = vmatprep.mubr.msk.bf16.mxu0 %vm751_vm3, %v5392_v4  ;;  %v2542_v4 = vshll.u32 %v5704_v61, 16 }
 0x142   : > { %v5825_v2 = vadd.f32 %v1569_v27, %v1179_v7  ;;  %v1190_v9 = vadd.f32 %v4391_v51, %v5725_v13  ;;  %v1585_v18 = vpop.f32.mrf.mxu0  ;;  %v2546_v27 = vshrl.u32 %v5704_v61, 16  ;;  %v2535_v3 = vrot.slane %v2533_v59, 4 }
 0x143   : > { %v1181_v17 = vpop.f32.mrf.mxu1  ;;  %v2544_v7 = vrot.slane %v2542_v4, 5  ;;  %v3938_v59 = vrot.slane %v5701_v23, 9 }
 0x144   : > { %v5828_v46 = vadd.f32 %v4425_v5, %v1190_v9  ;;  %v1182_v45 = vadd.f32 %v1181_v17, %v5731_v29  ;;  %v4429_v42 = vpop.f32.mrf.mxu0  ;;  %v2548_v51 = vrot.slane %v2546_v27, 4 }
 0x145   : > { %v4394_v8 = vpop.f32.mrf.mxu1  ;;  %4597 = vmatmul.mubr.msk.bf16.gmra.mxu1 %vm751_vm3, %v6471_v33 }
 0x146   : > { %v5837_v13 = vadd.f32 %v1572_v62, %v1182_v45  ;;  %v1203_v38 = vadd.f32 %v4394_v8, %v5625_v14  ;;  %v5840_v60 = vpop.f32.mrf.mxu0  ;;  %4600 = vmatprep.mubr.msk.bf16.mxu1 %vm751_vm3, %v6472_v50  ;;  %v2538_v62 = vrot.slane %v2536_v32, 5  ;;  %v306_v45 = vld [vmem:[%s4825_s30 + $0xd4] sm:$0x1]  ;;  %v2767_v32 = vrot.slane %v2765_v39, 4 }
 0x147   : > { %v1194_v29 = vpop.f32.mrf.mxu1  ;;  %v2768_v4 = vrot.slane %v306_v45, 5 }
 0x148   : > { %v5844_v55 = vadd.f32 %v4428_v16, %v1203_v38  ;;  %v1195_v5 = vadd.f32 %v1194_v29, %v5635_v22  ;;  %v4432_v28 = vpop.f32.mrf.mxu0  ;;  %4635 = vmatmul.mubr.msk.bf16.gmra.mxu0 %vm751_vm3, %v5407_v11 }
 0x149   : > { %v4395_v14 = vpop.f32.mrf.mxu1  ;;  %4638 = vmatprep.mubr.msk.bf16.mxu0 %vm751_vm3, %v5425_v21  ;;  %v2539_v21 = vor.u32 %v2538_v62, %v2535_v3  ;;  %v2766_v62 = vsel %vm5190_vm7, %v3938_v59, %v2765_v39 }
 0x14a   : > { %v5852_v9 = vadd.f32 %v1585_v18, %v1195_v5  ;;  %v1206_v16 = vadd.f32 %v4395_v14, %v5641_v49  ;;  %v1601_v17 = vpop.f32.mrf.mxu0  ;;  %v2549_v49 = vor.u32 %v2548_v51, %v2544_v7  ;;  %v2769_v14 = vsel %vm5190_vm7, %v2767_v32, %v2768_v4  ;;  %v6485_v4 = vld [vmem:[#allocation18_spill] sm:$0xff] }
 0x14b   : > { %v5855_v22 = vpop.f32.mrf.mxu1 }
 0x14c   : > { %v5858_v8 = vadd.f32 %v4429_v42, %v1206_v16  ;;  %v4433_v11 = vpop.f32.mrf.mxu0  ;;  %v2552_v42 = vshll.u32 %v306_v45, 16  ;;  %v2550_v16 = vrot.slane %v2549_v49, 4 }
 0x14d   : > { %v4398_v61 = vpop.f32.mrf.mxu1  ;;  %4601 = vmatmul.mubr.msk.bf16.gmra.mxu1 %vm751_vm3, %v6473_v58 }
 0x14e   : > { %v1219_v18 = vadd.f32 %v4398_v61, %v5657_v41  ;;  %v5864_v27 = vpop.f32.mrf.mxu0  ;;  %4604 = vmatprep.mubr.msk.bf16.mxu1 %vm751_vm3, %v6474_v43  ;;  %v2540_v41 = vrot.slane %v2539_v21, 4  ;;  %v2554_v45 = vrot.slane %v2552_v42, 5 }
 0x14f   : > { %v1210_v38 = vpop.f32.mrf.mxu1 }
 0x150   : > { %v5868_v29 = vadd.f32 %v4432_v28, %v1219_v18  ;;  %v1211_v23 = vadd.f32 %v1210_v38, %v5667_v19  ;;  %v4436_v5 = vpop.f32.mrf.mxu0  ;;  %4639 = vmatmul.mubr.msk.bf16.gmra.mxu0 %vm751_vm3, %v5490_v36 }
 0x151   : > { %v4399_v3 = vpop.f32.mrf.mxu1  ;;  %4642 = vmatprep.mubr.msk.bf16.mxu0 %vm751_vm3, %v5513_v56  ;;  %v3939_v56 = vcombine.low %v2766_v62, %v2769_v14 }
 0x152   : > { %v5879_v51 = vadd.f32 %v1601_v17, %v1211_v23  ;;  %v1222_v28 = vadd.f32 %v4399_v3, %v5673_v47  ;;  %v1617_v19 = vpop.f32.mrf.mxu0  ;;  %v2545_v17 = vsel %vm4874_vm4, %v2540_v41, %v2544_v7  ;;  %v6486_v3 = vld [vmem:[#allocation21_spill] sm:$0xff]  ;;  %v6487_v41 = vld [vmem:[#allocation8_spill] sm:$0xff]  ;;  %v6490_v47 = vld [vmem:[#allocation7_spill] sm:$0xff] }
 0x153   : > { %v5882_v61 = vpop.f32.mrf.mxu1 }
 0x154   : > { %v5884_v36 = vadd.f32 %v4433_v11, %v1222_v28  ;;  %v4437_v18 = vpop.f32.mrf.mxu0  ;;  %v2555_v11 = vsel %vm4874_vm4, %v2550_v16, %v2554_v45 }
 0x155   : > { %v4402_v21 = vpop.f32.mrf.mxu1  ;;  %4605 = vmatmul.mubr.msk.bf16.gmra.mxu1 %vm751_vm3, %v5248_v53  ;;  %v3920_v38 = vcombine.low %v2545_v17, %v2555_v11  ;;  %v6491_v11 = vld [vmem:[#allocation4_spill] sm:$0xff] }
 0x156   : > { %v1235_v6 = vadd.f32 %v4402_v21, %v5689_v1  ;;  %v5889_v39 = vpop.f32.mrf.mxu0  ;;  %4608 = vmatprep.mubr.msk.bf16.mxu1 %vm751_vm3, %v5590_v24  ;;  %v6488_v21 = vld [vmem:[#allocation3_spill] sm:$0xff] }
 0x157   : > { %v1226_v59 = vpop.f32.mrf.mxu1 }
 0x158   : > { %v5897_v32 = vadd.f32 %v4436_v5, %v1235_v6  ;;  %v1227_v49 = vadd.f32 %v1226_v59, %v6485_v4  ;;  %v4440_v42 = vpop.f32.mrf.mxu0  ;;  %4643 = vmatmul.mubr.msk.bf16.gmra.mxu0 %vm751_vm3, %v3939_v56 }
 0x159   : > { %v4403_v1 = vpop.f32.mrf.mxu1 }
 0x15a   : > { %v5901_v23 = vadd.f32 %v1617_v19, %v1227_v49  ;;  %v1238_v62 = vadd.f32 %v4403_v1, %v6486_v3  ;;  %v1633_v14 = vpop.f32.mrf.mxu0  ;;  %v6492_v1 = vld [vmem:[#allocation6_spill] sm:$0xff] }
 0x15b   : > { %v1229_v28 = vpop.f32.mrf.mxu1 }
 0x15c   : > { %v5904_v7 = vadd.f32 %v4437_v18, %v1238_v62  ;;  %v5907_v16 = vadd.f32 %v1229_v28, %v6487_v41  ;;  %v4441_v5 = vpop.f32.mrf.mxu0  ;;  %v6493_v41 = vld [vmem:[#allocation9_spill] sm:$0xff] }
 0x15d   : > { %v4406_v45 = vpop.f32.mrf.mxu1  ;;  %4609 = vmatmul.mubr.msk.bf16.gmra.mxu1 %vm751_vm3, %v3920_v38 }
 0x15e   : > { %v1251_v6 = vadd.f32 %v4406_v45, %v6488_v21  ;;  %v5911_v56 = vpop.f32.mrf.mxu0  ;;  %4648 = vmatprep.mubr.msk.bf16.mxu1 %vm751_vm3, %v6490_v47 }
 0x15f   : > { %6489 = vst [vmem:[#allocation20_spill] sm:$0xff] %v5911_v56  ;;  %v1242_v19 = vpop.f32.mrf.mxu1  ;;  %v6494_v56 = vld [vmem:[#allocation11_spill] sm:$0xff] }
 0x160   : > { %v5915_v17 = vadd.f32 %v4440_v42, %v1251_v6  ;;  %v1243_v18 = vadd.f32 %v1242_v19, %v6491_v11  ;;  %v4480_v59 = vpop.f32.mrf.mxu0 }
 0x161   : > { %v4407_v4 = vpop.f32.mrf.mxu1 }
 0x162   : > { %v5918_v49 = vadd.f32 %v1633_v14, %v1243_v18  ;;  %v1254_v3 = vadd.f32 %v4407_v4, %v6492_v1  ;;  %v1955_v62 = vpop.f32.mrf.mxu0  ;;  %v6496_v14 = vld [vmem:[#allocation13_spill] sm:$0xff] }
 0x163   : > { %v1245_v38 = vpop.f32.mrf.mxu1 }
 0x164   : > { %v5921_v28 = vadd.f32 %v4441_v5, %v1254_v3  ;;  %v5924_v45 = vadd.f32 %v1245_v38, %v6493_v41  ;;  %v4481_v21 = vpop.f32.mrf.mxu0 }
 0x165   : > { %v4446_v47 = vpop.f32.mrf.mxu1  ;;  %4649 = vmatmul.mubr.msk.bf16.vlgmr.msra.gmra.mxu1 %vm751_vm3, %v6494_v56 }
 0x166   : > { %v1858_v42 = vadd.f32 %v4446_v47, %v5750_v20  ;;  %v5929_v6 = vpop.f32.mrf.mxu0  ;;  %4652 = vmatprep.mubr.msk.bf16.mxu1 %vm751_vm3, %v6496_v14 }
 0x167   : > { %6495 = vst [vmem:[#allocation23_spill] sm:$0xff] %v5929_v6  ;;  %v1729_v19 = vpop.f32.mrf.mxu1  ;;  %v6497_v6 = vld [vmem:[#allocation15_spill] sm:$0xff] }
 0x168   : > { %v5933_v11 = vadd.f32 %v4480_v59, %v1858_v42  ;;  %v1856_v5 = vadd.f32 %v1729_v19, %v5757_v57  ;;  %v4484_v18 = vpop.f32.mrf.mxu0 }
 0x169   : > { %v4447_v4 = vpop.f32.mrf.mxu1 }
 0x16a   : > { %v5936_v1 = vadd.f32 %v1955_v62, %v1856_v5  ;;  %v1859_v3 = vadd.f32 %v4447_v4, %v5760_v52  ;;  %v1971_v38 = vpop.f32.mrf.mxu0 }
 0x16b   : > { %v1732_v56 = vpop.f32.mrf.mxu1 }
 0x16c   : > { %v5939_v41 = vadd.f32 %v4481_v21, %v1859_v3  ;;  %v5942_v20 = vadd.f32 %v1732_v56, %v5765_v26  ;;  %v4485_v47 = vpop.f32.mrf.mxu0 }
 0x16d   : > { %v4450_v14 = vpop.f32.mrf.mxu1  ;;  %4653 = vmatmul.mubr.msk.bf16.gmra.mxu1 %vm751_vm3, %v6497_v6 }
 0x16e   : > { %v1862_v57 = vadd.f32 %v4450_v14, %v5770_v10  ;;  %v5947_v59 = vpop.f32.mrf.mxu0  ;;  %4656 = vmatprep.mubr.msk.bf16.mxu1 %vm751_vm3, %v6466_v34 }
 0x16f   : > { %v1745_v52 = vpop.f32.mrf.mxu1 }
 0x170   : > { %v5951_v62 = vadd.f32 %v4484_v18, %v1862_v57  ;;  %v1860_v21 = vadd.f32 %v1745_v52, %v5777_v48  ;;  %v4488_v42 = vpop.f32.mrf.mxu0 }
 0x171   : > { %v4451_v26 = vpop.f32.mrf.mxu1 }
 0x172   : > { %v5954_v19 = vadd.f32 %v1971_v38, %v1860_v21  ;;  %v1863_v5 = vadd.f32 %v4451_v26, %v5780_v25  ;;  %v1987_v4 = vpop.f32.mrf.mxu0 }
 0x173   : > { %v1748_v6 = vpop.f32.mrf.mxu1 }
 0x174   : > { %v5957_v3 = vadd.f32 %v4485_v47, %v1863_v5  ;;  %v5960_v10 = vadd.f32 %v1748_v6, %v5785_v54  ;;  %v4489_v56 = vpop.f32.mrf.mxu0 }
 0x175   : > { %v4454_v34 = vpop.f32.mrf.mxu1  ;;  %4657 = vmatmul.mubr.msk.bf16.gmra.mxu1 %vm751_vm3, %v6467_v12 }
 0x176   : > { %v1866_v48 = vadd.f32 %v4454_v34, %v5790_v40  ;;  %v5965_v18 = vpop.f32.mrf.mxu0  ;;  %4660 = vmatprep.mubr.msk.bf16.mxu1 %vm751_vm3, %v5209_v44 }
 0x177   : > { %v1761_v25 = vpop.f32.mrf.mxu1 }
 0x178   : > { %v5969_v38 = vadd.f32 %v4488_v42, %v1866_v48  ;;  %v1864_v47 = vadd.f32 %v1761_v25, %v5804_v0  ;;  %v4492_v14 = vpop.f32.mrf.mxu0 }
 0x179   : > { %v4455_v54 = vpop.f32.mrf.mxu1 }
 0x17a   : > { %v5972_v57 = vadd.f32 %v1987_v4, %v1864_v47  ;;  %v1867_v52 = vadd.f32 %v4455_v54, %v5808_v35  ;;  %v2003_v21 = vpop.f32.mrf.mxu0 }
 0x17b   : > { %v1764_v12 = vpop.f32.mrf.mxu1 }
 0x17c   : > { %v5975_v26 = vadd.f32 %v4489_v56, %v1867_v52  ;;  %v5978_v40 = vadd.f32 %v1764_v12, %v5813_v37  ;;  %v4493_v5 = vpop.f32.mrf.mxu0 }
 0x17d   : > { %v4458_v44 = vpop.f32.mrf.mxu1  ;;  %4661 = vmatmul.mubr.msk.bf16.gmra.mxu1 %vm751_vm3, %v6468_v15 }
 0x17e   : > { %v1870_v0 = vadd.f32 %v4458_v44, %v5818_v63  ;;  %v5983_v42 = vpop.f32.mrf.mxu0  ;;  %4664 = vmatprep.mubr.msk.bf16.mxu1 %vm751_vm3, %v6469_v30 }
 0x17f   : > { %v1777_v35 = vpop.f32.mrf.mxu1 }
 0x180   : > { %v5987_v4 = vadd.f32 %v4492_v14, %v1870_v0  ;;  %v1868_v6 = vadd.f32 %v1777_v35, %v5825_v2  ;;  %v4496_v56 = vpop.f32.mrf.mxu0  ;;  %v6498_v14 = vld [vmem:[#allocation16_spill] sm:$0xff] }
 0x181   : > { %v4459_v37 = vpop.f32.mrf.mxu1  ;;  %v1198_v2 = vadd.f32 %v5855_v22, %v6498_v14 }
 0x182   : > { %v5990_v34 = vadd.f32 %v2003_v21, %v1868_v6  ;;  %v1871_v48 = vadd.f32 %v4459_v37, %v5828_v46  ;;  %v2019_v25 = vpop.f32.mrf.mxu0 }
 0x183   : > { %v1780_v15 = vpop.f32.mrf.mxu1  ;;  %v1665_v0 = vadd.f32 %v5840_v60, %v1198_v2 }
 0x184   : > { %v5993_v47 = vadd.f32 %v4493_v5, %v1871_v48  ;;  %v5996_v63 = vadd.f32 %v1780_v15, %v5837_v13  ;;  %v4497_v54 = vpop.f32.mrf.mxu0 }
 0x185   : > { %v4462_v30 = vpop.f32.mrf.mxu1  ;;  %4665 = vmatmul.mubr.msk.bf16.gmra.mxu1 %vm751_vm3, %v6470_v31 }
 0x186   : > { %v1874_v52 = vadd.f32 %v4462_v30, %v5844_v55  ;;  %v2022_v21 = vpop.f32.mrf.mxu0  ;;  %4668 = vmatprep.mubr.msk.bf16.mxu1 %vm751_vm3, %v6471_v33 }
 0x187   : > { %v1793_v46 = vpop.f32.mrf.mxu1 }
 0x188   : > { %v6005_v12 = vadd.f32 %v4496_v56, %v1874_v52  ;;  %v1872_v13 = vadd.f32 %v1793_v46, %v5852_v9  ;;  %v4500_v5 = vpop.f32.mrf.mxu0  ;;  %v6499_v56 = vld [vmem:[#allocation19_spill] sm:$0xff] }
 0x189   : > { %v4463_v44 = vpop.f32.mrf.mxu1  ;;  %v1214_v9 = vadd.f32 %v5882_v61, %v6499_v56 }
 0x18a   : > { %v6009_v35 = vadd.f32 %v2019_v25, %v1872_v13  ;;  %v1875_v31 = vadd.f32 %v4463_v44, %v5858_v8  ;;  %v2035_v22 = vpop.f32.mrf.mxu0 }
 0x18b   : > { %v1796_v6 = vpop.f32.mrf.mxu1 }
 0x18c   : > { %v6012_v55 = vadd.f32 %v4497_v54, %v1875_v31  ;;  %v1873_v37 = vadd.f32 %v1796_v6, %v1665_v0  ;;  %v4501_v48 = vpop.f32.mrf.mxu0 }
 0x18d   : > { %v4466_v33 = vpop.f32.mrf.mxu1  ;;  %4669 = vmatmul.mubr.msk.bf16.gmra.mxu1 %vm751_vm3, %v6472_v50  ;;  %v1669_v50 = vadd.f32 %v5864_v27, %v1214_v9 }
 0x18e   : > { %v6018_v15 = vadd.f32 %v2022_v21, %v1873_v37  ;;  %v1878_v60 = vadd.f32 %v4466_v33, %v5868_v29  ;;  %v2038_v25 = vpop.f32.mrf.mxu0  ;;  %4672 = vmatprep.mubr.msk.bf16.mxu1 %vm751_vm3, %v6473_v58  ;;  %v1673_v37 = vadd.f32 %v5889_v39, %v5907_v16 }
 0x18f   : > { %v1809_v8 = vpop.f32.mrf.mxu1 }
 0x190   : > { %v6023_v54 = vadd.f32 %v4500_v5, %v1878_v60  ;;  %v1876_v30 = vadd.f32 %v1809_v8, %v5879_v51  ;;  %v4504_v14 = vpop.f32.mrf.mxu0 }
 0x191   : > { %v4467_v2 = vpop.f32.mrf.mxu1 }
 0x192   : > { %v6027_v52 = vadd.f32 %v2035_v22, %v1876_v30  ;;  %v1879_v61 = vadd.f32 %v4467_v2, %v5884_v36  ;;  %v2051_v21 = vpop.f32.mrf.mxu0  ;;  %v6501_v2 = vld [vmem:[#allocation20_spill] sm:$0xff] }
 0x193   : > { %v1812_v46 = vpop.f32.mrf.mxu1 }
 0x194   : > { %v6030_v29 = vadd.f32 %v4501_v48, %v1879_v61  ;;  %v1877_v13 = vadd.f32 %v1812_v46, %v1669_v50  ;;  %v4505_v44 = vpop.f32.mrf.mxu0  ;;  %v1677_v50 = vadd.f32 %v6501_v2, %v5924_v45 }
 0x195   : > { %v4470_v58 = vpop.f32.mrf.mxu1  ;;  %4673 = vmatmul.mubr.msk.bf16.gmra.mxu1 %vm751_vm3, %v6474_v43 }
 0x196   : > { %v6034_v5 = vadd.f32 %v2038_v25, %v1877_v13  ;;  %v1882_v51 = vadd.f32 %v4470_v58, %v5897_v32  ;;  %v2054_v0 = vpop.f32.mrf.mxu0  ;;  %4676 = vmatprep.mubr.msk.bf16.mxu1 %vm751_vm3, %v5248_v53 }
 0x197   : > { %v1825_v27 = vpop.f32.mrf.mxu1 }
 0x198   : > { %v6039_v36 = vadd.f32 %v4504_v14, %v1882_v51  ;;  %v1880_v31 = vadd.f32 %v1825_v27, %v5901_v23  ;;  %v4508_v22 = vpop.f32.mrf.mxu0 }
 0x199   : > { %v4471_v6 = vpop.f32.mrf.mxu1 }
 0x19a   : > { %v6044_v48 = vadd.f32 %v2051_v21, %v1880_v31  ;;  %v1883_v43 = vadd.f32 %v4471_v6, %v5904_v7  ;;  %v2067_v33 = vpop.f32.mrf.mxu0 }
 0x19b   : > { %v1828_v32 = vpop.f32.mrf.mxu1 }
 0x19c   : > { %v6047_v56 = vadd.f32 %v4505_v44, %v1883_v43  ;;  %v1881_v9 = vadd.f32 %v1828_v32, %v1673_v37  ;;  %v4509_v53 = vpop.f32.mrf.mxu0 }
 0x19d   : > { %v4474_v60 = vpop.f32.mrf.mxu1  ;;  %4677 = vmatmul.mubr.msk.bf16.gmra.mxu1 %vm751_vm3, %v5590_v24 }
 0x19e   : > { %v6051_v23 = vadd.f32 %v2054_v0, %v1881_v9  ;;  %v1886_v25 = vadd.f32 %v4474_v60, %v5915_v17  ;;  %v2070_v8 = vpop.f32.mrf.mxu0 }
 0x19f   : > { %v1841_v39 = vpop.f32.mrf.mxu1 }
 0x1a0   : > { %6500 = vst [vmem:[#allocation5_spill] sm:$0xff] %v6051_v23  ;;  %v6054_v16 = vadd.f32 %v4508_v22, %v1886_v25  ;;  %v1884_v7 = vadd.f32 %v1841_v39, %v5918_v49  ;;  %v4548_v30 = vpop.f32.mrf.mxu0 }
 0x1a1   : > { %v4475_v14 = vpop.f32.mrf.mxu1 }
 0x1a2   : > { %v6059_v61 = vadd.f32 %v2067_v33, %v1884_v7  ;;  %v1887_v21 = vadd.f32 %v4475_v14, %v5921_v28  ;;  %v2373_v24 = vpop.f32.mrf.mxu0 }
 0x1a3   : > { %v1844_v46 = vpop.f32.mrf.mxu1 }
 0x1a4   : > { %v6062_v13 = vadd.f32 %v4509_v53, %v1887_v21  ;;  %v1885_v17 = vadd.f32 %v1844_v46, %v1677_v50  ;;  %v6064_v44 = vpop.f32.mrf.mxu0 }
 0x1a5   : > { %v4514_v58 = vpop.f32.mrf.mxu1 }
 0x1a6   : > { %v6066_v51 = vadd.f32 %v2070_v8, %v1885_v17  ;;  %v2298_v49 = vadd.f32 %v4514_v58, %v5933_v11  ;;  %v6069_v0 = vpop.f32.mrf.mxu0 }
 0x1a7   : > { %v2169_v27 = vpop.f32.mrf.mxu1 }
 0x1a8   : > { %6502 = vst [vmem:[#allocation10_spill] sm:$0xff] %v6066_v51  ;;  %v6071_v45 = vadd.f32 %v4548_v30, %v2298_v49  ;;  %v2296_v31 = vadd.f32 %v2169_v27, %v5936_v1  ;;  %v4552_v28 = vpop.f32.mrf.mxu0 }
 0x1a9   : > { %v6074_v22 = vpop.f32.mrf.mxu1 }
 0x1aa   : > { %v6076_v6 = vadd.f32 %v2373_v24, %v2296_v31  ;;  %v2389_v37 = vpop.f32.mrf.mxu0 }
 0x1ab   : > { %v6078_v43 = vpop.f32.mrf.mxu1 }
 0x1ac   : > { %v6080_v33 = vpop.f32.mrf.mxu0 }
 0x1ad   : > { %v4518_v32 = vpop.f32.mrf.mxu1 }
 0x1ae   : > { %v2302_v11 = vadd.f32 %v4518_v32, %v5951_v62  ;;  %v6083_v9 = vpop.f32.mrf.mxu0 }
 0x1af   : > { %v2185_v53 = vpop.f32.mrf.mxu1 }
 0x1b0   : > { %v6085_v60 = vadd.f32 %v4552_v28, %v2302_v11  ;;  %v2300_v1 = vadd.f32 %v2185_v53, %v5954_v19  ;;  %v4556_v25 = vpop.f32.mrf.mxu0 }
 0x1b1   : > { %v6088_v8 = vpop.f32.mrf.mxu1 }
 0x1b2   : > { %v6090_v39 = vadd.f32 %v2389_v37, %v2300_v1  ;;  %v2405_v7 = vpop.f32.mrf.mxu0 }
 0x1b3   : > { %v6092_v30 = vpop.f32.mrf.mxu1 }
 0x1b4   : > { %v4557_v14 = vpop.f32.mrf.mxu0 }
 0x1b5   : > { %v4522_v2 = vpop.f32.mrf.mxu1 }
 0x1b6   : > { %v2306_v50 = vadd.f32 %v4522_v2, %v5969_v38  ;;  %v6095_v62 = vpop.f32.mrf.mxu0 }
 0x1b7   : > { %v2201_v21 = vpop.f32.mrf.mxu1 }
 0x1b8   : > { %v6097_v24 = vadd.f32 %v4556_v25, %v2306_v50  ;;  %v2304_v46 = vadd.f32 %v2201_v21, %v5972_v57  ;;  %v4560_v19 = vpop.f32.mrf.mxu0 }
 0x1b9   : > { %v4523_v17 = vpop.f32.mrf.mxu1 }
 0x1ba   : > { %v6100_v58 = vadd.f32 %v2405_v7, %v2304_v46  ;;  %v2307_v49 = vadd.f32 %v4523_v17, %v5975_v26  ;;  %v2421_v27 = vpop.f32.mrf.mxu0 }
 0x1bb   : > { %v6103_v31 = vpop.f32.mrf.mxu1 }
 0x1bc   : > { %v6105_v28 = vadd.f32 %v4557_v14, %v2307_v49  ;;  %v4561_v37 = vpop.f32.mrf.mxu0 }
 0x1bd   : > { %v4526_v38 = vpop.f32.mrf.mxu1 }
 0x1be   : > { %v2310_v32 = vadd.f32 %v4526_v38, %v5987_v4  ;;  %v6108_v11 = vpop.f32.mrf.mxu0 }
 0x1bf   : > { %v2217_v53 = vpop.f32.mrf.mxu1 }
 0x1c0   : > { %v6110_v1 = vadd.f32 %v4560_v19, %v2310_v32  ;;  %v2308_v57 = vadd.f32 %v2217_v53, %v5990_v34  ;;  %v4564_v25 = vpop.f32.mrf.mxu0 }
 0x1c1   : > { %v4527_v7 = vpop.f32.mrf.mxu1 }
 0x1c2   : > { %v6113_v2 = vadd.f32 %v2421_v27, %v2308_v57  ;;  %v2311_v26 = vadd.f32 %v4527_v7, %v5993_v47  ;;  %v2437_v50 = vpop.f32.mrf.mxu0 }
 0x1c3   : > { %v6116_v14 = vpop.f32.mrf.mxu1 }
 0x1c4   : > { %v6118_v21 = vadd.f32 %v4561_v37, %v2311_v26  ;;  %v4565_v46 = vpop.f32.mrf.mxu0 }
 0x1c5   : > { %v4530_v4 = vpop.f32.mrf.mxu1 }
 0x1c6   : > { %v2314_v17 = vadd.f32 %v4530_v4, %v6005_v12  ;;  %v6121_v49 = vpop.f32.mrf.mxu0 }
 0x1c7   : > { %v2233_v19 = vpop.f32.mrf.mxu1 }
 0x1c8   : > { %v6123_v38 = vadd.f32 %v4564_v25, %v2314_v17  ;;  %v2312_v34 = vadd.f32 %v2233_v19, %v6009_v35  ;;  %v4568_v27 = vpop.f32.mrf.mxu0 }
 0x1c9   : > { %v4531_v32 = vpop.f32.mrf.mxu1 }
 0x1ca   : > { %v6126_v53 = vadd.f32 %v2437_v50, %v2312_v34  ;;  %v2315_v47 = vadd.f32 %v4531_v32, %v6012_v55  ;;  %v2453_v57 = vpop.f32.mrf.mxu0 }
 0x1cb   : > { %v6129_v37 = vpop.f32.mrf.mxu1 }
 0x1cc   : > { %v6131_v7 = vadd.f32 %v4565_v46, %v2315_v47  ;;  %v4569_v26 = vpop.f32.mrf.mxu0 }
 0x1cd   : > { %v4534_v12 = vpop.f32.mrf.mxu1 }
 0x1ce   : > { %v2318_v4 = vadd.f32 %v4534_v12, %v6023_v54  ;;  %v6134_v51 = vpop.f32.mrf.mxu0 }
 0x1cf   : > { %6503 = vst [vmem:[#allocation12_spill] sm:$0xff] %v6134_v51  ;;  %v2249_v25 = vpop.f32.mrf.mxu1 }
 0x1d0   : > { %v6136_v17 = vadd.f32 %v4568_v27, %v2318_v4  ;;  %v2316_v35 = vadd.f32 %v2249_v25, %v6027_v52  ;;  %v4572_v50 = vpop.f32.mrf.mxu0 }
 0x1d1   : > { %v4535_v19 = vpop.f32.mrf.mxu1 }
 0x1d2   : > { %v6139_v34 = vadd.f32 %v2453_v57, %v2316_v35  ;;  %v2319_v55 = vadd.f32 %v4535_v19, %v6030_v29  ;;  %v2469_v32 = vpop.f32.mrf.mxu0 }
 0x1d3   : > { %v6142_v46 = vpop.f32.mrf.mxu1 }
 0x1d4   : > { %v6144_v47 = vadd.f32 %v4569_v26, %v2319_v55  ;;  %v4573_v23 = vpop.f32.mrf.mxu0 }
 0x1d5   : > { %v4538_v54 = vpop.f32.mrf.mxu1 }
 0x1d6   : > { %6504 = vst [vmem:[#allocation14_spill] sm:$0xff] %v6144_v47  ;;  %v2322_v12 = vadd.f32 %v4538_v54, %v6039_v36  ;;  %v6147_v51 = vpop.f32.mrf.mxu0 }
 0x1d7   : > { %6505 = vst [vmem:[#allocation17_spill] sm:$0xff] %v6147_v51  ;;  %v2265_v27 = vpop.f32.mrf.mxu1 }
 0x1d8   : > { %v6149_v4 = vadd.f32 %v4572_v50, %v2322_v12  ;;  %v2320_v52 = vadd.f32 %v2265_v27, %v6044_v48  ;;  %v4576_v57 = vpop.f32.mrf.mxu0 }
 0x1d9   : > { %v4539_v25 = vpop.f32.mrf.mxu1 }
 0x1da   : > { %v6152_v35 = vadd.f32 %v2469_v32, %v2320_v52  ;;  %v2323_v29 = vadd.f32 %v4539_v25, %v6047_v56  ;;  %v2485_v19 = vpop.f32.mrf.mxu0 }
 0x1db   : > { %v6155_v26 = vpop.f32.mrf.mxu1 }
 0x1dc   : > { %v6157_v55 = vadd.f32 %v4573_v23, %v2323_v29  ;;  %v4577_v47 = vpop.f32.mrf.mxu0  ;;  %v6509_v29 = vld [vmem:[#allocation23_spill] sm:$0xff] }
 0x1dd   : > { %v4542_v36 = vpop.f32.mrf.mxu1 }
 0x1de   : > { %6506 = vst [vmem:[#allocation22_spill] sm:$0xff] %v6157_v55  ;;  %v2326_v54 = vadd.f32 %v4542_v36, %v6054_v16  ;;  %v6160_v51 = vpop.f32.mrf.mxu0  ;;  %v2083_v55 = vadd.f32 %v6509_v29, %v5942_v20  ;;  %v2299_v16 = vadd.f32 %v6074_v22, %v5939_v41  ;;  %v6183_v41 = vld [vmem:[%s6372_s2] ss:$0 sm:$0xff] }
 0x1df   : > { %6507 = vst [vmem:[#allocation24_spill] sm:$0xff] %v6160_v51  ;;  %v2281_v50 = vpop.f32.mrf.mxu1 }
 0x1e0   : > { %v6162_v12 = vadd.f32 %v4576_v57, %v2326_v54  ;;  %v2324_v48 = vadd.f32 %v2281_v50, %v6059_v61  ;;  %v4616_v32 = vpop.f32.mrf.mxu0  ;;  %v2297_v61 = vadd.f32 %v6078_v43, %v2083_v55 }
 0x1e1   : > { %v4543_v27 = vpop.f32.mrf.mxu1 }
 0x1e2   : > { %v6165_v52 = vadd.f32 %v2485_v19, %v2324_v48  ;;  %v2327_v56 = vadd.f32 %v4543_v27, %v6062_v13  ;;  %v2813_v25 = vpop.f32.mrf.mxu0  ;;  %v2503_v13 = vadd.f32 %v6064_v44, %v2299_v16  ;;  %v2501_v22 = vadd.f32 %v6069_v0, %v2297_v61 }
 0x1e3   : > { %v6168_v23 = vpop.f32.mrf.mxu1  ;;  %v2303_v16 = vadd.f32 %v6088_v8, %v5957_v3 }
 0x1e4   : > { %6508 = vst [vmem:[#allocation2_spill] sm:$0xff] %v6165_v52  ;;  %v6174_v36 = vadd.f32 %v4577_v47, %v2327_v56  ;;  %v4617_v57 = vpop.f32.mrf.mxu0 }
 0x1e5   : > { %v4582_v54 = vpop.f32.mrf.mxu1  ;;  %v2507_v3 = vadd.f32 %v6080_v33, %v2303_v16 }
 0x1e6   : > { %v2732_v19 = vadd.f32 %v4582_v54, %v6071_v45  ;;  %v2816_v50 = vpop.f32.mrf.mxu0  ;;  %v2087_v45 = vadd.f32 %v5947_v59, %v5960_v10 }
 0x1e7   : > { %v2603_v48 = vpop.f32.mrf.mxu1 }
 0x1e8   : > { %v2942_v27 = vadd.f32 %v4616_v32, %v2732_v19  ;;  %v2730_v51 = vadd.f32 %v2603_v48, %v6076_v6  ;;  %v4620_v52 = vpop.f32.mrf.mxu0  ;;  %v2301_v54 = vadd.f32 %v6092_v30, %v2087_v45 }
 0x1e9   : > { %v4583_v20 = vpop.f32.mrf.mxu1 }
 0x1ea   : > { %v2940_v47 = vadd.f32 %v2813_v25, %v2730_v51  ;;  %v2733_v43 = vadd.f32 %v4583_v20, %v2503_v13  ;;  %v2829_v55 = vpop.f32.mrf.mxu0  ;;  %v2981_v44 = vadd.f32 %v6183_v41, %v2942_v27  ;;  %v2505_v8 = vadd.f32 %v6083_v9, %v2301_v54 }
 0x1eb   : > { %v2606_v56 = vpop.f32.mrf.mxu1 }
 0x1ec   : > { %v2943_v32 = vadd.f32 %v4617_v57, %v2733_v43  ;;  %v2731_v6 = vadd.f32 %v2606_v56, %v2501_v22  ;;  %v4621_v29 = vpop.f32.mrf.mxu0  ;;  %v2979_v0 = vadd.f32 %v6183_v41, %v2940_v47  ;;  %v3013_v48 = vmax.f32 %v2981_v44, 0.0 }
 0x1ed   : > { %v4586_v19 = vpop.f32.mrf.mxu1 }
 0x1ee   : > { %v2982_v51 = vadd.f32 %v6183_v41, %v2943_v32  ;;  %v2941_v25 = vadd.f32 %v2816_v50, %v2731_v6  ;;  %v2736_v61 = vadd.f32 %v4586_v19, %v6085_v60  ;;  %v2832_v59 = vpop.f32.mrf.mxu0  ;;  %v3011_v47 = vmax.f32 %v2979_v0, 0.0 }
 0x1ef   : > { %v2619_v10 = vpop.f32.mrf.mxu1 }
 0x1f0   : > { %v3014_v13 = vmax.f32 %v2982_v51, 0.0  ;;  %v2980_v57 = vadd.f32 %v6183_v41, %v2941_v25  ;;  %v2734_v27 = vadd.f32 %v2619_v10, %v6090_v39  ;;  %v4624_v20 = vpop.f32.mrf.mxu0  ;;  %v2946_v30 = vadd.f32 %v4620_v52, %v2736_v61 }
 0x1f1   : > { %v4587_v22 = vpop.f32.mrf.mxu1  ;;  %v2091_v39 = vadd.f32 %v5965_v18, %v5978_v40 }
 0x1f2   : > { %v3044_v43 = vpack.c.bf16 %v3014_v13, %v3013_v48  ;;  %v3012_v50 = vmax.f32 %v2980_v57, 0.0  ;;  %v2944_v45 = vadd.f32 %v2829_v55, %v2734_v27  ;;  %v2845_v60 = vpop.f32.mrf.mxu0  ;;  %v2737_v56 = vadd.f32 %v4587_v22, %v2507_v3 }
 0x1f3   : > { %v2622_v32 = vpop.f32.mrf.mxu1  ;;  %v2985_v33 = vadd.f32 %v6183_v41, %v2946_v30  ;;  %v2305_v51 = vadd.f32 %v6103_v31, %v2091_v39 }
 0x1f4   : > { %v3043_v44 = vpack.c.bf16 %v3012_v50, %v3011_v47  ;;  %v2735_v6 = vadd.f32 %v2622_v32, %v2505_v8  ;;  %v4625_v19 = vpop.f32.mrf.mxu0  ;;  %v2947_v16 = vadd.f32 %v4621_v29, %v2737_v56  ;;  %v2983_v52 = vadd.f32 %v6183_v41, %v2944_v45 }
 0x1f5   : > { %v4590_v9 = vpop.f32.mrf.mxu1  ;;  %v3017_v48 = vmax.f32 %v2985_v33, 0.0  ;;  %v2509_v31 = vadd.f32 %v6095_v62, %v2305_v51  ;;  %v2095_v47 = vadd.f32 %v5983_v42, %v5996_v63 }
 0x1f6   : > { %v2945_v54 = vadd.f32 %v2832_v59, %v2735_v6  ;;  %v2740_v0 = vadd.f32 %v4590_v9, %v6097_v24  ;;  %4682 = vmatprep.mubr.msk.bf16.mxu0 %vm3232_vm8, %v3043_v44  ;;  %v2848_v55 = vpop.f32.mrf.mxu0  ;;  %v2986_v25 = vadd.f32 %v6183_v41, %v2947_v16  ;;  %v3015_v24 = vmax.f32 %v2983_v52, 0.0 }
 0x1f7   : > { %v2635_v61 = vpop.f32.mrf.mxu1  ;;  %4683 = vmatmul.mubr.msk.bf16.vlgmr.msra.gmra.mxu0 %vm3232_vm8, %v3044_v43  ;;  %v2309_v32 = vadd.f32 %v6116_v14, %v2095_v47 }
 0x1f8   : > { %v2984_v18 = vadd.f32 %v6183_v41, %v2945_v54  ;;  %v2950_v40 = vadd.f32 %v4624_v20, %v2740_v0  ;;  %v2738_v29 = vadd.f32 %v2635_v61, %v6100_v58  ;;  %v4628_v10 = vpop.f32.mrf.mxu0  ;;  %v3018_v59 = vmax.f32 %v2986_v25, 0.0 }
 0x1f9   : > { %v4591_v13 = vpop.f32.mrf.mxu1 }
 0x1fa   : > { %v3016_v57 = vmax.f32 %v2984_v18, 0.0  ;;  %v2741_v27 = vadd.f32 %v4591_v13, %v6105_v28  ;;  %v2861_v3 = vpop.f32.mrf.mxu0  ;;  %v3046_v8 = vpack.c.bf16 %v3018_v59, %v3017_v48  ;;  %v2948_v30 = vadd.f32 %v2845_v60, %v2738_v29 }
 0x1fb   : > { %v2638_v22 = vpop.f32.mrf.mxu1  ;;  %v2989_v58 = vadd.f32 %v6183_v41, %v2950_v40 }
 0x1fc   : > { %v3045_v20 = vpack.c.bf16 %v3016_v57, %v3015_v24  ;;  %v2951_v43 = vadd.f32 %v4625_v19, %v2741_v27  ;;  %v4629_v50 = vpop.f32.mrf.mxu0  ;;  %v2739_v45 = vadd.f32 %v2638_v22, %v2509_v31  ;;  %v2987_v60 = vadd.f32 %v6183_v41, %v2948_v30 }
 0x1fd   : > { %v4594_v56 = vpop.f32.mrf.mxu1  ;;  %v3021_v63 = vmax.f32 %v2989_v58, 0.0 }
 0x1fe   : > { %v2990_v28 = vadd.f32 %v6183_v41, %v2951_v43  ;;  %v2744_v44 = vadd.f32 %v4594_v56, %v6110_v1  ;;  %4686 = vmatprep.mubr.msk.bf16.mxu0 %vm3232_vm8, %v3045_v20  ;;  %v2864_v62 = vpop.f32.mrf.mxu0  ;;  %v2949_v6 = vadd.f32 %v2848_v55, %v2739_v45  ;;  %v2513_v1 = vadd.f32 %v6108_v11, %v2309_v32 }
 0x1ff   : > { %v2651_v42 = vpop.f32.mrf.mxu1  ;;  %4687 = vmatmul.mubr.msk.bf16.gmra.mxu0 %vm3232_vm8, %v3046_v8  ;;  %v3019_v55 = vmax.f32 %v2987_v60, 0.0 }
 0x200   : > { %v3022_v19 = vmax.f32 %v2990_v28, 0.0  ;;  %v2954_v39 = vadd.f32 %v4628_v10, %v2744_v44  ;;  %v2742_v33 = vadd.f32 %v2651_v42, %v6113_v2  ;;  %v4632_v16 = vpop.f32.mrf.mxu0  ;;  %v2988_v14 = vadd.f32 %v6183_v41, %v2949_v6 }
 0x201   : > { %v4595_v9 = vpop.f32.mrf.mxu1  ;;  %v2313_v2 = vadd.f32 %v6129_v37, %v6018_v15 }
 0x202   : > { %v3048_v52 = vpack.c.bf16 %v3022_v19, %v3021_v63  ;;  %v2952_v54 = vadd.f32 %v2861_v3, %v2742_v33  ;;  %v2745_v0 = vadd.f32 %v4595_v9, %v6118_v21  ;;  %v2877_v51 = vpop.f32.mrf.mxu0  ;;  %v3020_v25 = vmax.f32 %v2988_v14, 0.0 }
 0x203   : > { %v2654_v61 = vpop.f32.mrf.mxu1  ;;  %v2993_v18 = vadd.f32 %v6183_v41, %v2954_v39  ;;  %v2517_v37 = vadd.f32 %v6121_v49, %v2313_v2  ;;  %v2317_v19 = vadd.f32 %v6142_v46, %v6034_v5  ;;  %v6511_v5 = vld [vmem:[#allocation12_spill] sm:$0xff] }
 0x204   : > { %v2955_v40 = vadd.f32 %v4629_v50, %v2745_v0  ;;  %v2743_v29 = vadd.f32 %v2654_v61, %v2513_v1  ;;  %v4633_v10 = vpop.f32.mrf.mxu0  ;;  %v3047_v48 = vpack.c.bf16 %v3020_v25, %v3019_v55  ;;  %v2991_v11 = vadd.f32 %v6183_v41, %v2952_v54 }
 0x205   : > { %v4598_v59 = vpop.f32.mrf.mxu1  ;;  %v3025_v3 = vmax.f32 %v2993_v18, 0.0  ;;  %v2521_v46 = vadd.f32 %v6511_v5, %v2317_v19 }
 0x206   : > { %v2994_v13 = vadd.f32 %v6183_v41, %v2955_v40  ;;  %v2953_v24 = vadd.f32 %v2864_v62, %v2743_v29  ;;  %v2748_v21 = vadd.f32 %v4598_v59, %v6123_v38  ;;  %v2880_v57 = vpop.f32.mrf.mxu0  ;;  %4690 = vmatprep.mubr.msk.bf16.mxu0 %vm3232_vm8, %v3047_v48  ;;  %v3023_v20 = vmax.f32 %v2991_v11, 0.0  ;;  %v6512_v11 = vld [vmem:[#allocation5_spill] sm:$0xff] }
 0x207   : > { %v2667_v27 = vpop.f32.mrf.mxu1  ;;  %4691 = vmatmul.mubr.msk.bf16.gmra.mxu0 %vm3232_vm8, %v3048_v52 }
 0x208   : > { %v3026_v31 = vmax.f32 %v2994_v13, 0.0  ;;  %v2992_v8 = vadd.f32 %v6183_v41, %v2953_v24  ;;  %v2746_v30 = vadd.f32 %v2667_v27, %v6126_v53  ;;  %v4636_v15 = vpop.f32.mrf.mxu0  ;;  %v2958_v22 = vadd.f32 %v4632_v16, %v2748_v21 }
 0x209   : > { %v4599_v47 = vpop.f32.mrf.mxu1  ;;  %v2321_v13 = vadd.f32 %v6155_v26, %v6512_v11 }
 0x20a   : > { %v3050_v58 = vpack.c.bf16 %v3026_v31, %v3025_v3  ;;  %v3024_v38 = vmax.f32 %v2992_v8, 0.0  ;;  %v2956_v43 = vadd.f32 %v2877_v51, %v2746_v30  ;;  %v2893_v50 = vpop.f32.mrf.mxu0  ;;  %v2749_v45 = vadd.f32 %v4599_v47, %v6131_v7  ;;  %v6510_v51 = vld [vmem:[#allocation14_spill] sm:$0xff] }
 0x20b   : > { %v2670_v56 = vpop.f32.mrf.mxu1  ;;  %v2997_v53 = vadd.f32 %v6183_v41, %v2958_v22 }
 0x20c   : > { %v3049_v32 = vpack.c.bf16 %v3024_v38, %v3023_v20  ;;  %v2747_v28 = vadd.f32 %v2670_v56, %v2517_v37  ;;  %v4637_v44 = vpop.f32.mrf.mxu0  ;;  %v2959_v62 = vadd.f32 %v4633_v10, %v2749_v45  ;;  %v2995_v6 = vadd.f32 %v6183_v41, %v2956_v43  ;;  %v6513_v20 = vld [vmem:[#allocation17_spill] sm:$0xff]  ;;  %v6514_v43 = vld [vmem:[#allocation22_spill] sm:$0xff] }
 0x20d   : > { %v4602_v60 = vpop.f32.mrf.mxu1  ;;  %v3029_v1 = vmax.f32 %v2997_v53, 0.0 }
 0x20e   : > { %v2957_v49 = vadd.f32 %v2880_v57, %v2747_v28  ;;  %v2752_v42 = vadd.f32 %v4602_v60, %v6136_v17  ;;  %4694 = vmatprep.mubr.msk.bf16.mxu0 %vm3232_vm8, %v3049_v32  ;;  %v2896_v63 = vpop.f32.mrf.mxu0  ;;  %v2998_v7 = vadd.f32 %v6183_v41, %v2959_v62  ;;  %v3027_v54 = vmax.f32 %v2995_v6, 0.0 }
 0x20f   : > { %v2683_v39 = vpop.f32.mrf.mxu1  ;;  %4695 = vmatmul.mubr.msk.bf16.gmra.mxu0 %vm3232_vm8, %v3050_v58 }
 0x210   : > { %v2996_v33 = vadd.f32 %v6183_v41, %v2957_v49  ;;  %v2962_v16 = vadd.f32 %v4636_v15, %v2752_v42  ;;  %v2750_v14 = vadd.f32 %v2683_v39, %v6139_v34  ;;  %v4640_v9 = vpop.f32.mrf.mxu0  ;;  %v3030_v52 = vmax.f32 %v2998_v7, 0.0 }
 0x211   : > { %v4603_v17 = vpop.f32.mrf.mxu1 }
 0x212   : > { %v3028_v0 = vmax.f32 %v2996_v33, 0.0  ;;  %v2753_v55 = vadd.f32 %v4603_v17, %v6510_v51  ;;  %v2909_v25 = vpop.f32.mrf.mxu0  ;;  %v3052_v61 = vpack.c.bf16 %v3030_v52, %v3029_v1  ;;  %v2960_v18 = vadd.f32 %v2893_v50, %v2750_v14 }
 0x213   : > { %v2686_v40 = vpop.f32.mrf.mxu1  ;;  %v3001_v10 = vadd.f32 %v6183_v41, %v2962_v16 }
 0x214   : > { %v3051_v29 = vpack.c.bf16 %v3028_v0, %v3027_v54  ;;  %v2963_v34 = vadd.f32 %v4637_v44, %v2753_v55  ;;  %v4641_v2 = vpop.f32.mrf.mxu0  ;;  %v2751_v48 = vadd.f32 %v2686_v40, %v2521_v46  ;;  %v2999_v27 = vadd.f32 %v6183_v41, %v2960_v18 }
 0x215   : > { %v4606_v59 = vpop.f32.mrf.mxu1  ;;  %v3033_v8 = vmax.f32 %v3001_v10, 0.0 }
 0x216   : > { %v3002_v24 = vadd.f32 %v6183_v41, %v2963_v34  ;;  %v2756_v21 = vadd.f32 %v4606_v59, %v6149_v4  ;;  %4698 = vmatprep.mubr.msk.bf16.mxu0 %vm3232_vm8, %v3051_v29  ;;  %v2912_v57 = vpop.f32.mrf.mxu0  ;;  %v2961_v3 = vadd.f32 %v2896_v63, %v2751_v48  ;;  %v2525_v4 = vadd.f32 %v6513_v20, %v2321_v13 }
 0x217   : > { %v2699_v31 = vpop.f32.mrf.mxu1  ;;  %4699 = vmatmul.mubr.msk.bf16.gmra.mxu0 %vm3232_vm8, %v3052_v61  ;;  %v3031_v45 = vmax.f32 %v2999_v27, 0.0 }
 0x218   : > { %v3034_v30 = vmax.f32 %v3002_v24, 0.0  ;;  %v2966_v15 = vadd.f32 %v4640_v9, %v2756_v21  ;;  %v2754_v37 = vadd.f32 %v2699_v31, %v6152_v35  ;;  %v3000_v26 = vadd.f32 %v6183_v41, %v2961_v3  ;;  %v4644_v47 = vpop.f32.mrf.mxu0  ;;  %v6515_v35 = vld [vmem:[#allocation10_spill] sm:$0xff] }
 0x219   : > { %v4607_v22 = vpop.f32.mrf.mxu1  ;;  %v2325_v62 = vadd.f32 %v6168_v23, %v6515_v35  ;;  %v6516_v9 = vld [vmem:[#allocation2_spill] sm:$0xff]  ;;  %v6517_v23 = vld [vmem:[#allocation24_spill] sm:$0xff] }
 0x21a   : > { %v3054_v58 = vpack.c.bf16 %v3034_v30, %v3033_v8  ;;  %v2964_v38 = vadd.f32 %v2909_v25, %v2754_v37  ;;  %v2757_v50 = vadd.f32 %v4607_v22, %v6514_v43  ;;  %v3032_v56 = vmax.f32 %v3000_v26, 0.0  ;;  %v2925_v49 = vpop.f32.mrf.mxu0 }
 0x21b   : > { %v2702_v32 = vpop.f32.mrf.mxu1  ;;  %v3005_v28 = vadd.f32 %v6183_v41, %v2966_v15  ;;  %v2529_v52 = vadd.f32 %v6517_v23, %v2325_v62 }
 0x21c   : > { %v2967_v44 = vadd.f32 %v4641_v2, %v2757_v50  ;;  %v2755_v53 = vadd.f32 %v2702_v32, %v2525_v4  ;;  %v3053_v60 = vpack.c.bf16 %v3032_v56, %v3031_v45  ;;  %v3003_v42 = vadd.f32 %v6183_v41, %v2964_v38  ;;  %v4645_v0 = vpop.f32.mrf.mxu0  ;;  %v6294_v56 = vld [vmem:[%s6375_s5] ss:$0 sm:$0xff] }
 0x21d   : > { %v4610_v6 = vpop.f32.mrf.mxu1  ;;  %v3037_v33 = vmax.f32 %v3005_v28, 0.0 }
 0x21e   : > { %v3006_v63 = vadd.f32 %v6183_v41, %v2967_v44  ;;  %v2965_v19 = vadd.f32 %v2912_v57, %v2755_v53  ;;  %v2760_v7 = vadd.f32 %v4610_v6, %v6162_v12  ;;  %4702 = vmatprep.mubr.msk.bf16.mxu0 %vm3232_vm8, %v3053_v60  ;;  %v3035_v51 = vmax.f32 %v3003_v42, 0.0  ;;  %v2928_v10 = vpop.f32.mrf.mxu0 }
 0x21f   : > { %v2715_v39 = vpop.f32.mrf.mxu1  ;;  %4703 = vmatmul.mubr.msk.bf16.gmra.mxu0 %vm3232_vm8, %v3054_v58 }
 0x220   : > { %v3038_v16 = vmax.f32 %v3006_v63, 0.0  ;;  %v3004_v14 = vadd.f32 %v6183_v41, %v2965_v19  ;;  %v2758_v1 = vadd.f32 %v2715_v39, %v6516_v9  ;;  %v2970_v17 = vadd.f32 %v4644_v47, %v2760_v7 }
 0x221   : > { %v4611_v54 = vpop.f32.mrf.mxu1 }
 0x222   : > { %v3056_v55 = vpack.c.bf16 %v3038_v16, %v3037_v33  ;;  %v3036_v25 = vmax.f32 %v3004_v14, 0.0  ;;  %v2968_v12 = vadd.f32 %v2925_v49, %v2758_v1  ;;  %v2761_v5 = vadd.f32 %v4611_v54, %v6174_v36 }
 0x223   : > { %v2718_v46 = vpop.f32.mrf.mxu1  ;;  %v3009_v40 = vadd.f32 %v6183_v41, %v2970_v17 }
 0x224   : > { %v3055_v61 = vpack.c.bf16 %v3036_v25, %v3035_v51  ;;  %v2759_v18 = vadd.f32 %v2718_v46, %v2529_v52  ;;  %v2971_v29 = vadd.f32 %v4645_v0, %v2761_v5  ;;  %v3007_v34 = vadd.f32 %v6183_v41, %v2968_v12 }
 0x225   : > { %v3041_v11 = vmax.f32 %v3009_v40, 0.0  ;;  %v4650_v27 = vpop.f32.mrf.mxu1 }
 0x226   : > { %v2969_v2 = vadd.f32 %v2928_v10, %v2759_v18  ;;  %4706 = vmatprep.mubr.msk.bf16.mxu0 %vm3232_vm8, %v3055_v61  ;;  %v3010_v48 = vadd.f32 %v6183_v41, %v2971_v29  ;;  %v3039_v13 = vmax.f32 %v3007_v34, 0.0 }
 0x227   : > { %4707 = vmatmul.mubr.msk.bf16.gmra.mxu0 %vm3232_vm8, %v3056_v55  ;;  %v3099_v3 = vpop.f32.mrf.mxu1 }
 0x228   : > { %v3008_v59 = vadd.f32 %v6183_v41, %v2969_v2  ;;  %v3042_v36 = vmax.f32 %v3010_v48, 0.0 }
 0x229   : > { %v4651_v31 = vpop.f32.mrf.mxu1 }
 0x22a   : > { %v3040_v24 = vmax.f32 %v3008_v59, 0.0  ;;  %v3058_v21 = vpack.c.bf16 %v3042_v36, %v3041_v11 }
 0x22b   : > { %v3102_v8 = vpop.f32.mrf.mxu1 }
 0x22c   : > { %v3057_v57 = vpack.c.bf16 %v3040_v24, %v3039_v13 }
 0x22d   : > { %v4654_v30 = vpop.f32.mrf.mxu1 }
 0x22e   : > { %4710 = vmatprep.mubr.msk.bf16.mxu0 %vm3232_vm8, %v3057_v57 }
 0x22f   : > { %4711 = vmatmul.mubr.msk.bf16.gmra.mxu0 %vm3232_vm8, %v3058_v21  ;;  %v3115_v15 = vpop.f32.mrf.mxu1 }
 0x231   : > { %v4655_v37 = vpop.f32.mrf.mxu1 }
 0x233   : > { %v3118_v41 = vpop.f32.mrf.mxu1 }
 0x235   : > { %v4658_v26 = vpop.f32.mrf.mxu1 }
 0x237   : > { %v3131_v22 = vpop.f32.mrf.mxu1 }
 0x239   : > { %v4659_v47 = vpop.f32.mrf.mxu1 }
 0x23b   : > { %v6281_v20 = vpop.f32.mrf.mxu1 }
 0x23d   : > { %v6283_v4 = vpop.f32.mrf.mxu1 }
 0x23f   : > { %v6285_v58 = vpop.f32.mrf.mxu1 }
 0x241   : > { %v6287_v38 = vpop.f32.mrf.mxu1 }
 0x243   : > { %v6289_v43 = vpop.f32.mrf.mxu1 }
 0x245   : > { %v6296_v44 = vpop.f32.mrf.mxu1 }
 0x247   : > { %v6302_v63 = vpop.f32.mrf.mxu1 }
 0x249   : > { %v6310_v17 = vpop.f32.mrf.mxu1 }
 0x24b   : > { %v6317_v61 = vpop.f32.mrf.mxu1 }
 0x24d   : > { %v4670_v36 = vpop.f32.mrf.mxu1 }
 0x2b7   : > { %v4684_v50 = vpop.f32.mrf.mxu0 }
 0x2b8   : > { %v3324_v45 = vadd.f32 %v4684_v50, %v4650_v27 }
 0x2b9   : > { %v3315_v32 = vpop.f32.mrf.mxu0 }
 0x2ba   : > { %v3316_v28 = vadd.f32 %v3315_v32, %v3099_v3  ;;  %v3451_v35 = vadd.f32 %v6294_v56, %v3324_v45 }
 0x2bb   : > { %v4685_v53 = vpop.f32.mrf.mxu0 }
 0x2bc   : > { %v3327_v62 = vadd.f32 %v4685_v53, %v4651_v31  ;;  %v3449_v6 = vadd.f32 %v6294_v56, %v3316_v28  ;;  %v3483_v7 = vmax.f32 %v3451_v35, 0.0  ;;  %v3179_v31 = vpop.f32.mrf.mxu1 }
 0x2bd   : > { %v3318_v60 = vpop.f32.mrf.mxu0 }
 0x2be   : > { %v3452_v49 = vadd.f32 %v6294_v56, %v3327_v62  ;;  %v3319_v42 = vadd.f32 %v3318_v60, %v3102_v8  ;;  %v3481_v9 = vmax.f32 %v3449_v6, 0.0 }
 0x2bf   : > { %v4688_v19 = vpop.f32.mrf.mxu0 }
 0x2c0   : > { %v3484_v39 = vmax.f32 %v3452_v49, 0.0  ;;  %v3450_v33 = vadd.f32 %v6294_v56, %v3319_v42  ;;  %v3340_v16 = vadd.f32 %v4688_v19, %v4654_v30 }
 0x2c1   : > { %v3331_v14 = vpop.f32.mrf.mxu0 }
 0x2c2   : > { %v4066_v1 = vpack.c.bf16 %v3484_v39, %v3483_v7  ;;  %v3482_v23 = vmax.f32 %v3450_v33, 0.0  ;;  %v3332_v52 = vadd.f32 %v3331_v14, %v3115_v15  ;;  %v3455_v51 = vadd.f32 %v6294_v56, %v3340_v16 }
 0x2c3   : > { %v4689_v54 = vpop.f32.mrf.mxu0 }
 0x2c4   : > { %4138 = vst [vmem:[%s6308_s26 + $0x8] sm:$0xff] %v4066_v1   ;;  %v4061_v0 = vpack.c.bf16 %v3482_v23, %v3481_v9  ;;  %v3343_v55 = vadd.f32 %v4689_v54, %v4655_v37  ;;  %v3453_v12 = vadd.f32 %v6294_v56, %v3332_v52  ;;  %v3487_v18 = vmax.f32 %v3455_v51, 0.0 }
 0x2c5   : > { %v3334_v25 = vpop.f32.mrf.mxu0 }
 0x2c6   : > { %4062 = vst [vmem:[%s6308_s26] sm:$0xff] %v4061_v0   ;;  %v3456_v5 = vadd.f32 %v6294_v56, %v3343_v55  ;;  %v3335_v46 = vadd.f32 %v3334_v25, %v3118_v41  ;;  %v3485_v2 = vmax.f32 %v3453_v12, 0.0 }
 0x2c7   : > { %v4692_v10 = vpop.f32.mrf.mxu0 }
 0x2c8   : > { %v3488_v40 = vmax.f32 %v3456_v5, 0.0  ;;  %v3454_v29 = vadd.f32 %v6294_v56, %v3335_v46  ;;  %v3356_v34 = vadd.f32 %v4692_v10, %v4658_v26 }
 0x2c9   : > { %v3347_v11 = vpop.f32.mrf.mxu0 }
 0x2ca   : > { %v4076_v48 = vpack.c.bf16 %v3488_v40, %v3487_v18  ;;  %v3486_v59 = vmax.f32 %v3454_v29, 0.0  ;;  %v3348_v13 = vadd.f32 %v3347_v11, %v3131_v22  ;;  %v3459_v57 = vadd.f32 %v6294_v56, %v3356_v34 }
 0x2cb   : > { %v4693_v21 = vpop.f32.mrf.mxu0 }
 0x2cc   : > { %4140 = vst [vmem:[%s6308_s26 + $0x18] sm:$0xff] %v4076_v48   ;;  %v4071_v24 = vpack.c.bf16 %v3486_v59, %v3485_v2  ;;  %v3359_v27 = vadd.f32 %v4693_v21, %v4659_v47  ;;  %v3457_v8 = vadd.f32 %v6294_v56, %v3348_v13  ;;  %v3491_v41 = vmax.f32 %v3459_v57, 0.0  ;;  %v4671_v47 = vpop.f32.mrf.mxu1 }
 0x2cd   : > { %v3350_v3 = vpop.f32.mrf.mxu0 }
 0x2ce   : > { %4139 = vst [vmem:[%s6308_s26 + $0x10] sm:$0xff] %v4071_v24   ;;  %v3460_v30 = vadd.f32 %v6294_v56, %v3359_v27  ;;  %v3351_v15 = vadd.f32 %v3350_v3, %v6281_v20  ;;  %v3489_v32 = vmax.f32 %v3457_v8, 0.0  ;;  %v3182_v42 = vpop.f32.mrf.mxu1 }
 0x2cf   : > { %v4696_v37 = vpop.f32.mrf.mxu0 }
 0x2d0   : > { %v3492_v26 = vmax.f32 %v3460_v30, 0.0  ;;  %v3458_v22 = vadd.f32 %v6294_v56, %v3351_v15  ;;  %v3372_v50 = vadd.f32 %v4696_v37, %v6283_v4 }
 0x2d1   : > { %v3363_v45 = vpop.f32.mrf.mxu0 }
 0x2d2   : > { %v4086_v28 = vpack.c.bf16 %v3492_v26, %v3491_v41  ;;  %v3490_v53 = vmax.f32 %v3458_v22, 0.0  ;;  %v3364_v35 = vadd.f32 %v3363_v45, %v6285_v58  ;;  %v3463_v20 = vadd.f32 %v6294_v56, %v3372_v50 }
 0x2d3   : > { %v4697_v62 = vpop.f32.mrf.mxu0 }
 0x2d4   : > { %4142 = vst [vmem:[%s6308_s26 + $0x28] sm:$0xff] %v4086_v28   ;;  %v4081_v60 = vpack.c.bf16 %v3490_v53, %v3489_v32  ;;  %v3375_v6 = vadd.f32 %v4697_v62, %v6287_v38  ;;  %v3461_v4 = vadd.f32 %v6294_v56, %v3364_v35  ;;  %v3495_v33 = vmax.f32 %v3463_v20, 0.0  ;;  %v4674_v38 = vpop.f32.mrf.mxu1 }
 0x2d5   : > { %v3366_v49 = vpop.f32.mrf.mxu0 }
 0x2d6   : > { %4141 = vst [vmem:[%s6308_s26 + $0x20] sm:$0xff] %v4081_v60   ;;  %v3464_v19 = vadd.f32 %v6294_v56, %v3375_v6  ;;  %v3367_v7 = vadd.f32 %v3366_v49, %v6289_v43  ;;  %v3493_v1 = vmax.f32 %v3461_v4, 0.0  ;;  %v3195_v12 = vpop.f32.mrf.mxu1 }
 0x2d7   : > { %v4700_v39 = vpop.f32.mrf.mxu0 }
 0x2d8   : > { %v3496_v58 = vmax.f32 %v3464_v19, 0.0  ;;  %v3462_v16 = vadd.f32 %v6294_v56, %v3367_v7  ;;  %v3388_v14 = vadd.f32 %v4700_v39, %v6296_v44  ;;  %v4675_v2 = vpop.f32.mrf.mxu1 }
 0x2d9   : > { %v3379_v9 = vpop.f32.mrf.mxu0 }
 0x2da   : > { %v4096_v23 = vpack.c.bf16 %v3496_v58, %v3495_v33  ;;  %v3494_v52 = vmax.f32 %v3462_v16, 0.0  ;;  %v3380_v54 = vadd.f32 %v3379_v9, %v6302_v63  ;;  %v3467_v43 = vadd.f32 %v6294_v56, %v3388_v14  ;;  %v3198_v27 = vpop.f32.mrf.mxu1 }
 0x2db   : > { %v4701_v0 = vpop.f32.mrf.mxu0 }
 0x2dc   : > { %4144 = vst [vmem:[%s6308_s26 + $0x38] sm:$0xff] %v4096_v23   ;;  %v4091_v51 = vpack.c.bf16 %v3494_v52, %v3493_v1  ;;  %v3391_v55 = vadd.f32 %v4701_v0, %v6310_v17  ;;  %v3465_v44 = vadd.f32 %v6294_v56, %v3380_v54  ;;  %v3499_v40 = vmax.f32 %v3467_v43, 0.0  ;;  %v4678_v26 = vpop.f32.mrf.mxu1 }
 0x2dd   : > { %v3382_v25 = vpop.f32.mrf.mxu0 }
 0x2de   : > { %4143 = vst [vmem:[%s6308_s26 + $0x30] sm:$0xff] %v4091_v51   ;;  %v3468_v5 = vadd.f32 %v6294_v56, %v3391_v55  ;;  %v3383_v46 = vadd.f32 %v3382_v25, %v6317_v61  ;;  %v3497_v17 = vmax.f32 %v3465_v44, 0.0  ;;  %v3211_v60 = vpop.f32.mrf.mxu1 }
 0x2df   : > { %v4704_v18 = vpop.f32.mrf.mxu0 }
 0x2e0   : > { %v3500_v63 = vmax.f32 %v3468_v5, 0.0  ;;  %v3466_v29 = vadd.f32 %v6294_v56, %v3383_v46  ;;  %v3404_v10 = vadd.f32 %v4704_v18, %v4670_v36  ;;  %v4679_v58 = vpop.f32.mrf.mxu1 }
 0x2e1   : > { %v3395_v34 = vpop.f32.mrf.mxu0 }
 0x2e2   : > { %v4106_v48 = vpack.c.bf16 %v3500_v63, %v3499_v40  ;;  %v3498_v59 = vmax.f32 %v3466_v29, 0.0  ;;  %v3396_v11 = vadd.f32 %v3395_v34, %v3179_v31  ;;  %v3471_v21 = vadd.f32 %v6294_v56, %v3404_v10  ;;  %v3214_v51 = vpop.f32.mrf.mxu1 }
 0x2e3   : > { %v4705_v13 = vpop.f32.mrf.mxu0 }
 0x2e4   : > { %4146 = vst [vmem:[%s6308_s26 + $0x48] sm:$0xff] %v4106_v48   ;;  %v4101_v24 = vpack.c.bf16 %v3498_v59, %v3497_v17  ;;  %v3407_v57 = vadd.f32 %v4705_v13, %v4671_v47  ;;  %v3469_v3 = vadd.f32 %v6294_v56, %v3396_v11  ;;  %v3503_v15 = vmax.f32 %v3471_v21, 0.0 }
 0x2e5   : > { %v3398_v61 = vpop.f32.mrf.mxu0 }
 0x2e6   : > { %4145 = vst [vmem:[%s6308_s26 + $0x40] sm:$0xff] %v4101_v24   ;;  %v3472_v36 = vadd.f32 %v6294_v56, %v3407_v57  ;;  %v3399_v8 = vadd.f32 %v3398_v61, %v3182_v42  ;;  %v3501_v50 = vmax.f32 %v3469_v3, 0.0 }
 0x2e7   : > { %v4708_v30 = vpop.f32.mrf.mxu0 }
 0x2e8   : > { %v3504_v37 = vmax.f32 %v3472_v36, 0.0  ;;  %v3470_v31 = vadd.f32 %v6294_v56, %v3399_v8  ;;  %v3420_v41 = vadd.f32 %v4708_v30, %v4674_v38 }
 0x2e9   : > { %v3411_v22 = vpop.f32.mrf.mxu0 }
 0x2ea   : > { %v4116_v45 = vpack.c.bf16 %v3504_v37, %v3503_v15  ;;  %v3502_v47 = vmax.f32 %v3470_v31, 0.0  ;;  %v3412_v32 = vadd.f32 %v3411_v22, %v3195_v12  ;;  %v3475_v35 = vadd.f32 %v6294_v56, %v3420_v41 }
 0x2eb   : > { %v4709_v28 = vpop.f32.mrf.mxu0 }
 0x2ec   : > { %4148 = vst [vmem:[%s6308_s26 + $0x58] sm:$0xff] %v4116_v45   ;;  %v4111_v53 = vpack.c.bf16 %v3502_v47, %v3501_v50  ;;  %v3423_v62 = vadd.f32 %v4709_v28, %v4675_v2  ;;  %v3473_v6 = vadd.f32 %v6294_v56, %v3412_v32  ;;  %v3507_v19 = vmax.f32 %v3475_v35, 0.0 }
 0x2ed   : > { %v3414_v20 = vpop.f32.mrf.mxu0 }
 0x2ee   : > { %4147 = vst [vmem:[%s6308_s26 + $0x50] sm:$0xff] %v4111_v53   ;;  %v3476_v49 = vadd.f32 %v6294_v56, %v3423_v62  ;;  %v3415_v42 = vadd.f32 %v3414_v20, %v3198_v27  ;;  %v3505_v14 = vmax.f32 %v3473_v6, 0.0 }
 0x2ef   : > { %v4712_v4 = vpop.f32.mrf.mxu0 }
 0x2f0   : > { %v3508_v7 = vmax.f32 %v3476_v49, 0.0  ;;  %v3474_v39 = vadd.f32 %v6294_v56, %v3415_v42  ;;  %v3436_v33 = vadd.f32 %v4712_v4, %v4678_v26 }
 0x2f1   : > { %v3427_v16 = vpop.f32.mrf.mxu0 }
 0x2f2   : > { %v4126_v9 = vpack.c.bf16 %v3508_v7, %v3507_v19  ;;  %v3506_v38 = vmax.f32 %v3474_v39, 0.0  ;;  %v3428_v1 = vadd.f32 %v3427_v16, %v3211_v60  ;;  %v3479_v54 = vadd.f32 %v6294_v56, %v3436_v33 }
 0x2f3   : > { %v4713_v23 = vpop.f32.mrf.mxu0 }
 0x2f4   : > { %4150 = vst [vmem:[%s6308_s26 + $0x68] sm:$0xff] %v4126_v9   ;;  %v4121_v52 = vpack.c.bf16 %v3506_v38, %v3505_v14  ;;  %v3439_v0 = vadd.f32 %v4713_v23, %v4679_v58  ;;  %v3477_v55 = vadd.f32 %v6294_v56, %v3428_v1  ;;  %v3511_v44 = vmax.f32 %v3479_v54, 0.0 }
 0x2f5   : > { %v3430_v43 = vpop.f32.mrf.mxu0 }
 0x2f6   : > { %4149 = vst [vmem:[%s6308_s26 + $0x60] sm:$0xff] %v4121_v52   ;;  %v3480_v25 = vadd.f32 %v6294_v56, %v3439_v0  ;;  %v3431_v12 = vadd.f32 %v3430_v43, %v3214_v51  ;;  %v3509_v18 = vmax.f32 %v3477_v55, 0.0 }
 0x2f8   : > { %v3512_v5 = vmax.f32 %v3480_v25, 0.0  ;;  %v3478_v46 = vadd.f32 %v6294_v56, %v3431_v12 }
 0x2fa   : > { %v4136_v40 = vpack.c.bf16 %v3512_v5, %v3511_v44  ;;  %v3510_v63 = vmax.f32 %v3478_v46, 0.0 }
 0x2fc   : > { %4152 = vst [vmem:[%s6308_s26 + $0x78] sm:$0xff] %v4136_v40   ;;  %v4131_v29 = vpack.c.bf16 %v3510_v63, %v3509_v18 }
 0x2fe   : > { %4151 = vst [vmem:[%s6308_s26 + $0x70] sm:$0xff] %v4131_v29  }
 0x2ff PF: > { %s16_s21 = sadd.s32 1, %s4765_s21  }
 0x300   : > { %p13_p4 = scmp.ge.s32.totalorder %s16_s21, 4  }
 0x302   :  { %15 = sbr.rel (!%p13_p4) target bundleno = 1 (0x1), region = 74 }

</bundles_post_ra>
